<compile_context>
chip_gen: v6e
topology: v6e:2x2x1
jax: 0.10.0
libtpu: 0.0.40
codegen_flags: <defaults>
</compile_context>

<pallas_src>
import functools

import numpy as np
import jax
import jax.numpy as jnp
from jax.experimental import pallas as pl
from jax.experimental.pallas import tpu as pltpu

F32 = jnp.float32
EPS = 1e-5


# ----------------------------------------------------------------------------
# Fused kernel: conv1 -> BN1 -> conv2 -> BN2 -> fc1 -> BN -> fc2 -> BN -> out
# ----------------------------------------------------------------------------
def _fused_kernel(x_ref,
                  pr1_ref, band1_ref, bias1_ref, re1_ref, ro1_ref,
                  ce1_ref, co1_ref, gs1_ref, g1_ref, b1_ref, gt1_ref,
                  pr2_ref, band2_ref, bias2_ref, re2_ref, ro2_ref,
                  ce2_ref, co2_ref, gs2_ref, g2_ref, b2_ref, gt2_ref,
                  w1_ref, bf1_ref, g3_ref, b3_ref,
                  w2_ref, bf2_ref, g4_ref, b4_ref,
                  w3_ref, bo_ref,
                  o_ref, *, N):
    f32 = jnp.float32
    dot = functools.partial(jnp.dot, preferred_element_type=f32)

    # ---- hoist constant loads (load each VMEM tile once) --------------------
    pr1 = pr1_ref[...]; bias1 = bias1_ref[...]
    re1 = re1_ref[...]; ro1 = ro1_ref[...]; ce1 = ce1_ref[...]; co1 = co1_ref[...]
    gs1 = gs1_ref[...]; gt1 = gt1_ref[...]
    pr2 = pr2_ref[...]; bias2 = bias2_ref[...]
    re2 = re2_ref[...]; ro2 = ro2_ref[...]; ce2 = ce2_ref[...]; co2 = co2_ref[...]
    gs2 = gs2_ref[...]; gt2 = gt2_ref[...]
    band1 = [band1_ref[dh] for dh in range(5)]      # 5 x [28, 208]
    band2 = [band2_ref[dh] for dh in range(5)]      # 5 x [104, 176]
    w1 = [w1_ref[r] for r in range(5)]              # 5 x [80, 200]

    # ---- stage 1: Conv2d(1->8,k5,p1) + ReLU + MaxPool2x2 + BN1 batch stats --
    y1_list = []
    s1 = jnp.zeros((1, 8), f32)
    ss1 = jnp.zeros((1, 8), f32)
    for n in range(N):
        x2d = x_ref[n, 0]                                           # [28,28]
        xpad = dot(pr1, x2d)                                        # [30,28] (H pad)
        acc = dot(xpad[0:26, :], band1[0])                          # [26,208]
        for dh in range(1, 5):
            acc = acc + dot(xpad[dh:dh + 26, :], band1[dh])
        acc = jnp.maximum(acc + bias1, 0.0)                         # bias + ReLU
        rows = jnp.maximum(dot(re1, acc), dot(ro1, acc))            # [13,208]
        y = jnp.maximum(dot(rows, ce1), dot(rows, co1))             # [13,104]
        y1_list.append(y)
        s = jnp.sum(y, axis=0, keepdims=True)                       # [1,104]
        ss = jnp.sum(y * y, axis=0, keepdims=True)
        s1 = s1 + dot(s, gs1)                                       # [1,8]
        ss1 = ss1 + dot(ss, gs1)

    inv_n1 = 1.0 / float(N * 13 * 13)
    mean1 = s1 * inv_n1
    var1 = ss1 * inv_n1 - mean1 * mean1                             # biased var
    scale1 = g1_ref[...] * jax.lax.rsqrt(var1 + EPS)                # [1,8]
    shift1 = b1_ref[...] - mean1 * scale1
    scale1p = dot(scale1, gt1)                                      # [1,104]
    shift1p = dot(shift1, gt1)

    # ---- stage 2: BN1 apply + Conv2d(8->16,k5,p1) + ReLU + MaxPool + stats --
    y2_list = []
    s2 = jnp.zeros((1, 16), f32)
    ss2 = jnp.zeros((1, 16), f32)
    for n in range(N):
        y1n = y1_list[n] * scale1p + shift1p                        # [13,104]
        ypad = dot(pr2, y1n)                                        # [15,104]
        acc = dot(ypad[0:11, :], band2[0])                          # [11,176]
        for dh in range(1, 5):
            acc = acc + dot(ypad[dh:dh + 11, :], band2[dh])
        acc = jnp.maximum(acc + bias2, 0.0)
        rows = jnp.maximum(dot(re2, acc), dot(ro2, acc))            # [5,176]
        y = jnp.maximum(dot(rows, ce2), dot(rows, co2))             # [5,80]
        y2_list.append(y)
        s = jnp.sum(y, axis=0, keepdims=True)
        ss = jnp.sum(y * y, axis=0, keepdims=True)
        s2 = s2 + dot(s, gs2)                                       # [1,16]
        ss2 = ss2 + dot(ss, gs2)

    inv_n2 = 1.0 / float(N * 5 * 5)
    mean2 = s2 * inv_n2
    var2 = ss2 * inv_n2 - mean2 * mean2
    scale2 = g2_ref[...] * jax.lax.rsqrt(var2 + EPS)                # [1,16]
    shift2 = b2_ref[...] - mean2 * scale2
    scale2p = dot(scale2, gt2)                                      # [1,80]
    shift2p = dot(shift2, gt2)

    # ---- dense head: BN2 apply + fc1 + BN1d(200) + fc2 + BN1d(50) + out -----
    # Flatten is folded into the (pre-permuted) fc1 weights; per-image rows are
    # scattered into the batched [N,200] matrix with a one-hot multiply.
    rowsel = jax.lax.broadcasted_iota(jnp.int32, (N, 1), 0)         # [N,1]
    h1 = jnp.zeros((N, 200), f32)
    for n in range(N):
        y2n = y2_list[n] * scale2p + shift2p                        # [5,80]
        h1n = dot(y2n[0:1, :], w1[0])                               # [1,200]
        for r in range(1, 5):
            h1n = h1n + dot(y2n[r:r + 1, :], w1[r])
        onehot = (rowsel == n).astype(f32)                          # [N,1]
        h1 = h1 + onehot * h1n                                      # row-scatter
    h1 = h1 + bf1_ref[...]

    # BatchNorm1d(200), training mode (batch stats, biased variance)
    m = jnp.mean(h1, axis=0, keepdims=True)
    v = jnp.mean((h1 - m) ** 2, axis=0, keepdims=True)
    h1 = (h1 - m) * jax.lax.rsqrt(v + EPS) * g3_ref[...] + b3_ref[...]

    h2 = dot(h1, w2_ref[...]) + bf2_ref[...]                        # [N,50]
    m = jnp.mean(h2, axis=0, keepdims=True)
    v = jnp.mean((h2 - m) ** 2, axis=0, keepdims=True)
    h2 = (h2 - m) * jax.lax.rsqrt(v + EPS) * g4_ref[...] + b4_ref[...]

    o_ref[...] = dot(h2, w3_ref[...]) + bo_ref[...]                 # [N,10]


# ----------------------------------------------------------------------------
# pallas_call wrapper
# ----------------------------------------------------------------------------
def _full_spec(a):
    nd = a.ndim
    return pl.BlockSpec(a.shape, lambda i: (0,) * nd)


def baseline_forward(x_nchw, dp):
    N = x_nchw.shape[0]
    consts = (dp["pr1"], dp["band1"], dp["bias1p"], dp["re1"], dp["ro1"],
              dp["ce1"], dp["co1"], dp["gsum1"], dp["bn1_g"], dp["bn1_b"], dp["gt1"],
              dp["pr2"], dp["band2"], dp["bias2p"], dp["re2"], dp["ro2"],
              dp["ce2"], dp["co2"], dp["gsum2"], dp["bn2_g"], dp["bn2_b"], dp["gt2"],
              dp["w1"], dp["fc1_b"], dp["bn3_g"], dp["bn3_b"],
              dp["w2"], dp["fc2_b"], dp["bn4_g"], dp["bn4_b"],
              dp["w3"], dp["out_b"])
    kernel = functools.partial(_fused_kernel, N=N)
    return pl.pallas_call(
        kernel,
        grid=(1,),
        in_specs=[_full_spec(x_nchw)] + [_full_spec(c) for c in consts],
        out_specs=pl.BlockSpec((N, 10), lambda i: (0, 0)),
        out_shape=jax.ShapeDtypeStruct((N, 10), F32),
        compiler_params=pltpu.CompilerParams(
            dimension_semantics=("arbitrary",)),
    )(x_nchw, *consts)


# ----------------------------------------------------------------------------
# Parameter init (PyTorch-like shapes) and one-time preprocessing
# ----------------------------------------------------------------------------
def init_params(key):
    keys = jax.random.split(key, 10)
    f32 = jnp.float32
    return {
        "conv1_w": 0.1 * jax.random.normal(keys[0], (8, 1, 5, 5), f32),
        "conv1_b": 0.01 * jax.random.normal(keys[1], (8,), f32),
        "conv2_w": 0.1 * jax.random.normal(keys[2], (16, 8, 5, 5), f32),
        "conv2_b": 0.01 * jax.random.normal(keys[3], (16,), f32),
        "fc1_w": 0.05 * jax.random.normal(keys[4], (200, 400), f32),
        "fc1_b": 0.01 * jax.random.normal(keys[5], (200,), f32),
        "fc2_w": 0.05 * jax.random.normal(keys[6], (50, 200), f32),
        "fc2_b": 0.01 * jax.random.normal(keys[7], (50,), f32),
        "out_w": 0.05 * jax.random.normal(keys[8], (10, 50), f32),
        "out_b": 0.01 * jax.random.normal(keys[9], (10,), f32),
        "bn1_g": jnp.ones((8,), f32), "bn1_b": jnp.zeros((8,), f32),
        "bn2_g": jnp.ones((16,), f32), "bn2_b": jnp.zeros((16,), f32),
        "bn3_g": jnp.ones((200,), f32), "bn3_b": jnp.zeros((200,), f32),
        "bn4_g": jnp.ones((50,), f32), "bn4_b": jnp.zeros((50,), f32),
    }


def prepare_params(raw):
    """One-time (init-time) preprocessing: banded conv matrices, pool/pad/
    channel-sum one-hot matrices, packed biases, pre-transposed/permuted fc
    weights.  No per-forward weight transposes remain."""
    f32 = np.float32
    w1 = np.asarray(raw["conv1_w"], f32)   # [8,1,5,5]
    w2 = np.asarray(raw["conv2_w"], f32)   # [16,8,5,5]

    # Banded row-conv matrices: B[dh, w_in*Cin+ci, wo*Cout+co] (w-padding folded in)
    band1 = np.zeros((5, 28, 26 * 8), f32)
    for dh in range(5):
        for wo in range(26):
            for dw in range(5):
                w_in = wo + dw - 1
                if 0 <= w_in < 28:
                    band1[dh, w_in, wo * 8:(wo + 1) * 8] = w1[:, 0, dh, dw]

    band2 = np.zeros((5, 13 * 8, 11 * 16), f32)
    for dh in range(5):
        for wo in range(11):
            for dw in range(5):
                w_in = wo + dw - 1
                if 0 <= w_in < 13:
                    for ci in range(8):
                        band2[dh, w_in * 8 + ci, wo * 16:(wo + 1) * 16] = w2[:, ci, dh, dw]

    # zero-row (height) padding matrices
    pr1 = np.zeros((30, 28), f32); pr1[np.arange(1, 29), np.arange(28)] = 1.0
    pr2 = np.zeros((15, 13), f32); pr2[np.arange(1, 14), np.arange(13)] = 1.0

    # 2x2 max-pool one-hot selection matrices
    def row_sel(hp, ho):
        re = np.zeros((hp, ho), f32); ro = np.zeros((hp, ho), f32)
        re[np.arange(hp), 2 * np.arange(hp)] = 1.0
        ro[np.arange(hp), 2 * np.arange(hp) + 1] = 1.0
        return re, ro

    def col_sel(wo, wp, c):
        ce = np.zeros((wo * c, wp * c), f32); co = np.zeros((wo * c, wp * c), f32)
        for j in range(wp):
            for ch in range(c):
                ce[(2 * j) * c + ch, j * c + ch] = 1.0
                co[(2 * j + 1) * c + ch, j * c + ch] = 1.0
        return ce, co

    re1, ro1 = row_sel(13, 26)
    ce1, co1 = col_sel(26, 13, 8)
    re2, ro2 = row_sel(5, 11)
    ce2, co2 = col_sel(11, 5, 16)

    # per-channel group-sum (and its transpose = broadcast) for packed lanes
    gsum1 = np.tile(np.eye(8, dtype=f32), (13, 1))    # [104, 8]
    gsum2 = np.tile(np.eye(16, dtype=f32), (5, 1))    # [80, 16]

    # packed conv biases (lane index = wo*C + co)
    bias1p = np.tile(np.asarray(raw["conv1_b"], f32), 26)[None, :]   # [1,208]
    bias2p = np.tile(np.asarray(raw["conv2_b"], f32), 11)[None, :]   # [1,176]

    # fc1: pre-transposed + permuted so the packed activation layout
    # [h, w*16+c] matches PyTorch's NCHW flatten order (c*25 + h*5 + w).
    fc1_w = np.asarray(raw["fc1_w"], f32)              # [200, 400]
    lane = np.arange(80); wp = lane // 16; co = lane % 16
    w1m = np.zeros((5, 80, 200), f32)
    for r in range(5):
        w1m[r] = fc1_w[:, co * 25 + r * 5 + wp].T      # [80, 200]

    def row2d(a):
        return jnp.asarray(np.asarray(a, f32)[None, :])

    return {
        "band1": jnp.asarray(band1), "band2": jnp.asarray(band2),
        "pr1": jnp.asarray(pr1), "pr2": jnp.asarray(pr2),
        "re1": jnp.asarray(re1), "ro1": jnp.asarray(ro1),
        "ce1": jnp.asarray(ce1), "co1": jnp.asarray(co1),
        "re2": jnp.asarray(re2), "ro2": jnp.asarray(ro2),
        "ce2": jnp.asarray(ce2), "co2": jnp.asarray(co2),
        "gsum1": jnp.asarray(gsum1), "gt1": jnp.asarray(gsum1.T),
        "gsum2": jnp.asarray(gsum2), "gt2": jnp.asarray(gsum2.T),
        "bias1p": jnp.asarray(bias1p), "bias2p": jnp.asarray(bias2p),
        "w1": jnp.asarray(w1m),
        "fc1_b": row2d(raw["fc1_b"]),
        "w2": jnp.asarray(np.asarray(raw["fc2_w"], f32).T),   # [200,50]
        "fc2_b": row2d(raw["fc2_b"]),
        "w3": jnp.asarray(np.asarray(raw["out_w"], f32).T),   # [50,10]
        "out_b": row2d(raw["out_b"]),
        "bn1_g": row2d(raw["bn1_g"]), "bn1_b": row2d(raw["bn1_b"]),
        "bn2_g": row2d(raw["bn2_g"]), "bn2_b": row2d(raw["bn2_b"]),
        "bn3_g": row2d(raw["bn3_g"]), "bn3_b": row2d(raw["bn3_b"]),
        "bn4_g": row2d(raw["bn4_g"]), "bn4_b": row2d(raw["bn4_b"]),
    }


if __name__ == "__main__":
    key = jax.random.PRNGKey(0)
    pkey, xkey = jax.random.split(key)
    raw = init_params(pkey)
    dp = prepare_params(raw)

    # Input consistent with the module: two conv(k5,p1)+pool stages on 28x28
    # give exactly 16*5*5 features for dense1.
    x = jax.random.normal(xkey, (2, 1, 28, 28), jnp.float32)

    fwd = jax.jit(baseline_forward)
    out = fwd(x, dp)
    jax.block_until_ready(out)

    assert out.shape == (2, 10), out.shape
    assert out.dtype == jnp.float32
    assert bool(jnp.all(jnp.isfinite(out)))
    print("KERNEL_OK")
</pallas_src>

<mosaic_0001>
module attributes {stable_mosaic.version = 11 : i64} {
  func.func @_fused_kernel(%arg0: i32, %arg1: memref<2x1x28x28xf32, #tpu.memory_space<vmem>>, %arg2: memref<30x28xf32, #tpu.memory_space<vmem>>, %arg3: memref<5x28x208xf32, #tpu.memory_space<vmem>>, %arg4: memref<1x208xf32, #tpu.memory_space<vmem>>, %arg5: memref<13x26xf32, #tpu.memory_space<vmem>>, %arg6: memref<13x26xf32, #tpu.memory_space<vmem>>, %arg7: memref<208x104xf32, #tpu.memory_space<vmem>>, %arg8: memref<208x104xf32, #tpu.memory_space<vmem>>, %arg9: memref<104x8xf32, #tpu.memory_space<vmem>>, %arg10: memref<1x8xf32, #tpu.memory_space<vmem>>, %arg11: memref<1x8xf32, #tpu.memory_space<vmem>>, %arg12: memref<8x104xf32, #tpu.memory_space<vmem>>, %arg13: memref<15x13xf32, #tpu.memory_space<vmem>>, %arg14: memref<5x104x176xf32, #tpu.memory_space<vmem>>, %arg15: memref<1x176xf32, #tpu.memory_space<vmem>>, %arg16: memref<5x11xf32, #tpu.memory_space<vmem>>, %arg17: memref<5x11xf32, #tpu.memory_space<vmem>>, %arg18: memref<176x80xf32, #tpu.memory_space<vmem>>, %arg19: memref<176x80xf32, #tpu.memory_space<vmem>>, %arg20: memref<80x16xf32, #tpu.memory_space<vmem>>, %arg21: memref<1x16xf32, #tpu.memory_space<vmem>>, %arg22: memref<1x16xf32, #tpu.memory_space<vmem>>, %arg23: memref<16x80xf32, #tpu.memory_space<vmem>>, %arg24: memref<5x80x200xf32, #tpu.memory_space<vmem>>, %arg25: memref<1x200xf32, #tpu.memory_space<vmem>>, %arg26: memref<1x200xf32, #tpu.memory_space<vmem>>, %arg27: memref<1x200xf32, #tpu.memory_space<vmem>>, %arg28: memref<200x50xf32, #tpu.memory_space<vmem>>, %arg29: memref<1x50xf32, #tpu.memory_space<vmem>>, %arg30: memref<1x50xf32, #tpu.memory_space<vmem>>, %arg31: memref<1x50xf32, #tpu.memory_space<vmem>>, %arg32: memref<50x10xf32, #tpu.memory_space<vmem>>, %arg33: memref<1x10xf32, #tpu.memory_space<vmem>>, %arg34: memref<2x10xf32, #tpu.memory_space<vmem>>) attributes {dimension_semantics = [#tpu.dimension_semantics<arbitrary>], iteration_bounds = array<i64: 1>, scalar_prefetch = 0 : i64, scratch_operands = 0 : i64, tpu.core_type = #tpu.core_type<tc>, window_params = [{pipeline_mode = #tpu.pipeline_mode<synchronous>, transform_indices = @transform_0, window_bounds = array<i64: 2, 1, 28, 28>}, {pipeline_mode = #tpu.pipeline_mode<synchronous>, transform_indices = @transform_1, window_bounds = array<i64: 30, 28>}, {pipeline_mode = #tpu.pipeline_mode<synchronous>, transform_indices = @transform_2, window_bounds = array<i64: 5, 28, 208>}, {pipeline_mode = #tpu.pipeline_mode<synchronous>, transform_indices = @transform_3, window_bounds = array<i64: 1, 208>}, {pipeline_mode = #tpu.pipeline_mode<synchronous>, transform_indices = @transform_4, window_bounds = array<i64: 13, 26>}, {pipeline_mode = #tpu.pipeline_mode<synchronous>, transform_indices = @transform_5, window_bounds = array<i64: 13, 26>}, {pipeline_mode = #tpu.pipeline_mode<synchronous>, transform_indices = @transform_6, window_bounds = array<i64: 208, 104>}, {pipeline_mode = #tpu.pipeline_mode<synchronous>, transform_indices = @transform_7, window_bounds = array<i64: 208, 104>}, {pipeline_mode = #tpu.pipeline_mode<synchronous>, transform_indices = @transform_8, window_bounds = array<i64: 104, 8>}, {pipeline_mode = #tpu.pipeline_mode<synchronous>, transform_indices = @transform_9, window_bounds = array<i64: 1, 8>}, {pipeline_mode = #tpu.pipeline_mode<synchronous>, transform_indices = @transform_10, window_bounds = array<i64: 1, 8>}, {pipeline_mode = #tpu.pipeline_mode<synchronous>, transform_indices = @transform_11, window_bounds = array<i64: 8, 104>}, {pipeline_mode = #tpu.pipeline_mode<synchronous>, transform_indices = @transform_12, window_bounds = array<i64: 15, 13>}, {pipeline_mode = #tpu.pipeline_mode<synchronous>, transform_indices = @transform_13, window_bounds = array<i64: 5, 104, 176>}, {pipeline_mode = #tpu.pipeline_mode<synchronous>, transform_indices = @transform_14, window_bounds = array<i64: 1, 176>}, {pipeline_mode = #tpu.pipeline_mode<synchronous>, transform_indices = @transform_15, window_bounds = array<i64: 5, 11>}, {pipeline_mode = #tpu.pipeline_mode<synchronous>, transform_indices = @transform_16, window_bounds = array<i64: 5, 11>}, {pipeline_mode = #tpu.pipeline_mode<synchronous>, transform_indices = @transform_17, window_bounds = array<i64: 176, 80>}, {pipeline_mode = #tpu.pipeline_mode<synchronous>, transform_indices = @transform_18, window_bounds = array<i64: 176, 80>}, {pipeline_mode = #tpu.pipeline_mode<synchronous>, transform_indices = @transform_19, window_bounds = array<i64: 80, 16>}, {pipeline_mode = #tpu.pipeline_mode<synchronous>, transform_indices = @transform_20, window_bounds = array<i64: 1, 16>}, {pipeline_mode = #tpu.pipeline_mode<synchronous>, transform_indices = @transform_21, window_bounds = array<i64: 1, 16>}, {pipeline_mode = #tpu.pipeline_mode<synchronous>, transform_indices = @transform_22, window_bounds = array<i64: 16, 80>}, {pipeline_mode = #tpu.pipeline_mode<synchronous>, transform_indices = @transform_23, window_bounds = array<i64: 5, 80, 200>}, {pipeline_mode = #tpu.pipeline_mode<synchronous>, transform_indices = @transform_24, window_bounds = array<i64: 1, 200>}, {pipeline_mode = #tpu.pipeline_mode<synchronous>, transform_indices = @transform_25, window_bounds = array<i64: 1, 200>}, {pipeline_mode = #tpu.pipeline_mode<synchronous>, transform_indices = @transform_26, window_bounds = array<i64: 1, 200>}, {pipeline_mode = #tpu.pipeline_mode<synchronous>, transform_indices = @transform_27, window_bounds = array<i64: 200, 50>}, {pipeline_mode = #tpu.pipeline_mode<synchronous>, transform_indices = @transform_28, window_bounds = array<i64: 1, 50>}, {pipeline_mode = #tpu.pipeline_mode<synchronous>, transform_indices = @transform_29, window_bounds = array<i64: 1, 50>}, {pipeline_mode = #tpu.pipeline_mode<synchronous>, transform_indices = @transform_30, window_bounds = array<i64: 1, 50>}, {pipeline_mode = #tpu.pipeline_mode<synchronous>, transform_indices = @transform_31, window_bounds = array<i64: 50, 10>}, {pipeline_mode = #tpu.pipeline_mode<synchronous>, transform_indices = @transform_32, window_bounds = array<i64: 1, 10>}, {pipeline_mode = #tpu.pipeline_mode<synchronous>, transform_indices = @transform_33, window_bounds = array<i64: 2, 10>}]} {
    %c0 = arith.constant 0 : index
    %c0_0 = arith.constant 0 : index
    %0 = vector.load %arg2[%c0, %c0_0] : memref<30x28xf32, #tpu.memory_space<vmem>>, vector<30x28xf32>
    %c0_1 = arith.constant 0 : index
    %c0_2 = arith.constant 0 : index
    %1 = vector.load %arg4[%c0_1, %c0_2] : memref<1x208xf32, #tpu.memory_space<vmem>>, vector<1x208xf32>
    %c0_3 = arith.constant 0 : index
    %c0_4 = arith.constant 0 : index
    %2 = vector.load %arg5[%c0_3, %c0_4] : memref<13x26xf32, #tpu.memory_space<vmem>>, vector<13x26xf32>
    %c0_5 = arith.constant 0 : index
    %c0_6 = arith.constant 0 : index
    %3 = vector.load %arg6[%c0_5, %c0_6] : memref<13x26xf32, #tpu.memory_space<vmem>>, vector<13x26xf32>
    %c0_7 = arith.constant 0 : index
    %c0_8 = arith.constant 0 : index
    %4 = vector.load %arg7[%c0_7, %c0_8] : memref<208x104xf32, #tpu.memory_space<vmem>>, vector<208x104xf32>
    %c0_9 = arith.constant 0 : index
    %c0_10 = arith.constant 0 : index
    %5 = vector.load %arg8[%c0_9, %c0_10] : memref<208x104xf32, #tpu.memory_space<vmem>>, vector<208x104xf32>
    %c0_11 = arith.constant 0 : index
    %c0_12 = arith.constant 0 : index
    %6 = vector.load %arg9[%c0_11, %c0_12] : memref<104x8xf32, #tpu.memory_space<vmem>>, vector<104x8xf32>
    %c0_13 = arith.constant 0 : index
    %c0_14 = arith.constant 0 : index
    %7 = vector.load %arg12[%c0_13, %c0_14] : memref<8x104xf32, #tpu.memory_space<vmem>>, vector<8x104xf32>
    %c0_15 = arith.constant 0 : index
    %c0_16 = arith.constant 0 : index
    %8 = vector.load %arg13[%c0_15, %c0_16] : memref<15x13xf32, #tpu.memory_space<vmem>>, vector<15x13xf32>
    %c0_17 = arith.constant 0 : index
    %c0_18 = arith.constant 0 : index
    %9 = vector.load %arg15[%c0_17, %c0_18] : memref<1x176xf32, #tpu.memory_space<vmem>>, vector<1x176xf32>
    %c0_19 = arith.constant 0 : index
    %c0_20 = arith.constant 0 : index
    %10 = vector.load %arg16[%c0_19, %c0_20] : memref<5x11xf32, #tpu.memory_space<vmem>>, vector<5x11xf32>
    %c0_21 = arith.constant 0 : index
    %c0_22 = arith.constant 0 : index
    %11 = vector.load %arg17[%c0_21, %c0_22] : memref<5x11xf32, #tpu.memory_space<vmem>>, vector<5x11xf32>
    %c0_23 = arith.constant 0 : index
    %c0_24 = arith.constant 0 : index
    %12 = vector.load %arg18[%c0_23, %c0_24] : memref<176x80xf32, #tpu.memory_space<vmem>>, vector<176x80xf32>
    %c0_25 = arith.constant 0 : index
    %c0_26 = arith.constant 0 : index
    %13 = vector.load %arg19[%c0_25, %c0_26] : memref<176x80xf32, #tpu.memory_space<vmem>>, vector<176x80xf32>
    %c0_27 = arith.constant 0 : index
    %c0_28 = arith.constant 0 : index
    %14 = vector.load %arg20[%c0_27, %c0_28] : memref<80x16xf32, #tpu.memory_space<vmem>>, vector<80x16xf32>
    %c0_29 = arith.constant 0 : index
    %c0_30 = arith.constant 0 : index
    %15 = vector.load %arg23[%c0_29, %c0_30] : memref<16x80xf32, #tpu.memory_space<vmem>>, vector<16x80xf32>
    %c0_31 = arith.constant 0 : index
    %c0_32 = arith.constant 0 : index
    %c0_33 = arith.constant 0 : index
    %16 = vector.load %arg3[%c0_31, %c0_32, %c0_33] : memref<5x28x208xf32, #tpu.memory_space<vmem>>, vector<1x28x208xf32>
    %17 = vector.shape_cast %16 : vector<1x28x208xf32> to vector<28x208xf32>
    %c1 = arith.constant 1 : index
    %c0_34 = arith.constant 0 : index
    %c0_35 = arith.constant 0 : index
    %18 = vector.load %arg3[%c1, %c0_34, %c0_35] : memref<5x28x208xf32, #tpu.memory_space<vmem>>, vector<1x28x208xf32>
    %19 = vector.shape_cast %18 : vector<1x28x208xf32> to vector<28x208xf32>
    %c2 = arith.constant 2 : index
    %c0_36 = arith.constant 0 : index
    %c0_37 = arith.constant 0 : index
    %20 = vector.load %arg3[%c2, %c0_36, %c0_37] : memref<5x28x208xf32, #tpu.memory_space<vmem>>, vector<1x28x208xf32>
    %21 = vector.shape_cast %20 : vector<1x28x208xf32> to vector<28x208xf32>
    %c3 = arith.constant 3 : index
    %c0_38 = arith.constant 0 : index
    %c0_39 = arith.constant 0 : index
    %22 = vector.load %arg3[%c3, %c0_38, %c0_39] : memref<5x28x208xf32, #tpu.memory_space<vmem>>, vector<1x28x208xf32>
    %23 = vector.shape_cast %22 : vector<1x28x208xf32> to vector<28x208xf32>
    %c4 = arith.constant 4 : index
    %c0_40 = arith.constant 0 : index
    %c0_41 = arith.constant 0 : index
    %24 = vector.load %arg3[%c4, %c0_40, %c0_41] : memref<5x28x208xf32, #tpu.memory_space<vmem>>, vector<1x28x208xf32>
    %25 = vector.shape_cast %24 : vector<1x28x208xf32> to vector<28x208xf32>
    %c0_42 = arith.constant 0 : index
    %c0_43 = arith.constant 0 : index
    %c0_44 = arith.constant 0 : index
    %26 = vector.load %arg14[%c0_42, %c0_43, %c0_44] : memref<5x104x176xf32, #tpu.memory_space<vmem>>, vector<1x104x176xf32>
    %27 = vector.shape_cast %26 : vector<1x104x176xf32> to vector<104x176xf32>
    %c1_45 = arith.constant 1 : index
    %c0_46 = arith.constant 0 : index
    %c0_47 = arith.constant 0 : index
    %28 = vector.load %arg14[%c1_45, %c0_46, %c0_47] : memref<5x104x176xf32, #tpu.memory_space<vmem>>, vector<1x104x176xf32>
    %29 = vector.shape_cast %28 : vector<1x104x176xf32> to vector<104x176xf32>
    %c2_48 = arith.constant 2 : index
    %c0_49 = arith.constant 0 : index
    %c0_50 = arith.constant 0 : index
    %30 = vector.load %arg14[%c2_48, %c0_49, %c0_50] : memref<5x104x176xf32, #tpu.memory_space<vmem>>, vector<1x104x176xf32>
    %31 = vector.shape_cast %30 : vector<1x104x176xf32> to vector<104x176xf32>
    %c3_51 = arith.constant 3 : index
    %c0_52 = arith.constant 0 : index
    %c0_53 = arith.constant 0 : index
    %32 = vector.load %arg14[%c3_51, %c0_52, %c0_53] : memref<5x104x176xf32, #tpu.memory_space<vmem>>, vector<1x104x176xf32>
    %33 = vector.shape_cast %32 : vector<1x104x176xf32> to vector<104x176xf32>
    %c4_54 = arith.constant 4 : index
    %c0_55 = arith.constant 0 : index
    %c0_56 = arith.constant 0 : index
    %34 = vector.load %arg14[%c4_54, %c0_55, %c0_56] : memref<5x104x176xf32, #tpu.memory_space<vmem>>, vector<1x104x176xf32>
    %35 = vector.shape_cast %34 : vector<1x104x176xf32> to vector<104x176xf32>
    %c0_57 = arith.constant 0 : index
    %c0_58 = arith.constant 0 : index
    %c0_59 = arith.constant 0 : index
    %36 = vector.load %arg24[%c0_57, %c0_58, %c0_59] : memref<5x80x200xf32, #tpu.memory_space<vmem>>, vector<1x80x200xf32>
    %37 = vector.shape_cast %36 : vector<1x80x200xf32> to vector<80x200xf32>
    %c1_60 = arith.constant 1 : index
    %c0_61 = arith.constant 0 : index
    %c0_62 = arith.constant 0 : index
    %38 = vector.load %arg24[%c1_60, %c0_61, %c0_62] : memref<5x80x200xf32, #tpu.memory_space<vmem>>, vector<1x80x200xf32>
    %39 = vector.shape_cast %38 : vector<1x80x200xf32> to vector<80x200xf32>
    %c2_63 = arith.constant 2 : index
    %c0_64 = arith.constant 0 : index
    %c0_65 = arith.constant 0 : index
    %40 = vector.load %arg24[%c2_63, %c0_64, %c0_65] : memref<5x80x200xf32, #tpu.memory_space<vmem>>, vector<1x80x200xf32>
    %41 = vector.shape_cast %40 : vector<1x80x200xf32> to vector<80x200xf32>
    %c3_66 = arith.constant 3 : index
    %c0_67 = arith.constant 0 : index
    %c0_68 = arith.constant 0 : index
    %42 = vector.load %arg24[%c3_66, %c0_67, %c0_68] : memref<5x80x200xf32, #tpu.memory_space<vmem>>, vector<1x80x200xf32>
    %43 = vector.shape_cast %42 : vector<1x80x200xf32> to vector<80x200xf32>
    %c4_69 = arith.constant 4 : index
    %c0_70 = arith.constant 0 : index
    %c0_71 = arith.constant 0 : index
    %44 = vector.load %arg24[%c4_69, %c0_70, %c0_71] : memref<5x80x200xf32, #tpu.memory_space<vmem>>, vector<1x80x200xf32>
    %45 = vector.shape_cast %44 : vector<1x80x200xf32> to vector<80x200xf32>
    %cst = arith.constant 0.000000e+00 : f32
    %46 = vector.broadcast %cst : f32 to vector<1x8xf32>
    %cst_72 = arith.constant 0.000000e+00 : f32
    %47 = vector.broadcast %cst_72 : f32 to vector<1x8xf32>
    %c0_73 = arith.constant 0 : index
    %c0_74 = arith.constant 0 : index
    %c0_75 = arith.constant 0 : index
    %c0_76 = arith.constant 0 : index
    %48 = vector.load %arg1[%c0_73, %c0_74, %c0_75, %c0_76] : memref<2x1x28x28xf32, #tpu.memory_space<vmem>>, vector<1x1x28x28xf32>
    %49 = vector.shape_cast %48 : vector<1x1x28x28xf32> to vector<28x28xf32>
    %cst_77 = arith.constant dense<0.000000e+00> : vector<30x28xf32>
    %50 = tpu.matmul %0, %49, %cst_77 {dimension_numbers = #tpu.dot_dimension_numbers<[1], [0], [0], [1], [0, 0, 1, 1], [], []>} : vector<30x28xf32>, vector<28x28xf32>, vector<30x28xf32> -> vector<30x28xf32>
    %51 = vector.extract_strided_slice %50 {offsets = [0, 0], sizes = [26, 28], strides = [1, 1]} : vector<30x28xf32> to vector<26x28xf32>
    %cst_78 = arith.constant dense<0.000000e+00> : vector<26x208xf32>
    %52 = tpu.matmul %51, %17, %cst_78 {dimension_numbers = #tpu.dot_dimension_numbers<[1], [0], [0], [1], [0, 0, 1, 1], [], []>} : vector<26x28xf32>, vector<28x208xf32>, vector<26x208xf32> -> vector<26x208xf32>
    %53 = vector.extract_strided_slice %50 {offsets = [1, 0], sizes = [26, 28], strides = [1, 1]} : vector<30x28xf32> to vector<26x28xf32>
    %cst_79 = arith.constant dense<0.000000e+00> : vector<26x208xf32>
    %54 = tpu.matmul %53, %19, %cst_79 {dimension_numbers = #tpu.dot_dimension_numbers<[1], [0], [0], [1], [0, 0, 1, 1], [], []>} : vector<26x28xf32>, vector<28x208xf32>, vector<26x208xf32> -> vector<26x208xf32>
    %55 = arith.addf %52, %54 : vector<26x208xf32>
    %56 = vector.extract_strided_slice %50 {offsets = [2, 0], sizes = [26, 28], strides = [1, 1]} : vector<30x28xf32> to vector<26x28xf32>
    %cst_80 = arith.constant dense<0.000000e+00> : vector<26x208xf32>
    %57 = tpu.matmul %56, %21, %cst_80 {dimension_numbers = #tpu.dot_dimension_numbers<[1], [0], [0], [1], [0, 0, 1, 1], [], []>} : vector<26x28xf32>, vector<28x208xf32>, vector<26x208xf32> -> vector<26x208xf32>
    %58 = arith.addf %55, %57 : vector<26x208xf32>
    %59 = vector.extract_strided_slice %50 {offsets = [3, 0], sizes = [26, 28], strides = [1, 1]} : vector<30x28xf32> to vector<26x28xf32>
    %cst_81 = arith.constant dense<0.000000e+00> : vector<26x208xf32>
    %60 = tpu.matmul %59, %23, %cst_81 {dimension_numbers = #tpu.dot_dimension_numbers<[1], [0], [0], [1], [0, 0, 1, 1], [], []>} : vector<26x28xf32>, vector<28x208xf32>, vector<26x208xf32> -> vector<26x208xf32>
    %61 = arith.addf %58, %60 : vector<26x208xf32>
    %62 = vector.extract_strided_slice %50 {offsets = [4, 0], sizes = [26, 28], strides = [1, 1]} : vector<30x28xf32> to vector<26x28xf32>
    %cst_82 = arith.constant dense<0.000000e+00> : vector<26x208xf32>
    %63 = tpu.matmul %62, %25, %cst_82 {dimension_numbers = #tpu.dot_dimension_numbers<[1], [0], [0], [1], [0, 0, 1, 1], [], []>} : vector<26x28xf32>, vector<28x208xf32>, vector<26x208xf32> -> vector<26x208xf32>
    %64 = arith.addf %61, %63 : vector<26x208xf32>
    %65 = vector.broadcast %1 : vector<1x208xf32> to vector<26x208xf32>
    %66 = arith.addf %64, %65 : vector<26x208xf32>
    %cst_83 = arith.constant 0.000000e+00 : f32
    %67 = vector.broadcast %cst_83 : f32 to vector<26x208xf32>
    %68 = arith.maximumf %66, %67 : vector<26x208xf32>
    %cst_84 = arith.constant dense<0.000000e+00> : vector<13x208xf32>
    %69 = tpu.matmul %2, %68, %cst_84 {dimension_numbers = #tpu.dot_dimension_numbers<[1], [0], [0], [1], [0, 0, 1, 1], [], []>} : vector<13x26xf32>, vector<26x208xf32>, vector<13x208xf32> -> vector<13x208xf32>
    %cst_85 = arith.constant dense<0.000000e+00> : vector<13x208xf32>
    %70 = tpu.matmul %3, %68, %cst_85 {dimension_numbers = #tpu.dot_dimension_numbers<[1], [0], [0], [1], [0, 0, 1, 1], [], []>} : vector<13x26xf32>, vector<26x208xf32>, vector<13x208xf32> -> vector<13x208xf32>
    %71 = arith.maximumf %69, %70 : vector<13x208xf32>
    %cst_86 = arith.constant dense<0.000000e+00> : vector<13x104xf32>
    %72 = tpu.matmul %71, %4, %cst_86 {dimension_numbers = #tpu.dot_dimension_numbers<[1], [0], [0], [1], [0, 0, 1, 1], [], []>} : vector<13x208xf32>, vector<208x104xf32>, vector<13x104xf32> -> vector<13x104xf32>
    %cst_87 = arith.constant dense<0.000000e+00> : vector<13x104xf32>
    %73 = tpu.matmul %71, %5, %cst_87 {dimension_numbers = #tpu.dot_dimension_numbers<[1], [0], [0], [1], [0, 0, 1, 1], [], []>} : vector<13x208xf32>, vector<208x104xf32>, vector<13x104xf32> -> vector<13x104xf32>
    %74 = arith.maximumf %72, %73 : vector<13x104xf32>
    %cst_88 = arith.constant dense<0.000000e+00> : vector<104xf32>
    %75 = vector.multi_reduction <add>, %74, %cst_88 [0] : vector<13x104xf32> to vector<104xf32>
    %76 = vector.shape_cast %75 : vector<104xf32> to vector<1x104xf32>
    %77 = arith.mulf %74, %74 : vector<13x104xf32>
    %cst_89 = arith.constant dense<0.000000e+00> : vector<104xf32>
    %78 = vector.multi_reduction <add>, %77, %cst_89 [0] : vector<13x104xf32> to vector<104xf32>
    %79 = vector.shape_cast %78 : vector<104xf32> to vector<1x104xf32>
    %cst_90 = arith.constant dense<0.000000e+00> : vector<1x8xf32>
    %80 = tpu.matmul %76, %6, %cst_90 {dimension_numbers = #tpu.dot_dimension_numbers<[1], [0], [0], [1], [0, 0, 1, 1], [], []>} : vector<1x104xf32>, vector<104x8xf32>, vector<1x8xf32> -> vector<1x8xf32>
    %81 = arith.addf %46, %80 : vector<1x8xf32>
    %cst_91 = arith.constant dense<0.000000e+00> : vector<1x8xf32>
    %82 = tpu.matmul %79, %6, %cst_91 {dimension_numbers = #tpu.dot_dimension_numbers<[1], [0], [0], [1], [0, 0, 1, 1], [], []>} : vector<1x104xf32>, vector<104x8xf32>, vector<1x8xf32> -> vector<1x8xf32>
    %83 = arith.addf %47, %82 : vector<1x8xf32>
    %c1_92 = arith.constant 1 : index
    %c0_93 = arith.constant 0 : index
    %c0_94 = arith.constant 0 : index
    %c0_95 = arith.constant 0 : index
    %84 = vector.load %arg1[%c1_92, %c0_93, %c0_94, %c0_95] : memref<2x1x28x28xf32, #tpu.memory_space<vmem>>, vector<1x1x28x28xf32>
    %85 = vector.shape_cast %84 : vector<1x1x28x28xf32> to vector<28x28xf32>
    %cst_96 = arith.constant dense<0.000000e+00> : vector<30x28xf32>
    %86 = tpu.matmul %0, %85, %cst_96 {dimension_numbers = #tpu.dot_dimension_numbers<[1], [0], [0], [1], [0, 0, 1, 1], [], []>} : vector<30x28xf32>, vector<28x28xf32>, vector<30x28xf32> -> vector<30x28xf32>
    %87 = vector.extract_strided_slice %86 {offsets = [0, 0], sizes = [26, 28], strides = [1, 1]} : vector<30x28xf32> to vector<26x28xf32>
    %cst_97 = arith.constant dense<0.000000e+00> : vector<26x208xf32>
    %88 = tpu.matmul %87, %17, %cst_97 {dimension_numbers = #tpu.dot_dimension_numbers<[1], [0], [0], [1], [0, 0, 1, 1], [], []>} : vector<26x28xf32>, vector<28x208xf32>, vector<26x208xf32> -> vector<26x208xf32>
    %89 = vector.extract_strided_slice %86 {offsets = [1, 0], sizes = [26, 28], strides = [1, 1]} : vector<30x28xf32> to vector<26x28xf32>
    %cst_98 = arith.constant dense<0.000000e+00> : vector<26x208xf32>
    %90 = tpu.matmul %89, %19, %cst_98 {dimension_numbers = #tpu.dot_dimension_numbers<[1], [0], [0], [1], [0, 0, 1, 1], [], []>} : vector<26x28xf32>, vector<28x208xf32>, vector<26x208xf32> -> vector<26x208xf32>
    %91 = arith.addf %88, %90 : vector<26x208xf32>
    %92 = vector.extract_strided_slice %86 {offsets = [2, 0], sizes = [26, 28], strides = [1, 1]} : vector<30x28xf32> to vector<26x28xf32>
    %cst_99 = arith.constant dense<0.000000e+00> : vector<26x208xf32>
    %93 = tpu.matmul %92, %21, %cst_99 {dimension_numbers = #tpu.dot_dimension_numbers<[1], [0], [0], [1], [0, 0, 1, 1], [], []>} : vector<26x28xf32>, vector<28x208xf32>, vector<26x208xf32> -> vector<26x208xf32>
    %94 = arith.addf %91, %93 : vector<26x208xf32>
    %95 = vector.extract_strided_slice %86 {offsets = [3, 0], sizes = [26, 28], strides = [1, 1]} : vector<30x28xf32> to vector<26x28xf32>
    %cst_100 = arith.constant dense<0.000000e+00> : vector<26x208xf32>
    %96 = tpu.matmul %95, %23, %cst_100 {dimension_numbers = #tpu.dot_dimension_numbers<[1], [0], [0], [1], [0, 0, 1, 1], [], []>} : vector<26x28xf32>, vector<28x208xf32>, vector<26x208xf32> -> vector<26x208xf32>
    %97 = arith.addf %94, %96 : vector<26x208xf32>
    %98 = vector.extract_strided_slice %86 {offsets = [4, 0], sizes = [26, 28], strides = [1, 1]} : vector<30x28xf32> to vector<26x28xf32>
    %cst_101 = arith.constant dense<0.000000e+00> : vector<26x208xf32>
    %99 = tpu.matmul %98, %25, %cst_101 {dimension_numbers = #tpu.dot_dimension_numbers<[1], [0], [0], [1], [0, 0, 1, 1], [], []>} : vector<26x28xf32>, vector<28x208xf32>, vector<26x208xf32> -> vector<26x208xf32>
    %100 = arith.addf %97, %99 : vector<26x208xf32>
    %101 = vector.broadcast %1 : vector<1x208xf32> to vector<26x208xf32>
    %102 = arith.addf %100, %101 : vector<26x208xf32>
    %cst_102 = arith.constant 0.000000e+00 : f32
    %103 = vector.broadcast %cst_102 : f32 to vector<26x208xf32>
    %104 = arith.maximumf %102, %103 : vector<26x208xf32>
    %cst_103 = arith.constant dense<0.000000e+00> : vector<13x208xf32>
    %105 = tpu.matmul %2, %104, %cst_103 {dimension_numbers = #tpu.dot_dimension_numbers<[1], [0], [0], [1], [0, 0, 1, 1], [], []>} : vector<13x26xf32>, vector<26x208xf32>, vector<13x208xf32> -> vector<13x208xf32>
    %cst_104 = arith.constant dense<0.000000e+00> : vector<13x208xf32>
    %106 = tpu.matmul %3, %104, %cst_104 {dimension_numbers = #tpu.dot_dimension_numbers<[1], [0], [0], [1], [0, 0, 1, 1], [], []>} : vector<13x26xf32>, vector<26x208xf32>, vector<13x208xf32> -> vector<13x208xf32>
    %107 = arith.maximumf %105, %106 : vector<13x208xf32>
    %cst_105 = arith.constant dense<0.000000e+00> : vector<13x104xf32>
    %108 = tpu.matmul %107, %4, %cst_105 {dimension_numbers = #tpu.dot_dimension_numbers<[1], [0], [0], [1], [0, 0, 1, 1], [], []>} : vector<13x208xf32>, vector<208x104xf32>, vector<13x104xf32> -> vector<13x104xf32>
    %cst_106 = arith.constant dense<0.000000e+00> : vector<13x104xf32>
    %109 = tpu.matmul %107, %5, %cst_106 {dimension_numbers = #tpu.dot_dimension_numbers<[1], [0], [0], [1], [0, 0, 1, 1], [], []>} : vector<13x208xf32>, vector<208x104xf32>, vector<13x104xf32> -> vector<13x104xf32>
    %110 = arith.maximumf %108, %109 : vector<13x104xf32>
    %cst_107 = arith.constant dense<0.000000e+00> : vector<104xf32>
    %111 = vector.multi_reduction <add>, %110, %cst_107 [0] : vector<13x104xf32> to vector<104xf32>
    %112 = vector.shape_cast %111 : vector<104xf32> to vector<1x104xf32>
    %113 = arith.mulf %110, %110 : vector<13x104xf32>
    %cst_108 = arith.constant dense<0.000000e+00> : vector<104xf32>
    %114 = vector.multi_reduction <add>, %113, %cst_108 [0] : vector<13x104xf32> to vector<104xf32>
    %115 = vector.shape_cast %114 : vector<104xf32> to vector<1x104xf32>
    %cst_109 = arith.constant dense<0.000000e+00> : vector<1x8xf32>
    %116 = tpu.matmul %112, %6, %cst_109 {dimension_numbers = #tpu.dot_dimension_numbers<[1], [0], [0], [1], [0, 0, 1, 1], [], []>} : vector<1x104xf32>, vector<104x8xf32>, vector<1x8xf32> -> vector<1x8xf32>
    %117 = arith.addf %81, %116 : vector<1x8xf32>
    %cst_110 = arith.constant dense<0.000000e+00> : vector<1x8xf32>
    %118 = tpu.matmul %115, %6, %cst_110 {dimension_numbers = #tpu.dot_dimension_numbers<[1], [0], [0], [1], [0, 0, 1, 1], [], []>} : vector<1x104xf32>, vector<104x8xf32>, vector<1x8xf32> -> vector<1x8xf32>
    %119 = arith.addf %83, %118 : vector<1x8xf32>
    %cst_111 = arith.constant 2.958580e-03 : f32
    %120 = vector.broadcast %cst_111 : f32 to vector<1x8xf32>
    %121 = arith.mulf %117, %120 : vector<1x8xf32>
    %cst_112 = arith.constant 2.958580e-03 : f32
    %122 = vector.broadcast %cst_112 : f32 to vector<1x8xf32>
    %123 = arith.mulf %119, %122 : vector<1x8xf32>
    %124 = arith.mulf %121, %121 : vector<1x8xf32>
    %125 = arith.subf %123, %124 : vector<1x8xf32>
    %c0_113 = arith.constant 0 : index
    %c0_114 = arith.constant 0 : index
    %126 = vector.load %arg10[%c0_113, %c0_114] : memref<1x8xf32, #tpu.memory_space<vmem>>, vector<1x8xf32>
    %cst_115 = arith.constant 9.99999974E-6 : f32
    %127 = vector.broadcast %cst_115 : f32 to vector<1x8xf32>
    %128 = arith.addf %125, %127 : vector<1x8xf32>
    %129 = math.rsqrt %128 : vector<1x8xf32>
    %130 = arith.mulf %126, %129 : vector<1x8xf32>
    %c0_116 = arith.constant 0 : index
    %c0_117 = arith.constant 0 : index
    %131 = vector.load %arg11[%c0_116, %c0_117] : memref<1x8xf32, #tpu.memory_space<vmem>>, vector<1x8xf32>
    %132 = arith.mulf %121, %130 : vector<1x8xf32>
    %133 = arith.subf %131, %132 : vector<1x8xf32>
    %cst_118 = arith.constant dense<0.000000e+00> : vector<1x104xf32>
    %134 = tpu.matmul %130, %7, %cst_118 {dimension_numbers = #tpu.dot_dimension_numbers<[1], [0], [0], [1], [0, 0, 1, 1], [], []>} : vector<1x8xf32>, vector<8x104xf32>, vector<1x104xf32> -> vector<1x104xf32>
    %cst_119 = arith.constant dense<0.000000e+00> : vector<1x104xf32>
    %135 = tpu.matmul %133, %7, %cst_119 {dimension_numbers = #tpu.dot_dimension_numbers<[1], [0], [0], [1], [0, 0, 1, 1], [], []>} : vector<1x8xf32>, vector<8x104xf32>, vector<1x104xf32> -> vector<1x104xf32>
    %cst_120 = arith.constant 0.000000e+00 : f32
    %136 = vector.broadcast %cst_120 : f32 to vector<1x16xf32>
    %cst_121 = arith.constant 0.000000e+00 : f32
    %137 = vector.broadcast %cst_121 : f32 to vector<1x16xf32>
    %138 = vector.broadcast %134 : vector<1x104xf32> to vector<13x104xf32>
    %139 = arith.mulf %74, %138 : vector<13x104xf32>
    %140 = vector.broadcast %135 : vector<1x104xf32> to vector<13x104xf32>
    %141 = arith.addf %139, %140 : vector<13x104xf32>
    %cst_122 = arith.constant dense<0.000000e+00> : vector<15x104xf32>
    %142 = tpu.matmul %8, %141, %cst_122 {dimension_numbers = #tpu.dot_dimension_numbers<[1], [0], [0], [1], [0, 0, 1, 1], [], []>} : vector<15x13xf32>, vector<13x104xf32>, vector<15x104xf32> -> vector<15x104xf32>
    %143 = vector.extract_strided_slice %142 {offsets = [0, 0], sizes = [11, 104], strides = [1, 1]} : vector<15x104xf32> to vector<11x104xf32>
    %cst_123 = arith.constant dense<0.000000e+00> : vector<11x176xf32>
    %144 = tpu.matmul %143, %27, %cst_123 {dimension_numbers = #tpu.dot_dimension_numbers<[1], [0], [0], [1], [0, 0, 1, 1], [], []>} : vector<11x104xf32>, vector<104x176xf32>, vector<11x176xf32> -> vector<11x176xf32>
    %145 = vector.extract_strided_slice %142 {offsets = [1, 0], sizes = [11, 104], strides = [1, 1]} : vector<15x104xf32> to vector<11x104xf32>
    %cst_124 = arith.constant dense<0.000000e+00> : vector<11x176xf32>
    %146 = tpu.matmul %145, %29, %cst_124 {dimension_numbers = #tpu.dot_dimension_numbers<[1], [0], [0], [1], [0, 0, 1, 1], [], []>} : vector<11x104xf32>, vector<104x176xf32>, vector<11x176xf32> -> vector<11x176xf32>
    %147 = arith.addf %144, %146 : vector<11x176xf32>
    %148 = vector.extract_strided_slice %142 {offsets = [2, 0], sizes = [11, 104], strides = [1, 1]} : vector<15x104xf32> to vector<11x104xf32>
    %cst_125 = arith.constant dense<0.000000e+00> : vector<11x176xf32>
    %149 = tpu.matmul %148, %31, %cst_125 {dimension_numbers = #tpu.dot_dimension_numbers<[1], [0], [0], [1], [0, 0, 1, 1], [], []>} : vector<11x104xf32>, vector<104x176xf32>, vector<11x176xf32> -> vector<11x176xf32>
    %150 = arith.addf %147, %149 : vector<11x176xf32>
    %151 = vector.extract_strided_slice %142 {offsets = [3, 0], sizes = [11, 104], strides = [1, 1]} : vector<15x104xf32> to vector<11x104xf32>
    %cst_126 = arith.constant dense<0.000000e+00> : vector<11x176xf32>
    %152 = tpu.matmul %151, %33, %cst_126 {dimension_numbers = #tpu.dot_dimension_numbers<[1], [0], [0], [1], [0, 0, 1, 1], [], []>} : vector<11x104xf32>, vector<104x176xf32>, vector<11x176xf32> -> vector<11x176xf32>
    %153 = arith.addf %150, %152 : vector<11x176xf32>
    %154 = vector.extract_strided_slice %142 {offsets = [4, 0], sizes = [11, 104], strides = [1, 1]} : vector<15x104xf32> to vector<11x104xf32>
    %cst_127 = arith.constant dense<0.000000e+00> : vector<11x176xf32>
    %155 = tpu.matmul %154, %35, %cst_127 {dimension_numbers = #tpu.dot_dimension_numbers<[1], [0], [0], [1], [0, 0, 1, 1], [], []>} : vector<11x104xf32>, vector<104x176xf32>, vector<11x176xf32> -> vector<11x176xf32>
    %156 = arith.addf %153, %155 : vector<11x176xf32>
    %157 = vector.broadcast %9 : vector<1x176xf32> to vector<11x176xf32>
    %158 = arith.addf %156, %157 : vector<11x176xf32>
    %cst_128 = arith.constant 0.000000e+00 : f32
    %159 = vector.broadcast %cst_128 : f32 to vector<11x176xf32>
    %160 = arith.maximumf %158, %159 : vector<11x176xf32>
    %cst_129 = arith.constant dense<0.000000e+00> : vector<5x176xf32>
    %161 = tpu.matmul %10, %160, %cst_129 {dimension_numbers = #tpu.dot_dimension_numbers<[1], [0], [0], [1], [0, 0, 1, 1], [], []>} : vector<5x11xf32>, vector<11x176xf32>, vector<5x176xf32> -> vector<5x176xf32>
    %cst_130 = arith.constant dense<0.000000e+00> : vector<5x176xf32>
    %162 = tpu.matmul %11, %160, %cst_130 {dimension_numbers = #tpu.dot_dimension_numbers<[1], [0], [0], [1], [0, 0, 1, 1], [], []>} : vector<5x11xf32>, vector<11x176xf32>, vector<5x176xf32> -> vector<5x176xf32>
    %163 = arith.maximumf %161, %162 : vector<5x176xf32>
    %cst_131 = arith.constant dense<0.000000e+00> : vector<5x80xf32>
    %164 = tpu.matmul %163, %12, %cst_131 {dimension_numbers = #tpu.dot_dimension_numbers<[1], [0], [0], [1], [0, 0, 1, 1], [], []>} : vector<5x176xf32>, vector<176x80xf32>, vector<5x80xf32> -> vector<5x80xf32>
    %cst_132 = arith.constant dense<0.000000e+00> : vector<5x80xf32>
    %165 = tpu.matmul %163, %13, %cst_132 {dimension_numbers = #tpu.dot_dimension_numbers<[1], [0], [0], [1], [0, 0, 1, 1], [], []>} : vector<5x176xf32>, vector<176x80xf32>, vector<5x80xf32> -> vector<5x80xf32>
    %166 = arith.maximumf %164, %165 : vector<5x80xf32>
    %cst_133 = arith.constant dense<0.000000e+00> : vector<80xf32>
    %167 = vector.multi_reduction <add>, %166, %cst_133 [0] : vector<5x80xf32> to vector<80xf32>
    %168 = vector.shape_cast %167 : vector<80xf32> to vector<1x80xf32>
    %169 = arith.mulf %166, %166 : vector<5x80xf32>
    %cst_134 = arith.constant dense<0.000000e+00> : vector<80xf32>
    %170 = vector.multi_reduction <add>, %169, %cst_134 [0] : vector<5x80xf32> to vector<80xf32>
    %171 = vector.shape_cast %170 : vector<80xf32> to vector<1x80xf32>
    %cst_135 = arith.constant dense<0.000000e+00> : vector<1x16xf32>
    %172 = tpu.matmul %168, %14, %cst_135 {dimension_numbers = #tpu.dot_dimension_numbers<[1], [0], [0], [1], [0, 0, 1, 1], [], []>} : vector<1x80xf32>, vector<80x16xf32>, vector<1x16xf32> -> vector<1x16xf32>
    %173 = arith.addf %136, %172 : vector<1x16xf32>
    %cst_136 = arith.constant dense<0.000000e+00> : vector<1x16xf32>
    %174 = tpu.matmul %171, %14, %cst_136 {dimension_numbers = #tpu.dot_dimension_numbers<[1], [0], [0], [1], [0, 0, 1, 1], [], []>} : vector<1x80xf32>, vector<80x16xf32>, vector<1x16xf32> -> vector<1x16xf32>
    %175 = arith.addf %137, %174 : vector<1x16xf32>
    %176 = vector.broadcast %134 : vector<1x104xf32> to vector<13x104xf32>
    %177 = arith.mulf %110, %176 : vector<13x104xf32>
    %178 = vector.broadcast %135 : vector<1x104xf32> to vector<13x104xf32>
    %179 = arith.addf %177, %178 : vector<13x104xf32>
    %cst_137 = arith.constant dense<0.000000e+00> : vector<15x104xf32>
    %180 = tpu.matmul %8, %179, %cst_137 {dimension_numbers = #tpu.dot_dimension_numbers<[1], [0], [0], [1], [0, 0, 1, 1], [], []>} : vector<15x13xf32>, vector<13x104xf32>, vector<15x104xf32> -> vector<15x104xf32>
    %181 = vector.extract_strided_slice %180 {offsets = [0, 0], sizes = [11, 104], strides = [1, 1]} : vector<15x104xf32> to vector<11x104xf32>
    %cst_138 = arith.constant dense<0.000000e+00> : vector<11x176xf32>
    %182 = tpu.matmul %181, %27, %cst_138 {dimension_numbers = #tpu.dot_dimension_numbers<[1], [0], [0], [1], [0, 0, 1, 1], [], []>} : vector<11x104xf32>, vector<104x176xf32>, vector<11x176xf32> -> vector<11x176xf32>
    %183 = vector.extract_strided_slice %180 {offsets = [1, 0], sizes = [11, 104], strides = [1, 1]} : vector<15x104xf32> to vector<11x104xf32>
    %cst_139 = arith.constant dense<0.000000e+00> : vector<11x176xf32>
    %184 = tpu.matmul %183, %29, %cst_139 {dimension_numbers = #tpu.dot_dimension_numbers<[1], [0], [0], [1], [0, 0, 1, 1], [], []>} : vector<11x104xf32>, vector<104x176xf32>, vector<11x176xf32> -> vector<11x176xf32>
    %185 = arith.addf %182, %184 : vector<11x176xf32>
    %186 = vector.extract_strided_slice %180 {offsets = [2, 0], sizes = [11, 104], strides = [1, 1]} : vector<15x104xf32> to vector<11x104xf32>
    %cst_140 = arith.constant dense<0.000000e+00> : vector<11x176xf32>
    %187 = tpu.matmul %186, %31, %cst_140 {dimension_numbers = #tpu.dot_dimension_numbers<[1], [0], [0], [1], [0, 0, 1, 1], [], []>} : vector<11x104xf32>, vector<104x176xf32>, vector<11x176xf32> -> vector<11x176xf32>
    %188 = arith.addf %185, %187 : vector<11x176xf32>
    %189 = vector.extract_strided_slice %180 {offsets = [3, 0], sizes = [11, 104], strides = [1, 1]} : vector<15x104xf32> to vector<11x104xf32>
    %cst_141 = arith.constant dense<0.000000e+00> : vector<11x176xf32>
    %190 = tpu.matmul %189, %33, %cst_141 {dimension_numbers = #tpu.dot_dimension_numbers<[1], [0], [0], [1], [0, 0, 1, 1], [], []>} : vector<11x104xf32>, vector<104x176xf32>, vector<11x176xf32> -> vector<11x176xf32>
    %191 = arith.addf %188, %190 : vector<11x176xf32>
    %192 = vector.extract_strided_slice %180 {offsets = [4, 0], sizes = [11, 104], strides = [1, 1]} : vector<15x104xf32> to vector<11x104xf32>
    %cst_142 = arith.constant dense<0.000000e+00> : vector<11x176xf32>
    %193 = tpu.matmul %192, %35, %cst_142 {dimension_numbers = #tpu.dot_dimension_numbers<[1], [0], [0], [1], [0, 0, 1, 1], [], []>} : vector<11x104xf32>, vector<104x176xf32>, vector<11x176xf32> -> vector<11x176xf32>
    %194 = arith.addf %191, %193 : vector<11x176xf32>
    %195 = vector.broadcast %9 : vector<1x176xf32> to vector<11x176xf32>
    %196 = arith.addf %194, %195 : vector<11x176xf32>
    %cst_143 = arith.constant 0.000000e+00 : f32
    %197 = vector.broadcast %cst_143 : f32 to vector<11x176xf32>
    %198 = arith.maximumf %196, %197 : vector<11x176xf32>
    %cst_144 = arith.constant dense<0.000000e+00> : vector<5x176xf32>
    %199 = tpu.matmul %10, %198, %cst_144 {dimension_numbers = #tpu.dot_dimension_numbers<[1], [0], [0], [1], [0, 0, 1, 1], [], []>} : vector<5x11xf32>, vector<11x176xf32>, vector<5x176xf32> -> vector<5x176xf32>
    %cst_145 = arith.constant dense<0.000000e+00> : vector<5x176xf32>
    %200 = tpu.matmul %11, %198, %cst_145 {dimension_numbers = #tpu.dot_dimension_numbers<[1], [0], [0], [1], [0, 0, 1, 1], [], []>} : vector<5x11xf32>, vector<11x176xf32>, vector<5x176xf32> -> vector<5x176xf32>
    %201 = arith.maximumf %199, %200 : vector<5x176xf32>
    %cst_146 = arith.constant dense<0.000000e+00> : vector<5x80xf32>
    %202 = tpu.matmul %201, %12, %cst_146 {dimension_numbers = #tpu.dot_dimension_numbers<[1], [0], [0], [1], [0, 0, 1, 1], [], []>} : vector<5x176xf32>, vector<176x80xf32>, vector<5x80xf32> -> vector<5x80xf32>
    %cst_147 = arith.constant dense<0.000000e+00> : vector<5x80xf32>
    %203 = tpu.matmul %201, %13, %cst_147 {dimension_numbers = #tpu.dot_dimension_numbers<[1], [0], [0], [1], [0, 0, 1, 1], [], []>} : vector<5x176xf32>, vector<176x80xf32>, vector<5x80xf32> -> vector<5x80xf32>
    %204 = arith.maximumf %202, %203 : vector<5x80xf32>
    %cst_148 = arith.constant dense<0.000000e+00> : vector<80xf32>
    %205 = vector.multi_reduction <add>, %204, %cst_148 [0] : vector<5x80xf32> to vector<80xf32>
    %206 = vector.shape_cast %205 : vector<80xf32> to vector<1x80xf32>
    %207 = arith.mulf %204, %204 : vector<5x80xf32>
    %cst_149 = arith.constant dense<0.000000e+00> : vector<80xf32>
    %208 = vector.multi_reduction <add>, %207, %cst_149 [0] : vector<5x80xf32> to vector<80xf32>
    %209 = vector.shape_cast %208 : vector<80xf32> to vector<1x80xf32>
    %cst_150 = arith.constant dense<0.000000e+00> : vector<1x16xf32>
    %210 = tpu.matmul %206, %14, %cst_150 {dimension_numbers = #tpu.dot_dimension_numbers<[1], [0], [0], [1], [0, 0, 1, 1], [], []>} : vector<1x80xf32>, vector<80x16xf32>, vector<1x16xf32> -> vector<1x16xf32>
    %211 = arith.addf %173, %210 : vector<1x16xf32>
    %cst_151 = arith.constant dense<0.000000e+00> : vector<1x16xf32>
    %212 = tpu.matmul %209, %14, %cst_151 {dimension_numbers = #tpu.dot_dimension_numbers<[1], [0], [0], [1], [0, 0, 1, 1], [], []>} : vector<1x80xf32>, vector<80x16xf32>, vector<1x16xf32> -> vector<1x16xf32>
    %213 = arith.addf %175, %212 : vector<1x16xf32>
    %cst_152 = arith.constant 2.000000e-02 : f32
    %214 = vector.broadcast %cst_152 : f32 to vector<1x16xf32>
    %215 = arith.mulf %211, %214 : vector<1x16xf32>
    %cst_153 = arith.constant 2.000000e-02 : f32
    %216 = vector.broadcast %cst_153 : f32 to vector<1x16xf32>
    %217 = arith.mulf %213, %216 : vector<1x16xf32>
    %218 = arith.mulf %215, %215 : vector<1x16xf32>
    %219 = arith.subf %217, %218 : vector<1x16xf32>
    %c0_154 = arith.constant 0 : index
    %c0_155 = arith.constant 0 : index
    %220 = vector.load %arg21[%c0_154, %c0_155] : memref<1x16xf32, #tpu.memory_space<vmem>>, vector<1x16xf32>
    %cst_156 = arith.constant 9.99999974E-6 : f32
    %221 = vector.broadcast %cst_156 : f32 to vector<1x16xf32>
    %222 = arith.addf %219, %221 : vector<1x16xf32>
    %223 = math.rsqrt %222 : vector<1x16xf32>
    %224 = arith.mulf %220, %223 : vector<1x16xf32>
    %c0_157 = arith.constant 0 : index
    %c0_158 = arith.constant 0 : index
    %225 = vector.load %arg22[%c0_157, %c0_158] : memref<1x16xf32, #tpu.memory_space<vmem>>, vector<1x16xf32>
    %226 = arith.mulf %215, %224 : vector<1x16xf32>
    %227 = arith.subf %225, %226 : vector<1x16xf32>
    %cst_159 = arith.constant dense<0.000000e+00> : vector<1x80xf32>
    %228 = tpu.matmul %224, %15, %cst_159 {dimension_numbers = #tpu.dot_dimension_numbers<[1], [0], [0], [1], [0, 0, 1, 1], [], []>} : vector<1x16xf32>, vector<16x80xf32>, vector<1x80xf32> -> vector<1x80xf32>
    %cst_160 = arith.constant dense<0.000000e+00> : vector<1x80xf32>
    %229 = tpu.matmul %227, %15, %cst_160 {dimension_numbers = #tpu.dot_dimension_numbers<[1], [0], [0], [1], [0, 0, 1, 1], [], []>} : vector<1x16xf32>, vector<16x80xf32>, vector<1x80xf32> -> vector<1x80xf32>
    %230 = tpu.iota {dimensions = array<i32: 0>} : vector<2x1xi32>
    %cst_161 = arith.constant 0.000000e+00 : f32
    %231 = vector.broadcast %cst_161 : f32 to vector<2x200xf32>
    %232 = vector.broadcast %228 : vector<1x80xf32> to vector<5x80xf32>
    %233 = arith.mulf %166, %232 : vector<5x80xf32>
    %234 = vector.broadcast %229 : vector<1x80xf32> to vector<5x80xf32>
    %235 = arith.addf %233, %234 : vector<5x80xf32>
    %236 = vector.extract_strided_slice %235 {offsets = [0, 0], sizes = [1, 80], strides = [1, 1]} : vector<5x80xf32> to vector<1x80xf32>
    %cst_162 = arith.constant dense<0.000000e+00> : vector<1x200xf32>
    %237 = tpu.matmul %236, %37, %cst_162 {dimension_numbers = #tpu.dot_dimension_numbers<[1], [0], [0], [1], [0, 0, 1, 1], [], []>} : vector<1x80xf32>, vector<80x200xf32>, vector<1x200xf32> -> vector<1x200xf32>
    %238 = vector.extract_strided_slice %235 {offsets = [1, 0], sizes = [1, 80], strides = [1, 1]} : vector<5x80xf32> to vector<1x80xf32>
    %cst_163 = arith.constant dense<0.000000e+00> : vector<1x200xf32>
    %239 = tpu.matmul %238, %39, %cst_163 {dimension_numbers = #tpu.dot_dimension_numbers<[1], [0], [0], [1], [0, 0, 1, 1], [], []>} : vector<1x80xf32>, vector<80x200xf32>, vector<1x200xf32> -> vector<1x200xf32>
    %240 = arith.addf %237, %239 : vector<1x200xf32>
    %241 = vector.extract_strided_slice %235 {offsets = [2, 0], sizes = [1, 80], strides = [1, 1]} : vector<5x80xf32> to vector<1x80xf32>
    %cst_164 = arith.constant dense<0.000000e+00> : vector<1x200xf32>
    %242 = tpu.matmul %241, %41, %cst_164 {dimension_numbers = #tpu.dot_dimension_numbers<[1], [0], [0], [1], [0, 0, 1, 1], [], []>} : vector<1x80xf32>, vector<80x200xf32>, vector<1x200xf32> -> vector<1x200xf32>
    %243 = arith.addf %240, %242 : vector<1x200xf32>
    %244 = vector.extract_strided_slice %235 {offsets = [3, 0], sizes = [1, 80], strides = [1, 1]} : vector<5x80xf32> to vector<1x80xf32>
    %cst_165 = arith.constant dense<0.000000e+00> : vector<1x200xf32>
    %245 = tpu.matmul %244, %43, %cst_165 {dimension_numbers = #tpu.dot_dimension_numbers<[1], [0], [0], [1], [0, 0, 1, 1], [], []>} : vector<1x80xf32>, vector<80x200xf32>, vector<1x200xf32> -> vector<1x200xf32>
    %246 = arith.addf %243, %245 : vector<1x200xf32>
    %247 = vector.extract_strided_slice %235 {offsets = [4, 0], sizes = [1, 80], strides = [1, 1]} : vector<5x80xf32> to vector<1x80xf32>
    %cst_166 = arith.constant dense<0.000000e+00> : vector<1x200xf32>
    %248 = tpu.matmul %247, %45, %cst_166 {dimension_numbers = #tpu.dot_dimension_numbers<[1], [0], [0], [1], [0, 0, 1, 1], [], []>} : vector<1x80xf32>, vector<80x200xf32>, vector<1x200xf32> -> vector<1x200xf32>
    %249 = arith.addf %246, %248 : vector<1x200xf32>
    %c0_i32 = arith.constant 0 : i32
    %250 = vector.broadcast %c0_i32 : i32 to vector<2x1xi32>
    %251 = arith.cmpi eq, %230, %250 : vector<2x1xi32>
    %252 = arith.extui %251 : vector<2x1xi1> to vector<2x1xi32>
    %253 = arith.sitofp %252 : vector<2x1xi32> to vector<2x1xf32>
    %254 = vector.broadcast %253 : vector<2x1xf32> to vector<2x200xf32>
    %255 = vector.broadcast %249 : vector<1x200xf32> to vector<2x200xf32>
    %256 = arith.mulf %254, %255 : vector<2x200xf32>
    %257 = arith.addf %231, %256 : vector<2x200xf32>
    %258 = vector.broadcast %228 : vector<1x80xf32> to vector<5x80xf32>
    %259 = arith.mulf %204, %258 : vector<5x80xf32>
    %260 = vector.broadcast %229 : vector<1x80xf32> to vector<5x80xf32>
    %261 = arith.addf %259, %260 : vector<5x80xf32>
    %262 = vector.extract_strided_slice %261 {offsets = [0, 0], sizes = [1, 80], strides = [1, 1]} : vector<5x80xf32> to vector<1x80xf32>
    %cst_167 = arith.constant dense<0.000000e+00> : vector<1x200xf32>
    %263 = tpu.matmul %262, %37, %cst_167 {dimension_numbers = #tpu.dot_dimension_numbers<[1], [0], [0], [1], [0, 0, 1, 1], [], []>} : vector<1x80xf32>, vector<80x200xf32>, vector<1x200xf32> -> vector<1x200xf32>
    %264 = vector.extract_strided_slice %261 {offsets = [1, 0], sizes = [1, 80], strides = [1, 1]} : vector<5x80xf32> to vector<1x80xf32>
    %cst_168 = arith.constant dense<0.000000e+00> : vector<1x200xf32>
    %265 = tpu.matmul %264, %39, %cst_168 {dimension_numbers = #tpu.dot_dimension_numbers<[1], [0], [0], [1], [0, 0, 1, 1], [], []>} : vector<1x80xf32>, vector<80x200xf32>, vector<1x200xf32> -> vector<1x200xf32>
    %266 = arith.addf %263, %265 : vector<1x200xf32>
    %267 = vector.extract_strided_slice %261 {offsets = [2, 0], sizes = [1, 80], strides = [1, 1]} : vector<5x80xf32> to vector<1x80xf32>
    %cst_169 = arith.constant dense<0.000000e+00> : vector<1x200xf32>
    %268 = tpu.matmul %267, %41, %cst_169 {dimension_numbers = #tpu.dot_dimension_numbers<[1], [0], [0], [1], [0, 0, 1, 1], [], []>} : vector<1x80xf32>, vector<80x200xf32>, vector<1x200xf32> -> vector<1x200xf32>
    %269 = arith.addf %266, %268 : vector<1x200xf32>
    %270 = vector.extract_strided_slice %261 {offsets = [3, 0], sizes = [1, 80], strides = [1, 1]} : vector<5x80xf32> to vector<1x80xf32>
    %cst_170 = arith.constant dense<0.000000e+00> : vector<1x200xf32>
    %271 = tpu.matmul %270, %43, %cst_170 {dimension_numbers = #tpu.dot_dimension_numbers<[1], [0], [0], [1], [0, 0, 1, 1], [], []>} : vector<1x80xf32>, vector<80x200xf32>, vector<1x200xf32> -> vector<1x200xf32>
    %272 = arith.addf %269, %271 : vector<1x200xf32>
    %273 = vector.extract_strided_slice %261 {offsets = [4, 0], sizes = [1, 80], strides = [1, 1]} : vector<5x80xf32> to vector<1x80xf32>
    %cst_171 = arith.constant dense<0.000000e+00> : vector<1x200xf32>
    %274 = tpu.matmul %273, %45, %cst_171 {dimension_numbers = #tpu.dot_dimension_numbers<[1], [0], [0], [1], [0, 0, 1, 1], [], []>} : vector<1x80xf32>, vector<80x200xf32>, vector<1x200xf32> -> vector<1x200xf32>
    %275 = arith.addf %272, %274 : vector<1x200xf32>
    %c1_i32 = arith.constant 1 : i32
    %276 = vector.broadcast %c1_i32 : i32 to vector<2x1xi32>
    %277 = arith.cmpi eq, %230, %276 : vector<2x1xi32>
    %278 = arith.extui %277 : vector<2x1xi1> to vector<2x1xi32>
    %279 = arith.sitofp %278 : vector<2x1xi32> to vector<2x1xf32>
    %280 = vector.broadcast %279 : vector<2x1xf32> to vector<2x200xf32>
    %281 = vector.broadcast %275 : vector<1x200xf32> to vector<2x200xf32>
    %282 = arith.mulf %280, %281 : vector<2x200xf32>
    %283 = arith.addf %257, %282 : vector<2x200xf32>
    %c0_172 = arith.constant 0 : index
    %c0_173 = arith.constant 0 : index
    %284 = vector.load %arg25[%c0_172, %c0_173] : memref<1x200xf32, #tpu.memory_space<vmem>>, vector<1x200xf32>
    %285 = vector.broadcast %284 : vector<1x200xf32> to vector<2x200xf32>
    %286 = arith.addf %283, %285 : vector<2x200xf32>
    %cst_174 = arith.constant dense<0.000000e+00> : vector<200xf32>
    %287 = vector.multi_reduction <add>, %286, %cst_174 [0] : vector<2x200xf32> to vector<200xf32>
    %288 = vector.shape_cast %287 : vector<200xf32> to vector<1x200xf32>
    %cst_175 = arith.constant 2.000000e+00 : f32
    %289 = vector.broadcast %cst_175 : f32 to vector<1x200xf32>
    %290 = arith.divf %288, %289 : vector<1x200xf32>
    %291 = vector.broadcast %290 : vector<1x200xf32> to vector<2x200xf32>
    %292 = arith.subf %286, %291 : vector<2x200xf32>
    %293 = arith.mulf %292, %292 : vector<2x200xf32>
    %cst_176 = arith.constant dense<0.000000e+00> : vector<200xf32>
    %294 = vector.multi_reduction <add>, %293, %cst_176 [0] : vector<2x200xf32> to vector<200xf32>
    %295 = vector.shape_cast %294 : vector<200xf32> to vector<1x200xf32>
    %cst_177 = arith.constant 2.000000e+00 : f32
    %296 = vector.broadcast %cst_177 : f32 to vector<1x200xf32>
    %297 = arith.divf %295, %296 : vector<1x200xf32>
    %298 = vector.broadcast %290 : vector<1x200xf32> to vector<2x200xf32>
    %299 = arith.subf %286, %298 : vector<2x200xf32>
    %cst_178 = arith.constant 9.99999974E-6 : f32
    %300 = vector.broadcast %cst_178 : f32 to vector<1x200xf32>
    %301 = arith.addf %297, %300 : vector<1x200xf32>
    %302 = math.rsqrt %301 : vector<1x200xf32>
    %303 = vector.broadcast %302 : vector<1x200xf32> to vector<2x200xf32>
    %304 = arith.mulf %299, %303 : vector<2x200xf32>
    %c0_179 = arith.constant 0 : index
    %c0_180 = arith.constant 0 : index
    %305 = vector.load %arg26[%c0_179, %c0_180] : memref<1x200xf32, #tpu.memory_space<vmem>>, vector<1x200xf32>
    %306 = vector.broadcast %305 : vector<1x200xf32> to vector<2x200xf32>
    %307 = arith.mulf %304, %306 : vector<2x200xf32>
    %c0_181 = arith.constant 0 : index
    %c0_182 = arith.constant 0 : index
    %308 = vector.load %arg27[%c0_181, %c0_182] : memref<1x200xf32, #tpu.memory_space<vmem>>, vector<1x200xf32>
    %309 = vector.broadcast %308 : vector<1x200xf32> to vector<2x200xf32>
    %310 = arith.addf %307, %309 : vector<2x200xf32>
    %c0_183 = arith.constant 0 : index
    %c0_184 = arith.constant 0 : index
    %311 = vector.load %arg28[%c0_183, %c0_184] : memref<200x50xf32, #tpu.memory_space<vmem>>, vector<200x50xf32>
    %cst_185 = arith.constant dense<0.000000e+00> : vector<2x50xf32>
    %312 = tpu.matmul %310, %311, %cst_185 {dimension_numbers = #tpu.dot_dimension_numbers<[1], [0], [0], [1], [0, 0, 1, 1], [], []>} : vector<2x200xf32>, vector<200x50xf32>, vector<2x50xf32> -> vector<2x50xf32>
    %c0_186 = arith.constant 0 : index
    %c0_187 = arith.constant 0 : index
    %313 = vector.load %arg29[%c0_186, %c0_187] : memref<1x50xf32, #tpu.memory_space<vmem>>, vector<1x50xf32>
    %314 = vector.broadcast %313 : vector<1x50xf32> to vector<2x50xf32>
    %315 = arith.addf %312, %314 : vector<2x50xf32>
    %cst_188 = arith.constant dense<0.000000e+00> : vector<50xf32>
    %316 = vector.multi_reduction <add>, %315, %cst_188 [0] : vector<2x50xf32> to vector<50xf32>
    %317 = vector.shape_cast %316 : vector<50xf32> to vector<1x50xf32>
    %cst_189 = arith.constant 2.000000e+00 : f32
    %318 = vector.broadcast %cst_189 : f32 to vector<1x50xf32>
    %319 = arith.divf %317, %318 : vector<1x50xf32>
    %320 = vector.broadcast %319 : vector<1x50xf32> to vector<2x50xf32>
    %321 = arith.subf %315, %320 : vector<2x50xf32>
    %322 = arith.mulf %321, %321 : vector<2x50xf32>
    %cst_190 = arith.constant dense<0.000000e+00> : vector<50xf32>
    %323 = vector.multi_reduction <add>, %322, %cst_190 [0] : vector<2x50xf32> to vector<50xf32>
    %324 = vector.shape_cast %323 : vector<50xf32> to vector<1x50xf32>
    %cst_191 = arith.constant 2.000000e+00 : f32
    %325 = vector.broadcast %cst_191 : f32 to vector<1x50xf32>
    %326 = arith.divf %324, %325 : vector<1x50xf32>
    %327 = vector.broadcast %319 : vector<1x50xf32> to vector<2x50xf32>
    %328 = arith.subf %315, %327 : vector<2x50xf32>
    %cst_192 = arith.constant 9.99999974E-6 : f32
    %329 = vector.broadcast %cst_192 : f32 to vector<1x50xf32>
    %330 = arith.addf %326, %329 : vector<1x50xf32>
    %331 = math.rsqrt %330 : vector<1x50xf32>
    %332 = vector.broadcast %331 : vector<1x50xf32> to vector<2x50xf32>
    %333 = arith.mulf %328, %332 : vector<2x50xf32>
    %c0_193 = arith.constant 0 : index
    %c0_194 = arith.constant 0 : index
    %334 = vector.load %arg30[%c0_193, %c0_194] : memref<1x50xf32, #tpu.memory_space<vmem>>, vector<1x50xf32>
    %335 = vector.broadcast %334 : vector<1x50xf32> to vector<2x50xf32>
    %336 = arith.mulf %333, %335 : vector<2x50xf32>
    %c0_195 = arith.constant 0 : index
    %c0_196 = arith.constant 0 : index
    %337 = vector.load %arg31[%c0_195, %c0_196] : memref<1x50xf32, #tpu.memory_space<vmem>>, vector<1x50xf32>
    %338 = vector.broadcast %337 : vector<1x50xf32> to vector<2x50xf32>
    %339 = arith.addf %336, %338 : vector<2x50xf32>
    %c0_197 = arith.constant 0 : index
    %c0_198 = arith.constant 0 : index
    %340 = vector.load %arg32[%c0_197, %c0_198] : memref<50x10xf32, #tpu.memory_space<vmem>>, vector<50x10xf32>
    %cst_199 = arith.constant dense<0.000000e+00> : vector<2x10xf32>
    %341 = tpu.matmul %339, %340, %cst_199 {dimension_numbers = #tpu.dot_dimension_numbers<[1], [0], [0], [1], [0, 0, 1, 1], [], []>} : vector<2x50xf32>, vector<50x10xf32>, vector<2x10xf32> -> vector<2x10xf32>
    %c0_200 = arith.constant 0 : index
    %c0_201 = arith.constant 0 : index
    %342 = vector.load %arg33[%c0_200, %c0_201] : memref<1x10xf32, #tpu.memory_space<vmem>>, vector<1x10xf32>
    %343 = vector.broadcast %342 : vector<1x10xf32> to vector<2x10xf32>
    %344 = arith.addf %341, %343 : vector<2x10xf32>
    %c0_202 = arith.constant 0 : index
    %c0_203 = arith.constant 0 : index
    %345 = vector.load %arg34[%c0_202, %c0_203] : memref<2x10xf32, #tpu.memory_space<vmem>>, vector<2x10xf32>
    tpu.vector_store %arg34[%c0_202, %c0_203], %344 {strides = array<i32>} : memref<2x10xf32, #tpu.memory_space<vmem>>, vector<2x10xf32>,
    return
  }
  func.func @transform_0(%arg0: i32) -> (i32, i32, i32, i32) {
    %c0_i32 = arith.constant 0 : i32
    %c0_i32_0 = arith.constant 0 : i32
    %c0_i32_1 = arith.constant 0 : i32
    %c0_i32_2 = arith.constant 0 : i32
    %c0_i32_3 = arith.constant 0 : i32
    return %c0_i32, %c0_i32_0, %c0_i32_1, %c0_i32_2 : i32, i32, i32, i32
  }
  func.func @transform_1(%arg0: i32) -> (i32, i32) {
    %c0_i32 = arith.constant 0 : i32
    %c0_i32_0 = arith.constant 0 : i32
    %c0_i32_1 = arith.constant 0 : i32
    return %c0_i32, %c0_i32_0 : i32, i32
  }
  func.func @transform_2(%arg0: i32) -> (i32, i32, i32) {
    %c0_i32 = arith.constant 0 : i32
    %c0_i32_0 = arith.constant 0 : i32
    %c0_i32_1 = arith.constant 0 : i32
    %c0_i32_2 = arith.constant 0 : i32
    return %c0_i32, %c0_i32_0, %c0_i32_1 : i32, i32, i32
  }
  func.func @transform_3(%arg0: i32) -> (i32, i32) {
    %c0_i32 = arith.constant 0 : i32
    %c0_i32_0 = arith.constant 0 : i32
    %c0_i32_1 = arith.constant 0 : i32
    return %c0_i32, %c0_i32_0 : i32, i32
  }
  func.func @transform_4(%arg0: i32) -> (i32, i32) {
    %c0_i32 = arith.constant 0 : i32
    %c0_i32_0 = arith.constant 0 : i32
    %c0_i32_1 = arith.constant 0 : i32
    return %c0_i32, %c0_i32_0 : i32, i32
  }
  func.func @transform_5(%arg0: i32) -> (i32, i32) {
    %c0_i32 = arith.constant 0 : i32
    %c0_i32_0 = arith.constant 0 : i32
    %c0_i32_1 = arith.constant 0 : i32
    return %c0_i32, %c0_i32_0 : i32, i32
  }
  func.func @transform_6(%arg0: i32) -> (i32, i32) {
    %c0_i32 = arith.constant 0 : i32
    %c0_i32_0 = arith.constant 0 : i32
    %c0_i32_1 = arith.constant 0 : i32
    return %c0_i32, %c0_i32_0 : i32, i32
  }
  func.func @transform_7(%arg0: i32) -> (i32, i32) {
    %c0_i32 = arith.constant 0 : i32
    %c0_i32_0 = arith.constant 0 : i32
    %c0_i32_1 = arith.constant 0 : i32
    return %c0_i32, %c0_i32_0 : i32, i32
  }
  func.func @transform_8(%arg0: i32) -> (i32, i32) {
    %c0_i32 = arith.constant 0 : i32
    %c0_i32_0 = arith.constant 0 : i32
    %c0_i32_1 = arith.constant 0 : i32
    return %c0_i32, %c0_i32_0 : i32, i32
  }
  func.func @transform_9(%arg0: i32) -> (i32, i32) {
    %c0_i32 = arith.constant 0 : i32
    %c0_i32_0 = arith.constant 0 : i32
    %c0_i32_1 = arith.constant 0 : i32
    return %c0_i32, %c0_i32_0 : i32, i32
  }
  func.func @transform_10(%arg0: i32) -> (i32, i32) {
    %c0_i32 = arith.constant 0 : i32
    %c0_i32_0 = arith.constant 0 : i32
    %c0_i32_1 = arith.constant 0 : i32
    return %c0_i32, %c0_i32_0 : i32, i32
  }
  func.func @transform_11(%arg0: i32) -> (i32, i32) {
    %c0_i32 = arith.constant 0 : i32
    %c0_i32_0 = arith.constant 0 : i32
    %c0_i32_1 = arith.constant 0 : i32
    return %c0_i32, %c0_i32_0 : i32, i32
  }
  func.func @transform_12(%arg0: i32) -> (i32, i32) {
    %c0_i32 = arith.constant 0 : i32
    %c0_i32_0 = arith.constant 0 : i32
    %c0_i32_1 = arith.constant 0 : i32
    return %c0_i32, %c0_i32_0 : i32, i32
  }
  func.func @transform_13(%arg0: i32) -> (i32, i32, i32) {
    %c0_i32 = arith.constant 0 : i32
    %c0_i32_0 = arith.constant 0 : i32
    %c0_i32_1 = arith.constant 0 : i32
    %c0_i32_2 = arith.constant 0 : i32
    return %c0_i32, %c0_i32_0, %c0_i32_1 : i32, i32, i32
  }
  func.func @transform_14(%arg0: i32) -> (i32, i32) {
    %c0_i32 = arith.constant 0 : i32
    %c0_i32_0 = arith.constant 0 : i32
    %c0_i32_1 = arith.constant 0 : i32
    return %c0_i32, %c0_i32_0 : i32, i32
  }
  func.func @transform_15(%arg0: i32) -> (i32, i32) {
    %c0_i32 = arith.constant 0 : i32
    %c0_i32_0 = arith.constant 0 : i32
    %c0_i32_1 = arith.constant 0 : i32
    return %c0_i32, %c0_i32_0 : i32, i32
  }
  func.func @transform_16(%arg0: i32) -> (i32, i32) {
    %c0_i32 = arith.constant 0 : i32
    %c0_i32_0 = arith.constant 0 : i32
    %c0_i32_1 = arith.constant 0 : i32
    return %c0_i32, %c0_i32_0 : i32, i32
  }
  func.func @transform_17(%arg0: i32) -> (i32, i32) {
    %c0_i32 = arith.constant 0 : i32
    %c0_i32_0 = arith.constant 0 : i32
    %c0_i32_1 = arith.constant 0 : i32
    return %c0_i32, %c0_i32_0 : i32, i32
  }
  func.func @transform_18(%arg0: i32) -> (i32, i32) {
    %c0_i32 = arith.constant 0 : i32
    %c0_i32_0 = arith.constant 0 : i32
    %c0_i32_1 = arith.constant 0 : i32
    return %c0_i32, %c0_i32_0 : i32, i32
  }
  func.func @transform_19(%arg0: i32) -> (i32, i32) {
    %c0_i32 = arith.constant 0 : i32
    %c0_i32_0 = arith.constant 0 : i32
    %c0_i32_1 = arith.constant 0 : i32
    return %c0_i32, %c0_i32_0 : i32, i32
  }
  func.func @transform_20(%arg0: i32) -> (i32, i32) {
    %c0_i32 = arith.constant 0 : i32
    %c0_i32_0 = arith.constant 0 : i32
    %c0_i32_1 = arith.constant 0 : i32
    return %c0_i32, %c0_i32_0 : i32, i32
  }
  func.func @transform_21(%arg0: i32) -> (i32, i32) {
    %c0_i32 = arith.constant 0 : i32
    %c0_i32_0 = arith.constant 0 : i32
    %c0_i32_1 = arith.constant 0 : i32
    return %c0_i32, %c0_i32_0 : i32, i32
  }
  func.func @transform_22(%arg0: i32) -> (i32, i32) {
    %c0_i32 = arith.constant 0 : i32
    %c0_i32_0 = arith.constant 0 : i32
    %c0_i32_1 = arith.constant 0 : i32
    return %c0_i32, %c0_i32_0 : i32, i32
  }
  func.func @transform_23(%arg0: i32) -> (i32, i32, i32) {
    %c0_i32 = arith.constant 0 : i32
    %c0_i32_0 = arith.constant 0 : i32
    %c0_i32_1 = arith.constant 0 : i32
    %c0_i32_2 = arith.constant 0 : i32
    return %c0_i32, %c0_i32_0, %c0_i32_1 : i32, i32, i32
  }
  func.func @transform_24(%arg0: i32) -> (i32, i32) {
    %c0_i32 = arith.constant 0 : i32
    %c0_i32_0 = arith.constant 0 : i32
    %c0_i32_1 = arith.constant 0 : i32
    return %c0_i32, %c0_i32_0 : i32, i32
  }
  func.func @transform_25(%arg0: i32) -> (i32, i32) {
    %c0_i32 = arith.constant 0 : i32
    %c0_i32_0 = arith.constant 0 : i32
    %c0_i32_1 = arith.constant 0 : i32
    return %c0_i32, %c0_i32_0 : i32, i32
  }
  func.func @transform_26(%arg0: i32) -> (i32, i32) {
    %c0_i32 = arith.constant 0 : i32
    %c0_i32_0 = arith.constant 0 : i32
    %c0_i32_1 = arith.constant 0 : i32
    return %c0_i32, %c0_i32_0 : i32, i32
  }
  func.func @transform_27(%arg0: i32) -> (i32, i32) {
    %c0_i32 = arith.constant 0 : i32
    %c0_i32_0 = arith.constant 0 : i32
    %c0_i32_1 = arith.constant 0 : i32
    return %c0_i32, %c0_i32_0 : i32, i32
  }
  func.func @transform_28(%arg0: i32) -> (i32, i32) {
    %c0_i32 = arith.constant 0 : i32
    %c0_i32_0 = arith.constant 0 : i32
    %c0_i32_1 = arith.constant 0 : i32
    return %c0_i32, %c0_i32_0 : i32, i32
  }
  func.func @transform_29(%arg0: i32) -> (i32, i32) {
    %c0_i32 = arith.constant 0 : i32
    %c0_i32_0 = arith.constant 0 : i32
    %c0_i32_1 = arith.constant 0 : i32
    return %c0_i32, %c0_i32_0 : i32, i32
  }
  func.func @transform_30(%arg0: i32) -> (i32, i32) {
    %c0_i32 = arith.constant 0 : i32
    %c0_i32_0 = arith.constant 0 : i32
    %c0_i32_1 = arith.constant 0 : i32
    return %c0_i32, %c0_i32_0 : i32, i32
  }
  func.func @transform_31(%arg0: i32) -> (i32, i32) {
    %c0_i32 = arith.constant 0 : i32
    %c0_i32_0 = arith.constant 0 : i32
    %c0_i32_1 = arith.constant 0 : i32
    return %c0_i32, %c0_i32_0 : i32, i32
  }
  func.func @transform_32(%arg0: i32) -> (i32, i32) {
    %c0_i32 = arith.constant 0 : i32
    %c0_i32_0 = arith.constant 0 : i32
    %c0_i32_1 = arith.constant 0 : i32
    return %c0_i32, %c0_i32_0 : i32, i32
  }
  func.func @transform_33(%arg0: i32) -> (i32, i32) {
    %c0_i32 = arith.constant 0 : i32
    %c0_i32_0 = arith.constant 0 : i32
    %c0_i32_1 = arith.constant 0 : i32
    return %c0_i32, %c0_i32_0 : i32, i32
  }
}

</mosaic_0001>

<bundles_post_ra>
// kernel: baseline_forward.1
= control target key start
LH: loop header
LB: loop body
LE: loop exit
PB: predicated region body
PF: predicated region fallthrough
CT: control target
= control target key end

     0   :  { %s7289_s6 = smov 1   ;;  %s7290_s10 = smov 2   ;;  %s10385_s0 = inlined_call_operand.smem [shape: u32[34], index: -1, kind: input, shape index: {}] }
   0x1   :  { %s7333_s5 = sld [smem:[%s10385_s0]]   ;;  %s7291_s14 = smov 3  }
   0x2   :  { %s7338_s9 = sld [smem:[%s10385_s0 + %s7289_s6]]   ;;  %s7292_s18 = smov 4  }
   0x3   :  { %s7343_s13 = sld [smem:[%s10385_s0 + %s7290_s10]]   ;;  %s7293_s22 = smov 5  }
   0x4   :  { %s7348_s17 = sld [smem:[%s10385_s0 + %s7291_s14]]   ;;  %s7294_s26 = smov 6  }
   0x5   :  { %s7353_s21 = sld [smem:[%s10385_s0 + %s7292_s18]]   ;;  %s7295_s30 = smov 7  }
   0x6   :  { %s7358_s25 = sld [smem:[%s10385_s0 + %s7293_s22]]   ;;  %s7296_s4 = smov 8  }
   0x7   :  { %s7363_s29 = sld [smem:[%s10385_s0 + %s7294_s26]]   ;;  %s7297_s10 = smov 9  }
   0x8   :  { %s7368_s3 = sld [smem:[%s10385_s0 + %s7295_s30]]   ;;  %s7298_s15 = smov 10  }
   0x9   :  { %s7373_s8 = sld [smem:[%s10385_s0 + %s7296_s4]]   ;;  %s7299_s20 = smov 11  }
   0xa   :  { %s7378_s14 = sld [smem:[%s10385_s0 + %s7297_s10]]   ;;  %s7300_s26 = smov 12  }
   0xb   :  { %s7383_s19 = sld [smem:[%s10385_s0 + %s7298_s15]]   ;;  %s7301_s1 = smov 13  }
   0xc   :  { %s7388_s24 = sld [smem:[%s10385_s0 + %s7299_s20]]   ;;  %s7302_s7 = smov 14  }
   0xd   :  { %s7393_s30 = sld [smem:[%s10385_s0 + %s7300_s26]]   ;;  %s7303_s15 = smov 15  }
   0xe   :  { %s7398_s6 = sld [smem:[%s10385_s0 + %s7301_s1]]   ;;  %s7304_s22 = smov 16  }
   0xf   :  { %s7403_s12 = sld [smem:[%s10385_s0 + %s7302_s7]]   ;;  %s7305_s28 = smov 17  }
  0x10   :  { %s7408_s20 = sld [smem:[%s10385_s0 + %s7303_s15]]   ;;  %s7306_s7 = smov 18  }
  0x11   :  { %s7413_s27 = sld [smem:[%s10385_s0 + %s7304_s22]]   ;;  %s7307_s15 = smov 19  }
  0x12   :  { %s7418_s4 = sld [smem:[%s10385_s0 + %s7305_s28]]   ;;  %s7308_s22 = smov 20  }
  0x13   :  { %s7309_s28 = smov 21  }
  0x15   :  { %10605 = sst [smem:[#allocation5_spill]] %s7403_s12 }
  0x16   :  { %10606 = sst [smem:[#allocation6_spill]] %s7408_s20 }
  0x17   :  { %10607 = sst [smem:[#allocation7_spill]] %s7413_s27 }
  0x18   :  { %10608 = sst [smem:[#allocation8_spill]] %s7418_s4 }
  0x19   :  { %s7423_s12 = sld [smem:[%s10385_s0 + %s7306_s7]]   ;;  %s7310_s7 = smov 22  }
  0x1a   :  { %s7428_s20 = sld [smem:[%s10385_s0 + %s7307_s15]]   ;;  %s7311_s15 = smov 23  }
  0x1b   :  { %s7433_s27 = sld [smem:[%s10385_s0 + %s7308_s22]]   ;;  %s7312_s22 = smov 24  }
  0x1c   :  { %s7438_s4 = sld [smem:[%s10385_s0 + %s7309_s28]]   ;;  %s7313_s28 = smov 25  }
  0x1f   :  { %10609 = sst [smem:[#allocation9_spill]] %s7423_s12 }
  0x20   :  { %10610 = sst [smem:[#allocation10_spill]] %s7428_s20 }
  0x21   :  { %10611 = sst [smem:[#allocation11_spill]] %s7433_s27 }
  0x22   :  { %10612 = sst [smem:[#allocation12_spill]] %s7438_s4 }
  0x23   :  { %s7443_s12 = sld [smem:[%s10385_s0 + %s7310_s7]]   ;;  %s7314_s7 = smov 26  }
  0x24   :  { %s7448_s20 = sld [smem:[%s10385_s0 + %s7311_s15]]   ;;  %s7315_s15 = smov 27  }
  0x25   :  { %s7453_s27 = sld [smem:[%s10385_s0 + %s7312_s22]]   ;;  %s7316_s22 = smov 28  }
  0x26   :  { %s7458_s4 = sld [smem:[%s10385_s0 + %s7313_s28]]   ;;  %s7317_s28 = smov 29  }
  0x29   :  { %10613 = sst [smem:[#allocation13_spill]] %s7443_s12 }
  0x2a   :  { %10614 = sst [smem:[#allocation14_spill]] %s7448_s20 }
  0x2b   :  { %10615 = sst [smem:[#allocation15_spill]] %s7453_s27 }
  0x2c   :  { %10616 = sst [smem:[#allocation16_spill]] %s7458_s4 }
  0x2d   :  { %s7463_s12 = sld [smem:[%s10385_s0 + %s7314_s7]]   ;;  %s7318_s7 = smov 30  }
  0x2e   :  { %s7468_s20 = sld [smem:[%s10385_s0 + %s7315_s15]]   ;;  %s7319_s15 = smov 31  }
  0x2f   :  { %s7473_s27 = sld [smem:[%s10385_s0 + %s7316_s22]]   ;;  %s7320_s22 = smov 32  }
  0x30   :  { %s7478_s4 = sld [smem:[%s10385_s0 + %s7317_s28]]   ;;  %s7321_s28 = smov 33  }
  0x33   :  { %10617 = sst [smem:[#allocation17_spill]] %s7463_s12 }
  0x34   :  { %10618 = sst [smem:[#allocation18_spill]] %s7468_s20 }
  0x35   :  { %10619 = sst [smem:[#allocation19_spill]] %s7473_s27 }
  0x36   :  { %10620 = sst [smem:[#allocation20_spill]] %s7478_s4 }
  0x37   :  { %s7483_s12 = sld [smem:[%s10385_s0 + %s7318_s7]]  }
  0x38   :  { %s7488_s20 = sld [smem:[%s10385_s0 + %s7319_s15]]  }
  0x39   :  { %s7493_s27 = sld [smem:[%s10385_s0 + %s7320_s22]]  }
  0x3a   :  { %s7498_s4 = sld [smem:[%s10385_s0 + %s7321_s28]]  }
  0x3b   :  { %v560_v0 = vld [vmem:[%s7333_s5 + $0x18] sm:$0xf]  ;;  %vm574_vm0 = vcmask 1043456   ;;  %v559_v1 = vld [vmem:[%s7333_s5 + $0x10] sm:$0xff]  ;;  %vm561_vm1 = vcmask 228352   ;;  %v7504_v2 = vld [vmem:[%s7338_s9] sm:$0xff] }
  0x3c   :  { %6906 = vmatprep.subr.msk.mxu0 %vm574_vm0, %v560_v0  ;;  %v558_v3 = vld [vmem:[%s7333_s5 + $0x8] sm:$0xff]  ;;  %6914 = vmatprep.mubr.msk.f32.mxu0 %vm561_vm1, %v7504_v2  ;;  %v7511_v4 = vld [vmem:[%s7343_s13 + $0x78] sm:$0xf]  ;;  %v7516_v5 = vld [vmem:[%s7343_s13 + $0x70] sm:$0xf] }
  0x3d   :  { %6907 = vmatpush3.msk.msra.mxu0 %vm574_vm0, %v560_v0  ;;  %6598 = vmatprep.subr.msk.mxu1 %vm574_vm0, %v7511_v4  ;;  %v557_v6 = vld [vmem:[%s7333_s5] sm:$0xff] }
  0x3e   :  { %6908 = vmatprep.subr.mxu0 %v559_v1  ;;  %6599 = vmatpush1.msk.msra.mxu1 %vm574_vm0, %v7516_v5 }
  0x3f   :  { %6909 = vmatpush3.msra.mxu0 %v559_v1 }
  0x40   :  { %72 = vsyncpa [#allocation3], 0  ;;  %6910 = vmatprep.subr.mxu0 %v558_v3  ;;  %v7522_v7 = vld [vmem:[%s7338_s9 + $0x8] sm:$0xff]  ;;  %v7525_v8 = vld [vmem:[%s7343_s13 + $0xf8] sm:$0xf]  ;;  %v10411_v24 = vmov 0.0  }
  0x41   :  { %6911 = vmatpush3.msra.mxu0 %v558_v3  ;;  %10621 = vst [vmem:[#allocation21_spill] sm:$0xff] %v7525_v8  ;;  %v7528_v9 = vld [vmem:[%s7338_s9 + $0x10] sm:$0xff]  ;;  %v7540_v11 = vld [vmem:[%s7338_s9 + $0x18] sm:$0x3f]  ;;  %v7547_v12 = vld [vmem:[%s7343_s13 + $0x68] sm:$0xff]  ;;  %753 = vmatprep.mubr.f32.mxu1 %v10411_v24  ;;  %vm667_vm2 = vcmask 1046528  }
  0x42   :  { %6912 = vmatprep.subr.mxu0 %v557_v6  ;;  %v7531_v10 = vld [vmem:[%s7343_s13 + $0xf0] sm:$0xf]  ;;  %10623 = vst [vmem:[#allocation23_spill] sm:$0xff] %v7540_v11  ;;  %v7550_v13 = vld [vmem:[%s7343_s13 + $0xe8] sm:$0xff]  ;;  %715 = vmatprep.subr.mxu1 %v7547_v12  ;;  %v7555_v14 = vld [vmem:[%s7343_s13 + $0x60] sm:$0xff]  ;;  %vm1000_vm3 = vcmask 1044480  }
  0x43   :  { %10622 = vst [vmem:[#allocation22_spill] sm:$0xff] %v7531_v10  ;;  %6913 = vmatpush3.msra.mxu0 %v557_v6  ;;  %10624 = vst [vmem:[#allocation24_spill] sm:$0xff] %v7550_v13  ;;  %v7558_v15 = vld [vmem:[%s7343_s13 + $0xe0] sm:$0xff]  ;;  %716 = vmatpush1.msra.mxu1 %v7555_v14  ;;  %v7563_v16 = vld [vmem:[%s7343_s13 + $0x58] sm:$0xff]  ;;  %vm881_vm4 = vcmask 1045504   ;;  %vm1271_vm5 = vcmask 1041408  }
  0x44   :  { %6915 = vmatmul.mubr.msk.f32.vlgmr.msra.gmra.mxu0 %vm561_vm1, %v7522_v7  ;;  %6616 = vmatprep.subr.msk.mxu0 %vm574_vm0, %v7525_v8  ;;  %10625 = vst [vmem:[#allocation25_spill] sm:$0xff] %v7555_v14  ;;  %10626 = vst [vmem:[#allocation26_spill] sm:$0xff] %v7558_v15  ;;  %v7566_v17 = vld [vmem:[%s7343_s13 + $0xd8] sm:$0xff]  ;;  %v7571_v18 = vld [vmem:[%s7343_s13 + $0x50] sm:$0xff]  ;;  %vm1264_vm6 = vcmask 211968   ;;  %vm1442_vm7 = vcmask 654336  }
  0x45   :  { %6917 = vmatprep.mubr.msk.f32.mxu0 %vm561_vm1, %v7528_v9  ;;  %6617 = vmatpush1.msk.msra.mxu0 %vm574_vm0, %v7531_v10  ;;  %10627 = vst [vmem:[#allocation27_spill] sm:$0xff] %v7563_v16  ;;  %10628 = vst [vmem:[#allocation28_spill] sm:$0xff] %v7566_v17  ;;  %v7574_v19 = vld [vmem:[%s7343_s13 + $0xd0] sm:$0xff]  ;;  %v7579_v20 = vld [vmem:[%s7343_s13 + $0x48] sm:$0xff]  ;;  %vm1603_vm8 = vcmask 847872   ;;  %vm1601_vm9 = vcmask 850944  }
  0x46   :  { %1048 = vmatprep.subr.mxu0 %v7550_v13  ;;  %717 = vmatprep.subr.mxu1 %v7563_v16  ;;  %10629 = vst [vmem:[#allocation29_spill] sm:$0xff] %v7571_v18  ;;  %10630 = vst [vmem:[#allocation30_spill] sm:$0xff] %v7574_v19  ;;  %v7582_v21 = vld [vmem:[%s7343_s13 + $0xc8] sm:$0xff]  ;;  %v7587_v22 = vld [vmem:[%s7343_s13 + $0x40] sm:$0xff]  ;;  %vm7323_vm10 = vmmov 0   ;;  %vm2918_vm11 = vcmask 64512  }
  0x47   :  { %1049 = vmatpush1.msra.mxu0 %v7558_v15  ;;  %718 = vmatpush1.msra.mxu1 %v7571_v18  ;;  %10631 = vst [vmem:[#allocation31_spill] sm:$0xff] %v7579_v20  ;;  %10632 = vst [vmem:[#allocation32_spill] sm:$0xff] %v7582_v21  ;;  %v7590_v23 = vld [vmem:[%s7343_s13 + $0xc0] sm:$0xff]  ;;  %v7597_v25 = vld [vmem:[%s7343_s13 + $0x38] sm:$0xf]  ;;  %vm3077_vm12 = vcmask 105472  }
  0x48   :  { %6918 = vmatmul.mubr.msk.f32.gmra.mxu0 %vm561_vm1, %v7540_v11  ;;  %1050 = vmatprep.subr.mxu0 %v7566_v17  ;;  %10633 = vst [vmem:[#allocation33_spill] sm:$0xff] %v7587_v22  ;;  %10634 = vst [vmem:[#allocation34_spill] sm:$0xff] %v7590_v23  ;;  %v7614_v35 = vld [vmem:[%s7343_s13 + $0x30] sm:$0xf]  ;;  %v7621_v37 = vld [vmem:[%s7343_s13 + $0x28] sm:$0xff]  ;;  %s10854_s0 = sld [smem:[#allocation9_spill]] }
  0x49   :  { %1051 = vmatpush1.msra.mxu0 %v7574_v19  ;;  %719 = vmatprep.subr.mxu1 %v7579_v20  ;;  %v7633_v42 = vld [vmem:[%s7343_s13 + $0x20] sm:$0xff]  ;;  %v7638_v43 = vld [vmem:[%s7343_s13 + $0x18] sm:$0xff]  ;;  %v7649_v48 = vld [vmem:[%s7343_s13 + $0x10] sm:$0xff]  ;;  %s10877_s9 = sld [smem:[#allocation6_spill]]  ;;  %vm3616_vm13 = vcmask 1042432   ;;  %vm3612_vm14 = vcmask 89088  }
  0x4a   :  { %1052 = vmatprep.subr.mxu0 %v7582_v21  ;;  %720 = vmatpush1.msra.mxu1 %v7587_v22  ;;  %v7654_v49 = vld [vmem:[%s7343_s13 + $0x8] sm:$0xff]  ;;  %v7660_v50 = vld [vmem:[%s7343_s13] sm:$0xff]  ;;  %v7664_v51 = vld [vmem:[%s7343_s13 + $0xb8] sm:$0xf]  ;;  %vm3770_vm15 = vcmask 392192   ;;  %s11052_s7 = sld [smem:[#allocation20_spill]] }
  0x4b   :  { %1053 = vmatpush1.msra.mxu0 %v7590_v23  ;;  %1086 = vmatprep.mubr.f32.mxu0 %v10411_v24  ;;  %10635 = vst [vmem:[#allocation35_spill] sm:$0xff] %v7654_v49  ;;  %10636 = vst [vmem:[#allocation36_spill] sm:$0xff] %v7660_v50  ;;  %v7673_v52 = vld [vmem:[%s7343_s13 + $0xb0] sm:$0xf]  ;;  %v7677_v53 = vld [vmem:[%s7343_s13 + $0xa8] sm:$0xff] }
  0x4c   :  { %6604 = vmatprep.subr.msk.mxu1 %vm574_vm0, %v7597_v25  ;;  %10637 = vst [vmem:[#allocation37_spill] sm:$0xff] %v7664_v51  ;;  %10638 = vst [vmem:[#allocation38_spill] sm:$0xff] %v7673_v52  ;;  %v7682_v54 = vld [vmem:[%s7343_s13 + $0xa0] sm:$0xff]  ;;  %v7688_v55 = vld [vmem:[%s7343_s13 + $0x98] sm:$0xff] }
  0x4d   :  { %10639 = vst [vmem:[#allocation39_spill] sm:$0xff] %v7677_v53  ;;  %10640 = vst [vmem:[#allocation40_spill] sm:$0xff] %v7682_v54  ;;  %v7692_v56 = vld [vmem:[%s7343_s13 + $0x90] sm:$0xff]  ;;  %v7696_v57 = vld [vmem:[%s7343_s13 + $0x88] sm:$0xff] }
  0x4e   :  { %10641 = vst [vmem:[#allocation41_spill] sm:$0xff] %v7688_v55  ;;  %10642 = vst [vmem:[#allocation42_spill] sm:$0xff] %v7692_v56  ;;  %v7702_v58 = vld [vmem:[%s7343_s13 + $0x80] sm:$0xff]  ;;  %v7707_v59 = vld [vmem:[%s7343_s13 + $0x138] sm:$0xf] }
  0x4f   :  { %10643 = vst [vmem:[#allocation43_spill] sm:$0xff] %v7696_v57  ;;  %10644 = vst [vmem:[#allocation44_spill] sm:$0xff] %v7702_v58  ;;  %v7722_v62 = vld [vmem:[%s7343_s13 + $0x130] sm:$0xf]  ;;  %v7727_v1 = vld [vmem:[%s7343_s13 + $0x128] sm:$0xff] }
  0x50   :  { %10645 = vst [vmem:[#allocation45_spill] sm:$0xff] %v7707_v59  ;;  %10646 = vst [vmem:[#allocation46_spill] sm:$0xff] %v7722_v62  ;;  %v7731_v3 = vld [vmem:[%s7343_s13 + $0x120] sm:$0xff]  ;;  %v7737_v6 = vld [vmem:[%s7343_s13 + $0x118] sm:$0xff] }
  0x51   :  { %10647 = vst [vmem:[#allocation47_spill] sm:$0xff] %v7727_v1  ;;  %10648 = vst [vmem:[#allocation48_spill] sm:$0xff] %v7731_v3 }
  0x52   :  { %10649 = vst [vmem:[#allocation49_spill] sm:$0xff] %v7737_v6 }
 0x104   :  { %v7601_v26 = vpop.f32.mrf.mxu0 }
 0x105   :  { %v1002_v28 = vrot.slane %v7601_v26, 3  ;;  %v669_v31 = vrot.slane %v7601_v26, 1  ;;  %v883_v61 = vrot.slane %v7601_v26, 2 }
 0x106   :  { %v7603_v27 = vpop.f32.mrf.mxu0 }
 0x107   :  { %v1001_v29 = vrot.slane %v7603_v27, 3  ;;  %v668_v30 = vrot.slane %v7603_v27, 1  ;;  %v882_v60 = vrot.slane %v7603_v27, 2 }
 0x108   :  { %v7609_v32 = vpop.f32.mrf.mxu0 }
 0x109   :  { %v670_v33 = vsel %vm667_vm2, %v668_v30, %v669_v31  ;;  %v1003_v34 = vsel %vm1000_vm3, %v1001_v29, %v1002_v28  ;;  %v673_v44 = vrot.slane %v7609_v32, 1  ;;  %v1006_v45 = vrot.slane %v7609_v32, 3  ;;  %v7746_v30 = vld [vmem:[%s7343_s13 + $0x108] sm:$0xff] }
 0x10a   :  { %v7616_v36 = vpop.f32.mrf.mxu0  ;;  %6600 = vmatmul.mubr.msk.f32.vlgmr.msra.gmra.mxu1 %vm561_vm1, %v670_v33  ;;  %6618 = vmatmul.mubr.msk.f32.vlgmr.msra.gmra.mxu0 %vm561_vm1, %v1003_v34  ;;  %v884_v63 = vsel %vm881_vm4, %v882_v60, %v883_v61  ;;  %10651 = vst [vmem:[#allocation51_spill] sm:$0xff] %v7746_v30  ;;  %v887_v33 = vrot.slane %v7609_v32, 2  ;;  %v7802_v60 = vld [vmem:[%s7363_s29 + $0x50] sm:$0xff] }
 0x10b   :  { %759 = vmatprep.mubr.f32.mxu1 %v10411_v24  ;;  %1092 = vmatprep.mubr.f32.mxu0 %v10411_v24  ;;  %v671_v38 = vrot.slane %v7616_v36, 1  ;;  %v1004_v39 = vrot.slane %v7616_v36, 3  ;;  %v885_v0 = vrot.slane %v7616_v36, 2  ;;  %10658 = vst [vmem:[#allocation58_spill] sm:$0xff] %v7802_v60 }
 0x10c   :  { %6605 = vmatpush1.msk.msra.mxu1 %vm574_vm0, %v7614_v35 }
 0x10d   :  { %v672_v40 = vsel %vm667_vm2, %v669_v31, %v671_v38  ;;  %v1005_v41 = vsel %vm1000_vm3, %v1002_v28, %v1004_v39  ;;  %818 = vmatprep.subr.mxu1 %v7621_v37  ;;  %v674_v46 = vsel %vm667_vm2, %v671_v38, %v673_v44  ;;  %v1007_v47 = vsel %vm1000_vm3, %v1004_v39, %v1006_v45  ;;  %v7741_v28 = vld [vmem:[%s7343_s13 + $0x110] sm:$0xff]  ;;  %v7751_v31 = vld [vmem:[%s7343_s13 + $0x100] sm:$0xff]  ;;  %s10878_s13 = sld [smem:[#allocation7_spill]] }
 0x10e   :  { %6601 = vmatmul.mubr.msk.f32.gmra.mxu1 %vm561_vm1, %v672_v40  ;;  %6619 = vmatmul.mubr.msk.f32.gmra.mxu0 %vm561_vm1, %v1005_v41  ;;  %10650 = vst [vmem:[#allocation50_spill] sm:$0xff] %v7741_v28  ;;  %v886_v29 = vsel %vm881_vm4, %v883_v61, %v885_v0  ;;  %10652 = vst [vmem:[#allocation52_spill] sm:$0xff] %v7751_v31  ;;  %v888_v34 = vsel %vm881_vm4, %v885_v0, %v887_v33  ;;  %v1119_v38 = vrot.slane %v7603_v27, 4  ;;  %v7807_v61 = vld [vmem:[%s7363_s29 + $0x48] sm:$0xff]  ;;  %v7817_v0 = vld [vmem:[%s7363_s29 + $0x38] sm:$0xff] }
 0x10f   :  { %765 = vmatprep.mubr.f32.mxu1 %v10411_v24  ;;  %1098 = vmatprep.mubr.f32.mxu0 %v10411_v24  ;;  %v1120_v39 = vrot.slane %v7601_v26, 4  ;;  %v1122_v41 = vrot.slane %v7616_v36, 4  ;;  %10659 = vst [vmem:[#allocation59_spill] sm:$0xff] %v7807_v61  ;;  %10661 = vst [vmem:[#allocation61_spill] sm:$0xff] %v7817_v0 }
 0x110   :  { %819 = vmatpush1.msra.mxu1 %v7633_v42 }
 0x111   :  { %820 = vmatprep.subr.mxu1 %v7638_v43  ;;  %v1121_v40 = vsel %vm574_vm0, %v1119_v38, %v1120_v39  ;;  %v7837_v38 = vld [vmem:[%s7363_s29 + $0x18] sm:$0xff] }
 0x112   :  { %6602 = vmatmul.mubr.msk.f32.gmra.mxu1 %vm561_vm1, %v674_v46  ;;  %6620 = vmatmul.mubr.msk.f32.gmra.mxu0 %vm561_vm1, %v1007_v47  ;;  %v7792_v46 = vld [vmem:[%s7363_s29 + $0x60] sm:$0xff]  ;;  %v7797_v47 = vld [vmem:[%s7363_s29 + $0x58] sm:$0xff]  ;;  %10665 = vst [vmem:[#allocation65_spill] sm:$0xff] %v7837_v38 }
 0x113   :  { %771 = vmatprep.mubr.f32.mxu1 %v10411_v24  ;;  %1104 = vmatprep.mubr.f32.mxu0 %v10411_v24  ;;  %10656 = vst [vmem:[#allocation56_spill] sm:$0xff] %v7792_v46  ;;  %10657 = vst [vmem:[#allocation57_spill] sm:$0xff] %v7797_v47 }
 0x114   :  { %821 = vmatpush1.msra.mxu1 %v7649_v48 }
 0x115   :  { %822 = vmatprep.subr.mxu1 %v7654_v49 }
 0x116   :  { %6603 = vmatmul.mubr.msk.f32.gmra.mxu1 %vm561_vm1, %v673_v44  ;;  %6621 = vmatmul.mubr.msk.f32.gmra.mxu0 %vm561_vm1, %v1006_v45  ;;  %v7782_v45 = vld [vmem:[%s7363_s29 + $0x70] sm:$0xff] }
 0x117   :  { %823 = vmatpush1.msra.mxu1 %v7660_v50  ;;  %856 = vmatprep.mubr.f32.mxu1 %v10411_v24  ;;  %10654 = vst [vmem:[#allocation54_spill] sm:$0xff] %v7782_v45 }
 0x118   :  { %6610 = vmatprep.subr.msk.mxu1 %vm574_vm0, %v7664_v51  ;;  %1342 = vmatprep.mubr.f32.mxu0 %v10411_v24 }
 0x11a   :  { %6606 = vmatmul.mubr.msk.f32.vlgmr.msra.gmra.mxu1 %vm561_vm1, %v7603_v27  ;;  %v1123_v27 = vsel %vm574_vm0, %v1120_v39, %v1122_v41  ;;  %v7842_v39 = vld [vmem:[%s7363_s29 + $0x10] sm:$0xff] }
 0x11b   :  { %862 = vmatprep.mubr.f32.mxu1 %v10411_v24  ;;  %6611 = vmatpush1.msk.msra.mxu1 %vm574_vm0, %v7673_v52  ;;  %10666 = vst [vmem:[#allocation66_spill] sm:$0xff] %v7842_v39 }
 0x11c   :  { %929 = vmatprep.subr.mxu1 %v7677_v53 }
 0x11d   :  { %930 = vmatpush1.msra.mxu1 %v7682_v54 }
 0x11e   :  { %6607 = vmatmul.mubr.msk.f32.gmra.mxu1 %vm561_vm1, %v7601_v26  ;;  %931 = vmatprep.subr.mxu1 %v7688_v55  ;;  %v1124_v26 = vrot.slane %v7609_v32, 4 }
 0x11f   :  { %868 = vmatprep.mubr.f32.mxu1 %v10411_v24  ;;  %932 = vmatpush1.msra.mxu1 %v7692_v56  ;;  %v1238_v56 = vlaneseq }
 0x120   :  { %933 = vmatprep.subr.mxu1 %v7696_v57  ;;  %v1125_v44 = vsel %vm574_vm0, %v1122_v41, %v1124_v26  ;;  %v7852_v41 = vld [vmem:[%s7363_s29] sm:$0xff] }
 0x121   :  { %934 = vmatpush1.msra.mxu1 %v7702_v58  ;;  %10668 = vst [vmem:[#allocation68_spill] sm:$0xff] %v7852_v41  ;;  %v7873_v17 = vshrl.u32 %v1238_v56, 7 }
 0x122   :  { %6608 = vmatmul.mubr.msk.f32.gmra.mxu1 %vm561_vm1, %v7616_v36  ;;  %6622 = vmatprep.subr.msk.mxu1 %vm574_vm0, %v7707_v59  ;;  %v7779_v36 = vld [vmem:[%s7363_s29 + $0x78] sm:$0xff] }
 0x123   :  { %874 = vmatprep.mubr.f32.mxu1 %v10411_v24  ;;  %10653 = vst [vmem:[#allocation53_spill] sm:$0xff] %v7779_v36  ;;  %10672 = vst [vmem:[#allocation72_spill] sm:$0xff] %v7873_v17 }
 0x126   :  { %6609 = vmatmul.mubr.msk.f32.gmra.mxu1 %vm561_vm1, %v7609_v32  ;;  %v7787_v32 = vld [vmem:[%s7363_s29 + $0x68] sm:$0xff] }
 0x127   :  { %967 = vmatprep.mubr.f32.mxu1 %v10411_v24  ;;  %10655 = vst [vmem:[#allocation55_spill] sm:$0xff] %v7787_v32 }
 0x12a   :  { %6612 = vmatmul.mubr.msk.f32.vlgmr.msra.gmra.mxu1 %vm561_vm1, %v884_v63  ;;  %v7812_v63 = vld [vmem:[%s7363_s29 + $0x40] sm:$0xff] }
 0x12b   :  { %973 = vmatprep.mubr.f32.mxu1 %v10411_v24  ;;  %6623 = vmatpush1.msk.msra.mxu1 %vm574_vm0, %v7722_v62  ;;  %10660 = vst [vmem:[#allocation60_spill] sm:$0xff] %v7812_v63 }
 0x12c   :  { %1166 = vmatprep.subr.mxu1 %v7727_v1 }
 0x12d   :  { %1167 = vmatpush1.msra.mxu1 %v7731_v3 }
 0x12e   :  { %6613 = vmatmul.mubr.msk.f32.gmra.mxu1 %vm561_vm1, %v886_v29  ;;  %1168 = vmatprep.subr.mxu1 %v7737_v6  ;;  %v7822_v29 = vld [vmem:[%s7363_s29 + $0x30] sm:$0xff] }
 0x12f   :  { %979 = vmatprep.mubr.f32.mxu1 %v10411_v24  ;;  %1169 = vmatpush1.msra.mxu1 %v7741_v28  ;;  %10662 = vst [vmem:[#allocation62_spill] sm:$0xff] %v7822_v29 }
 0x130   :  { %1170 = vmatprep.subr.mxu1 %v7746_v30 }
 0x131   :  { %1171 = vmatpush1.msra.mxu1 %v7751_v31 }
 0x132   :  { %6614 = vmatmul.mubr.msk.f32.gmra.mxu1 %vm561_vm1, %v888_v34  ;;  %1449 = vmatprep.subr.mxu1 %v10411_v24  ;;  %v7832_v34 = vld [vmem:[%s7363_s29 + $0x20] sm:$0xff] }
 0x133   :  { %985 = vmatprep.mubr.f32.mxu1 %v10411_v24  ;;  %10664 = vst [vmem:[#allocation64_spill] sm:$0xff] %v7832_v34 }
 0x136   :  { %6615 = vmatmul.mubr.msk.f32.gmra.mxu1 %vm561_vm1, %v887_v33  ;;  %v7827_v33 = vld [vmem:[%s7363_s29 + $0x28] sm:$0xff] }
 0x137   :  { %1204 = vmatprep.mubr.f32.mxu1 %v10411_v24  ;;  %10663 = vst [vmem:[#allocation63_spill] sm:$0xff] %v7827_v33 }
 0x13a   :  { %6624 = vmatmul.mubr.msk.f32.vlgmr.msra.gmra.mxu1 %vm561_vm1, %v1121_v40  ;;  %v7847_v40 = vld [vmem:[%s7363_s29 + $0x8] sm:$0xff] }
 0x13b   :  { %1210 = vmatprep.mubr.f32.mxu1 %v10411_v24  ;;  %1450 = vmatpush1.msra.mxu1 %v7779_v36  ;;  %10667 = vst [vmem:[#allocation67_spill] sm:$0xff] %v7847_v40 }
 0x13c   :  { %1451 = vmatprep.subr.mxu1 %v10411_v24 }
 0x13d   :  { %1452 = vmatpush1.msra.mxu1 %v7782_v45 }
 0x13e   :  { %6625 = vmatmul.mubr.msk.f32.gmra.mxu1 %vm561_vm1, %v1123_v27  ;;  %1453 = vmatprep.subr.mxu1 %v10411_v24  ;;  %v7857_v27 = vld [vmem:[%s7363_s29 + $0xc8] sm:$0xff] }
 0x13f   :  { %1216 = vmatprep.mubr.f32.mxu1 %v10411_v24  ;;  %1454 = vmatpush1.msra.mxu1 %v7787_v32  ;;  %10669 = vst [vmem:[#allocation69_spill] sm:$0xff] %v7857_v27 }
 0x140   :  { %1455 = vmatprep.subr.mxu1 %v10411_v24 }
 0x141   :  { %1456 = vmatpush1.msra.mxu1 %v7792_v46 }
 0x142   :  { %6626 = vmatmul.mubr.msk.f32.gmra.mxu1 %vm561_vm1, %v1125_v44  ;;  %1457 = vmatprep.subr.mxu1 %v10411_v24  ;;  %v7867_v44 = vld [vmem:[%s7363_s29 + $0xb8] sm:$0xff] }
 0x143   :  { %1222 = vmatprep.mubr.f32.mxu1 %v10411_v24  ;;  %1458 = vmatpush1.msra.mxu1 %v7797_v47  ;;  %10671 = vst [vmem:[#allocation71_spill] sm:$0xff] %v7867_v44 }
 0x144   :  { %1459 = vmatprep.subr.mxu1 %v10411_v24 }
 0x145   :  { %1460 = vmatpush1.msra.mxu1 %v7802_v60 }
 0x146   :  { %6627 = vmatmul.mubr.msk.f32.gmra.mxu1 %vm561_vm1, %v1124_v26  ;;  %1461 = vmatprep.subr.mxu1 %v10411_v24  ;;  %v7862_v26 = vld [vmem:[%s7363_s29 + $0xc0] sm:$0xff] }
 0x147   :  { %1462 = vmatpush1.msra.mxu1 %v7807_v61  ;;  %10670 = vst [vmem:[#allocation70_spill] sm:$0xff] %v7862_v26 }
 0x148   :  { %1463 = vmatprep.subr.mxu1 %v10411_v24 }
 0x149   :  { %1464 = vmatpush1.msra.mxu1 %v7812_v63 }
 0x14a   :  { %1465 = vmatprep.subr.mxu1 %v10411_v24 }
 0x14b   :  { %1466 = vmatpush1.msra.mxu1 %v7817_v0 }
 0x14c   :  { %1467 = vmatprep.subr.mxu1 %v10411_v24 }
 0x14d   :  { %1468 = vmatpush1.msra.mxu1 %v7822_v29 }
 0x14e   :  { %1469 = vmatprep.subr.mxu1 %v10411_v24 }
 0x14f   :  { %1470 = vmatpush1.msra.mxu1 %v7827_v33 }
 0x150   :  { %1471 = vmatprep.subr.mxu1 %v10411_v24 }
 0x151   :  { %1472 = vmatpush1.msra.mxu1 %v7832_v34 }
 0x152   :  { %1473 = vmatprep.subr.mxu1 %v10411_v24 }
 0x153   :  { %1474 = vmatpush1.msra.mxu1 %v7837_v38 }
 0x154   :  { %1475 = vmatprep.subr.mxu1 %v10411_v24 }
 0x155   :  { %1476 = vmatpush1.msra.mxu1 %v7842_v39 }
 0x156   :  { %1477 = vmatprep.subr.mxu1 %v10411_v24 }
 0x157   :  { %1478 = vmatpush1.msra.mxu1 %v7847_v40 }
 0x158   :  { %1479 = vmatprep.subr.mxu1 %v10411_v24 }
 0x159   :  { %1480 = vmatpush1.msra.mxu1 %v7852_v41 }
 0x15a   :  { %1493 = vmatprep.subr.mxu1 %v10411_v24 }
 0x15b   :  { %1494 = vmatpush2.msra.mxu1 %v7857_v27 }
 0x15c   :  { %1495 = vmatprep.subr.mxu1 %v10411_v24 }
 0x15d   :  { %1496 = vmatpush2.msra.mxu1 %v7862_v26 }
 0x15e   :  { %1497 = vmatprep.subr.mxu1 %v10411_v24 }
 0x15f   :  { %1498 = vmatpush2.msra.mxu1 %v7867_v44 }
 0x160   :  { %1499 = vmatprep.subr.mxu1 %v10411_v24 }
 0x1ca   :  { %v755_v40 = vpop.f32.mrf.mxu1  ;;  %v1088_v45 = vpop.f32.mrf.mxu0 }
 0x1cc   :  { %v757_v41 = vpop.f32.mrf.mxu1  ;;  %v1090_v24 = vpop.f32.mrf.mxu0 }
 0x1ce   :  { %v761_v39 = vpop.f32.mrf.mxu1  ;;  %v1094_v28 = vpop.f32.mrf.mxu0 }
 0x1d0   :  { %v763_v38 = vpop.f32.mrf.mxu1  ;;  %v1096_v1 = vpop.f32.mrf.mxu0 }
 0x1d2   :  { %v767_v34 = vpop.f32.mrf.mxu1  ;;  %v1100_v58 = vpop.f32.mrf.mxu0 }
 0x1d4   :  { %v769_v33 = vpop.f32.mrf.mxu1  ;;  %v1102_v55 = vpop.f32.mrf.mxu0 }
 0x1d6   :  { %v773_v29 = vpop.f32.mrf.mxu1  ;;  %v1106_v22 = vpop.f32.mrf.mxu0 }
 0x1d8   :  { %v775_v27 = vpop.f32.mrf.mxu1 }
 0x1da   :  { %v858_v0 = vpop.f32.mrf.mxu1 }
 0x1db   :  { %v859_v49 = vadd.f32 %v858_v0, %v755_v40  ;;  %v7913_v40 = vld [vmem:[%s7358_s25] sm:$0xff] }
 0x1dc   :  { %v860_v63 = vpop.f32.mrf.mxu1 }
 0x1dd   :  { %v861_v50 = vadd.f32 %v860_v63, %v757_v41  ;;  %v7916_v41 = vld [vmem:[%s7368_s3 + $0x78] sm:$0xff] }
 0x1de   :  { %v864_v61 = vpop.f32.mrf.mxu1 }
 0x1df   :  { %v865_v8 = vadd.f32 %v864_v61, %v761_v39  ;;  %v7907_v39 = vld [vmem:[%s7353_s21 + $0x8] sm:$0x1f] }
 0x1e0   :  { %v866_v60 = vpop.f32.mrf.mxu1 }
 0x1e1   :  { %v867_v15 = vadd.f32 %v866_v60, %v763_v38  ;;  %v7880_v60 = vsub.s32 1, %v7873_v17  ;;  %v10675_v38 = vmov 0.0  }
 0x1e2   :  { %v870_v47 = vpop.f32.mrf.mxu1 }
 0x1e3   :  { %v871_v53 = vadd.f32 %v870_v47, %v767_v34  ;;  %10674 = vst [vmem:[#allocation74_spill] sm:$0xff] %v7880_v60  ;;  %v7899_v34 = vld [vmem:[%s7353_s21] sm:$0xff]  ;;  %s10984_s21 = sld [smem:[#allocation10_spill]] }
 0x1e4   :  { %v872_v26 = vpop.f32.mrf.mxu1 }
 0x1e5   :  { %v873_v54 = vadd.f32 %v872_v26, %v769_v33  ;;  %v7926_v26 = vld [vmem:[%s7358_s25 + $0x8] sm:$0x1f]  ;;  %s10987_s25 = sld [smem:[#allocation13_spill]] }
 0x1e6   :  { %v876_v46 = vpop.f32.mrf.mxu1 }
 0x1e7   :  { %v877_v19 = vadd.f32 %v876_v46, %v773_v29  ;;  %v7876_v46 = vsub.s32 0, %v7873_v17  ;;  %v143_v29 = vld [vmem:[%s7348_s17] sm:$0x3]  ;;  %s10879_s17 = sld [smem:[#allocation8_spill]] }
 0x1e8   :  { %v878_v32 = vpop.f32.mrf.mxu1  ;;  %v7886_v61 = vrot.slane %v143_v29, %v7880_v60  ;;  %v6642_v60 = vld [vmem:[%s7333_s5 + $0x30] sm:$0xff] }
 0x1e9   :  { %v879_v13 = vadd.f32 %v878_v32, %v775_v27  ;;  %10673 = vst [vmem:[#allocation73_spill] sm:$0xff] %v7876_v46  ;;  %v7922_v27 = vld [vmem:[%s7368_s3 + $0x70] sm:$0xff] }
 0x1ea   :  { %v969_v44 = vpop.f32.mrf.mxu1 }
 0x1ec   :  { %v971_v36 = vpop.f32.mrf.mxu1 }
 0x1ed   :  { %v993_v47 = vadd.f32 %v971_v36, %v861_v50 }
 0x1ee   :  { %v975_v31 = vpop.f32.mrf.mxu1 }
 0x1ef   :  { %v994_v14 = vadd.f32 %v975_v31, %v865_v8  ;;  %v7883_v8 = vrot.slane %v143_v29, %v7876_v46  ;;  %v1112_v36 = vadd.f32 %v1090_v24, %v993_v47  ;;  %v7943_v47 = vld [vmem:[%s7368_s3 + $0x58] sm:$0xff]  ;;  %v7948_v29 = vld [vmem:[%s7368_s3 + $0x50] sm:$0xff] }
 0x1f0   :  { %v977_v30 = vpop.f32.mrf.mxu1  ;;  %10676 = vst [vmem:[#allocation75_spill] sm:$0xff] %v7943_v47  ;;  %10677 = vst [vmem:[#allocation76_spill] sm:$0xff] %v7948_v29 }
 0x1f1   :  { %v995_v16 = vadd.f32 %v977_v30, %v867_v15  ;;  %v1113_v30 = vadd.f32 %v1094_v28, %v994_v14 }
 0x1f2   :  { %v981_v6 = vpop.f32.mrf.mxu1 }
 0x1f3   :  { %v996_v20 = vadd.f32 %v981_v6, %v871_v53  ;;  %v1114_v32 = vadd.f32 %v1096_v1, %v995_v16 }
 0x1f4   :  { %v983_v3 = vpop.f32.mrf.mxu1 }
 0x1f5   :  { %v997_v10 = vadd.f32 %v983_v3, %v873_v54  ;;  %v992_v3 = vadd.f32 %v969_v44, %v859_v49  ;;  %v1115_v53 = vadd.f32 %v1100_v58, %v996_v20  ;;  %v7931_v44 = vld [vmem:[%s7368_s3 + $0x68] sm:$0xff] }
 0x1f6   :  { %v987_v62 = vpop.f32.mrf.mxu1 }
 0x1f7   :  { %v998_v51 = vadd.f32 %v987_v62, %v877_v19  ;;  %v1116_v54 = vadd.f32 %v1102_v55, %v997_v10  ;;  %v1108_v62 = vpop.f32.mrf.mxu0 }
 0x1f8   :  { %v989_v59 = vpop.f32.mrf.mxu1 }
 0x1f9   :  { %v999_v11 = vadd.f32 %v989_v59, %v879_v13  ;;  %v1117_v19 = vadd.f32 %v1106_v22, %v998_v51  ;;  %v1111_v51 = vadd.f32 %v1088_v45, %v992_v3  ;;  %v7968_v3 = vld [vmem:[%s7368_s3 + $0x30] sm:$0xff] }
 0x1fa   :  { %v1206_v57 = vpop.f32.mrf.mxu1  ;;  %10681 = vst [vmem:[#allocation80_spill] sm:$0xff] %v7968_v3 }
 0x1fb   :  { %v1118_v59 = vadd.f32 %v1108_v62, %v999_v11  ;;  %v1229_v58 = vadd.f32 %v1206_v57, %v1111_v51  ;;  %v7963_v62 = vld [vmem:[%s7368_s3 + $0x38] sm:$0xff]  ;;  %v8033_v51 = vld [vmem:[%s7368_s3 + $0xa8] sm:$0xff] }
 0x1fc   :  { %v1208_v23 = vpop.f32.mrf.mxu1  ;;  %10680 = vst [vmem:[#allocation79_spill] sm:$0xff] %v7963_v62  ;;  %10692 = vst [vmem:[#allocation91_spill] sm:$0xff] %v8033_v51 }
 0x1fd   :  { %v1230_v16 = vadd.f32 %v1208_v23, %v1112_v36  ;;  %v1248_v23 = vadd.f32 %v7883_v8, %v1229_v58  ;;  %v8020_v36 = vld [vmem:[%s7363_s29 + $0xb0] sm:$0xff] }
 0x1fe   :  { %v1212_v21 = vpop.f32.mrf.mxu1  ;;  %1500 = vmatpush2.msra.mxu1 %v8020_v36  ;;  %v8063_v58 = vld [vmem:[%s7368_s3 + $0x90] sm:$0xff] }
 0x1ff   :  { %v1231_v49 = vadd.f32 %v1212_v21, %v1113_v30  ;;  %v1249_v21 = vadd.f32 %v7886_v61, %v1230_v16  ;;  %v1256_v33 = vmax.f32 %v1248_v23, 0.0  ;;  %v8003_v30 = vld [vmem:[%s7368_s3 + $0xc8] sm:$0xff]  ;;  %1501 = vmatprep.subr.mxu1 %v10675_v38  ;;  %v8050_v16 = vld [vmem:[%s7363_s29 + $0x98] sm:$0xff]  ;;  %10695 = vst [vmem:[#allocation94_spill] sm:$0xff] %v8063_v58 }
 0x200   :  { %v1214_v52 = vpop.f32.mrf.mxu1  ;;  %10688 = vst [vmem:[#allocation87_spill] sm:$0xff] %v8003_v30 }
 0x201   :  { %v1232_v10 = vadd.f32 %v1214_v52, %v1114_v32  ;;  %v1250_v1 = vadd.f32 %v7883_v8, %v1231_v49  ;;  %v1257_v0 = vmax.f32 %v1249_v21, 0.0  ;;  %v7983_v32 = vld [vmem:[%s7368_s3 + $0x18] sm:$0xff]  ;;  %v8040_v49 = vld [vmem:[%s7363_s29 + $0xa0] sm:$0xff] }
 0x202   :  { %v1218_v18 = vpop.f32.mrf.mxu1  ;;  %10684 = vst [vmem:[#allocation83_spill] sm:$0xff] %v7983_v32 }
 0x203   :  { %v1233_v31 = vadd.f32 %v1218_v18, %v1115_v53  ;;  %v1251_v18 = vadd.f32 %v7886_v61, %v1232_v10  ;;  %v1258_v63 = vmax.f32 %v1250_v1, 0.0  ;;  %v7973_v53 = vld [vmem:[%s7368_s3 + $0x28] sm:$0xff]  ;;  %v8023_v10 = vld [vmem:[%s7368_s3 + $0xb0] sm:$0xff]  ;;  %v8083_v1 = vld [vmem:[%s7368_s3 + $0x80] sm:$0xff] }
 0x204   :  { %v1220_v56 = vpop.f32.mrf.mxu1  ;;  %10682 = vst [vmem:[#allocation81_spill] sm:$0xff] %v7973_v53  ;;  %10691 = vst [vmem:[#allocation90_spill] sm:$0xff] %v8023_v10 }
 0x205   :  { %v1234_v15 = vadd.f32 %v1220_v56, %v1116_v54  ;;  %v1252_v14 = vadd.f32 %v7883_v8, %v1233_v31  ;;  %v1259_v57 = vmax.f32 %v1251_v18, 0.0  ;;  %v7938_v56 = vld [vmem:[%s7368_s3 + $0x60] sm:$0xff]  ;;  %v7953_v54 = vld [vmem:[%s7368_s3 + $0x48] sm:$0xff]  ;;  %10697 = vst [vmem:[#allocation96_spill] sm:$0xff] %v8083_v1 }
 0x206   :  { %v1224_v6 = vpop.f32.mrf.mxu1  ;;  %10678 = vst [vmem:[#allocation77_spill] sm:$0xff] %v7953_v54  ;;  %v8008_v31 = vld [vmem:[%s7368_s3 + $0xc0] sm:$0xff]  ;;  %v8073_v18 = vld [vmem:[%s7368_s3 + $0x88] sm:$0xff] }
 0x207   :  { %v1235_v13 = vadd.f32 %v1224_v6, %v1117_v19  ;;  %v1253_v55 = vadd.f32 %v7886_v61, %v1234_v15  ;;  %v1260_v45 = vmax.f32 %v1252_v14, 0.0  ;;  %v7958_v19 = vld [vmem:[%s7368_s3 + $0x40] sm:$0xff]  ;;  %v7988_v15 = vld [vmem:[%s7368_s3 + $0x10] sm:$0xff]  ;;  %10689 = vst [vmem:[#allocation88_spill] sm:$0xff] %v8008_v31  ;;  %v8070_v14 = vld [vmem:[%s7363_s29 + $0x88] sm:$0xff] }
 0x208   :  { %v1226_v50 = vpop.f32.mrf.mxu1  ;;  %10679 = vst [vmem:[#allocation78_spill] sm:$0xff] %v7958_v19  ;;  %v7978_v6 = vld [vmem:[%s7368_s3 + $0x20] sm:$0xff]  ;;  %10685 = vst [vmem:[#allocation84_spill] sm:$0xff] %v7988_v15 }
 0x209   :  { %v1236_v22 = vadd.f32 %v1226_v50, %v1118_v59  ;;  %v1254_v20 = vadd.f32 %v7883_v8, %v1235_v13  ;;  %v1261_v28 = vmax.f32 %v1253_v55, 0.0  ;;  %10683 = vst [vmem:[#allocation82_spill] sm:$0xff] %v7978_v6  ;;  %v7993_v13 = vld [vmem:[%s7368_s3 + $0x8] sm:$0xff]  ;;  %v7998_v59 = vld [vmem:[%s7368_s3] sm:$0xff]  ;;  %v8013_v50 = vld [vmem:[%s7368_s3 + $0xb8] sm:$0xff] }
 0x20a   :  { %10686 = vst [vmem:[#allocation85_spill] sm:$0xff] %v7993_v13  ;;  %10687 = vst [vmem:[#allocation86_spill] sm:$0xff] %v7998_v59  ;;  %v8053_v55 = vld [vmem:[%s7368_s3 + $0x98] sm:$0xff] }
 0x20b   :  { %v1255_v11 = vadd.f32 %v7886_v61, %v1236_v22  ;;  %v1262_v52 = vmax.f32 %v1254_v20, 0.0  ;;  %10690 = vst [vmem:[#allocation89_spill] sm:$0xff] %v8013_v50  ;;  %v8030_v22 = vld [vmem:[%s7363_s29 + $0xa8] sm:$0xff]  ;;  %v8043_v20 = vld [vmem:[%s7368_s3 + $0xa0] sm:$0xff]  ;;  %10694 = vst [vmem:[#allocation93_spill] sm:$0xff] %v8053_v55  ;;  %s10989_s3 = sld [smem:[#allocation11_spill]] }
 0x20c   :  { %1502 = vmatpush2.msra.mxu1 %v8030_v22  ;;  %10693 = vst [vmem:[#allocation92_spill] sm:$0xff] %v8043_v20  ;;  %10696 = vst [vmem:[#allocation95_spill] sm:$0xff] %v8073_v18 }
 0x20d   :  { %v1263_v24 = vmax.f32 %v1255_v11, 0.0  ;;  %1503 = vmatprep.subr.mxu1 %v10675_v38  ;;  %v8060_v11 = vld [vmem:[%s7363_s29 + $0x90] sm:$0xff] }
 0x20e   :  { %1504 = vmatpush2.msra.mxu1 %v8040_v49 }
 0x20f   :  { %6628 = vmatprep.subr.msk.mxu0 %vm1271_vm5, %v1263_v24  ;;  %1505 = vmatprep.subr.mxu1 %v10675_v38 }
 0x210   :  { %6629 = vmatpush1.msk.msra.mxu0 %vm1271_vm5, %v1262_v52  ;;  %1506 = vmatpush2.msra.mxu1 %v8050_v16 }
 0x211   :  { %1304 = vmatprep.subr.mxu0 %v1261_v28  ;;  %1507 = vmatprep.subr.mxu1 %v10675_v38 }
 0x212   :  { %1305 = vmatpush1.msra.mxu0 %v1260_v45  ;;  %1508 = vmatpush2.msra.mxu1 %v8060_v11 }
 0x213   :  { %1306 = vmatprep.subr.mxu0 %v1259_v57  ;;  %1509 = vmatprep.subr.mxu1 %v10675_v38 }
 0x214   :  { %1307 = vmatpush1.msra.mxu0 %v1258_v63  ;;  %1510 = vmatpush2.msra.mxu1 %v8070_v14 }
 0x215   :  { %1308 = vmatprep.subr.mxu0 %v1257_v0  ;;  %1511 = vmatprep.subr.mxu1 %v10675_v38 }
 0x216   :  { %1309 = vmatpush1.msra.mxu0 %v1256_v33 }
 0x217   :  { %6630 = vmatmul.mubr.msk.f32.vlgmr.msra.gmra.mxu0 %vm1264_vm6, %v7899_v34  ;;  %6632 = vmatprep.subr.msk.mxu0 %vm1271_vm5, %v1263_v24  ;;  %v8080_v24 = vld [vmem:[%s7363_s29 + $0x80] sm:$0xff]  ;;  %s10988_s29 = sld [smem:[#allocation14_spill]] }
 0x218   :  { %6633 = vmatpush1.msk.msra.mxu0 %vm1271_vm5, %v1262_v52  ;;  %1348 = vmatprep.mubr.f32.mxu0 %v10675_v38  ;;  %v6643_v52 = vld [vmem:[%s7333_s5 + $0x38] sm:$0xf] }
 0x219   :  { %1387 = vmatprep.subr.mxu0 %v1261_v28  ;;  %1512 = vmatpush2.msra.mxu1 %v8080_v24 }
 0x21a   :  { %1388 = vmatpush1.msra.mxu0 %v1260_v45  ;;  %6920 = vmatprep.subr.msk.mxu1 %vm574_vm0, %v6643_v52 }
 0x21b   :  { %6631 = vmatmul.mubr.msk.f32.gmra.mxu0 %vm1264_vm6, %v7907_v39  ;;  %1389 = vmatprep.subr.mxu0 %v1259_v57 }
 0x21c   :  { %1390 = vmatpush1.msra.mxu0 %v1258_v63  ;;  %1425 = vmatprep.mubr.f32.mxu0 %v10675_v38 }
 0x21d   :  { %1391 = vmatprep.subr.mxu0 %v1257_v0 }
 0x21e   :  { %1392 = vmatpush1.msra.mxu0 %v1256_v33 }
 0x21f   :  { %6634 = vmatmul.mubr.msk.f32.vlgmr.msra.gmra.mxu0 %vm1264_vm6, %v7913_v40  ;;  %1524 = vmatprep.subr.mxu0 %v10675_v38 }
 0x220   :  { %1431 = vmatprep.mubr.f32.mxu0 %v10675_v38  ;;  %1525 = vmatpush1.msra.mxu0 %v7916_v41 }
 0x221   :  { %1526 = vmatprep.subr.mxu0 %v10675_v38 }
 0x222   :  { %1527 = vmatpush1.msra.mxu0 %v7922_v27 }
 0x223   :  { %6635 = vmatmul.mubr.msk.f32.gmra.mxu0 %vm1264_vm6, %v7926_v26  ;;  %1528 = vmatprep.subr.mxu0 %v10675_v38 }
 0x224   :  { %1529 = vmatpush1.msra.mxu0 %v7931_v44 }
 0x225   :  { %1530 = vmatprep.subr.mxu0 %v10675_v38 }
 0x226   :  { %1531 = vmatpush1.msra.mxu0 %v7938_v56 }
 0x227   :  { %1532 = vmatprep.subr.mxu0 %v10675_v38 }
 0x228   :  { %1533 = vmatpush1.msra.mxu0 %v7943_v47 }
 0x229   :  { %1534 = vmatprep.subr.mxu0 %v10675_v38 }
 0x22a   :  { %1535 = vmatpush1.msra.mxu0 %v7948_v29 }
 0x22b   :  { %1536 = vmatprep.subr.mxu0 %v10675_v38 }
 0x22c   :  { %1537 = vmatpush1.msra.mxu0 %v7953_v54 }
 0x22d   :  { %1538 = vmatprep.subr.mxu0 %v10675_v38 }
 0x22e   :  { %1539 = vmatpush1.msra.mxu0 %v7958_v19 }
 0x22f   :  { %1540 = vmatprep.subr.mxu0 %v10675_v38 }
 0x230   :  { %1541 = vmatpush1.msra.mxu0 %v7963_v62 }
 0x231   :  { %1542 = vmatprep.subr.mxu0 %v10675_v38 }
 0x232   :  { %1543 = vmatpush1.msra.mxu0 %v7968_v3 }
 0x233   :  { %1544 = vmatprep.subr.mxu0 %v10675_v38 }
 0x234   :  { %1545 = vmatpush1.msra.mxu0 %v7973_v53 }
 0x235   :  { %1546 = vmatprep.subr.mxu0 %v10675_v38 }
 0x236   :  { %1547 = vmatpush1.msra.mxu0 %v7978_v6 }
 0x237   :  { %1548 = vmatprep.subr.mxu0 %v10675_v38 }
 0x238   :  { %1549 = vmatpush1.msra.mxu0 %v7983_v32 }
 0x239   :  { %1550 = vmatprep.subr.mxu0 %v10675_v38 }
 0x23a   :  { %1551 = vmatpush1.msra.mxu0 %v7988_v15 }
 0x23b   :  { %1552 = vmatprep.subr.mxu0 %v10675_v38 }
 0x23c   :  { %1553 = vmatpush1.msra.mxu0 %v7993_v13 }
 0x23d   :  { %1554 = vmatprep.subr.mxu0 %v10675_v38 }
 0x23e   :  { %1555 = vmatpush1.msra.mxu0 %v7998_v59 }
 0x23f   :  { %1568 = vmatprep.subr.mxu0 %v10675_v38 }
 0x240   :  { %1569 = vmatpush2.msra.mxu0 %v8003_v30 }
 0x241   :  { %1570 = vmatprep.subr.mxu0 %v10675_v38 }
 0x242   :  { %1571 = vmatpush2.msra.mxu0 %v8008_v31 }
 0x243   :  { %1572 = vmatprep.subr.mxu0 %v10675_v38 }
 0x244   :  { %1573 = vmatpush2.msra.mxu0 %v8013_v50 }
 0x245   :  { %1574 = vmatprep.subr.mxu0 %v10675_v38 }
 0x246   :  { %1575 = vmatpush2.msra.mxu0 %v8023_v10 }
 0x247   :  { %1576 = vmatprep.subr.mxu0 %v10675_v38 }
 0x248   :  { %1577 = vmatpush2.msra.mxu0 %v8033_v51 }
 0x249   :  { %1578 = vmatprep.subr.mxu0 %v10675_v38 }
 0x24a   :  { %1579 = vmatpush2.msra.mxu0 %v8043_v20 }
 0x24b   :  { %1580 = vmatprep.subr.mxu0 %v10675_v38 }
 0x24c   :  { %1581 = vmatpush2.msra.mxu0 %v8053_v55 }
 0x24d   :  { %1582 = vmatprep.subr.mxu0 %v10675_v38 }
 0x24e   :  { %1583 = vmatpush2.msra.mxu0 %v8063_v58 }
 0x24f   :  { %1584 = vmatprep.subr.mxu0 %v10675_v38 }
 0x250   :  { %1585 = vmatpush2.msra.mxu0 %v8073_v18 }
 0x251   :  { %1586 = vmatprep.subr.mxu0 %v10675_v38 }
 0x252   :  { %1587 = vmatpush2.msra.mxu0 %v8083_v1 }
 0x253   :  { %6655 = vmatprep.subr.msk.mxu0 %vm574_vm0, %v7597_v25 }
 0x2d7   :  { %v1344_v21 = vpop.f32.mrf.mxu0 }
 0x2d9   :  { %v1346_v28 = vpop.f32.mrf.mxu0 }
 0x2db   :  { %v1350_v23 = vpop.f32.mrf.mxu0 }
 0x2dd   :  { %v1352_v45 = vpop.f32.mrf.mxu0 }
 0x2df   :  { %v1427_v57 = vpop.f32.mrf.mxu0 }
 0x2e0   :  { %v1438_v33 = vmax.f32 %v1344_v21, %v1427_v57  ;;  %v6640_v21 = vld [vmem:[%s7333_s5 + $0x20] sm:$0xff] }
 0x2e1   :  { %v1429_v63 = vpop.f32.mrf.mxu0 }
 0x2e2   :  { %v1439_v0 = vmax.f32 %v1346_v28, %v1429_v63  ;;  %v6641_v28 = vld [vmem:[%s7333_s5 + $0x28] sm:$0xff]  ;;  %s10875_s5 = sld [smem:[#allocation5_spill]] }
 0x2e3   :  { %v1433_v17 = vpop.f32.mrf.mxu0 }
 0x2e4   :  { %6636 = vmatprep.mubr.msk.f32.mxu1 %vm1442_vm7, %v1439_v0  ;;  %6638 = vmatprep.mubr.msk.f32.mxu0 %vm1442_vm7, %v1439_v0  ;;  %v1440_v1 = vmax.f32 %v1350_v23, %v1433_v17  ;;  %v10699_v17 = vld [vmem:[#allocation35_spill] sm:$0xff] }
 0x2e5   :  { %v1435_v25 = vpop.f32.mrf.mxu0  ;;  %1514 = vmatmul.mubr.f32.vlgmr.msra.gmra.mxu1 %v1438_v33  ;;  %1589 = vmatmul.mubr.f32.vlgmr.msra.gmra.mxu0 %v1438_v33 }
 0x2e6   :  { %v1441_v46 = vmax.f32 %v1352_v45, %v1435_v25  ;;  %6921 = vmatpush3.msk.msra.mxu1 %vm574_vm0, %v6643_v52  ;;  %6656 = vmatpush1.msk.msra.mxu0 %vm574_vm0, %v7614_v35  ;;  %v10700_v35 = vld [vmem:[#allocation23_spill] sm:$0xff] }
 0x2e7   :  { %6922 = vmatprep.subr.mxu1 %v6642_v60  ;;  %1858 = vmatprep.subr.mxu0 %v7621_v37  ;;  %v10706_v37 = vld [vmem:[#allocation33_spill] sm:$0xff] }
 0x2e8   :  { %6637 = vmatprep.mubr.msk.f32.mxu1 %vm1442_vm7, %v1441_v46  ;;  %6639 = vmatprep.mubr.msk.f32.mxu0 %vm1442_vm7, %v1441_v46 }
 0x2e9   :  { %6923 = vmatpush3.msra.mxu1 %v6642_v60  ;;  %1594 = vmatmul.mubr.f32.gmra.mxu0 %v1440_v1 }
 0x2ea   :  { %1519 = vmatmul.mubr.f32.gmra.mxu1 %v1440_v1  ;;  %6924 = vmatprep.subr.mxu1 %v6641_v28 }
 0x2eb   :  { %6925 = vmatpush3.msra.mxu1 %v6641_v28  ;;  %6928 = vmatprep.mubr.msk.f32.mxu1 %vm561_vm1, %v7504_v2  ;;  %v10698_v2 = vld [vmem:[#allocation25_spill] sm:$0xff] }
 0x2ec   :  { %6926 = vmatprep.subr.mxu1 %v6640_v21  ;;  %1859 = vmatpush1.msra.mxu0 %v7633_v42  ;;  %v10707_v42 = vld [vmem:[#allocation37_spill] sm:$0xff] }
 0x2ed   :  { %6927 = vmatpush3.msra.mxu1 %v6640_v21  ;;  %1860 = vmatprep.subr.mxu0 %v7638_v43 }
 0x2ee   :  { %6929 = vmatmul.mubr.msk.f32.vlgmr.msra.gmra.mxu1 %vm561_vm1, %v7522_v7  ;;  %6649 = vmatprep.subr.msk.mxu1 %vm574_vm0, %v7511_v4  ;;  %v10701_v7 = vld [vmem:[#allocation27_spill] sm:$0xff]  ;;  %v10702_v4 = vld [vmem:[#allocation36_spill] sm:$0xff] }
 0x2ef   :  { %6931 = vmatprep.mubr.msk.f32.mxu1 %vm561_vm1, %v7528_v9  ;;  %6650 = vmatpush1.msk.msra.mxu1 %vm574_vm0, %v7516_v5  ;;  %v10703_v9 = vld [vmem:[#allocation29_spill] sm:$0xff]  ;;  %v10704_v5 = vld [vmem:[#allocation31_spill] sm:$0xff] }
 0x2f0   :  { %1761 = vmatprep.subr.mxu1 %v7547_v12  ;;  %1861 = vmatpush1.msra.mxu0 %v7649_v48  ;;  %v10705_v12 = vld [vmem:[#allocation21_spill] sm:$0xff] }
 0x2f1   :  { %1762 = vmatpush1.msra.mxu1 %v10698_v2  ;;  %1862 = vmatprep.subr.mxu0 %v10699_v17  ;;  %v10710_v2 = vld [vmem:[#allocation22_spill] sm:$0xff] }
 0x2f2   :  { %6932 = vmatmul.mubr.msk.f32.gmra.mxu1 %vm561_vm1, %v10700_v35  ;;  %1763 = vmatprep.subr.mxu1 %v10701_v7  ;;  %v10711_v35 = vld [vmem:[#allocation24_spill] sm:$0xff] }
 0x2f3   :  { %1863 = vmatpush1.msra.mxu0 %v10702_v4  ;;  %1896 = vmatprep.mubr.f32.mxu0 %v10675_v38  ;;  %v10712_v4 = vld [vmem:[#allocation26_spill] sm:$0xff] }
 0x2f4   :  { %1764 = vmatpush1.msra.mxu1 %v10703_v9  ;;  %1799 = vmatprep.mubr.f32.mxu1 %v10675_v38 }
 0x2f5   :  { %1765 = vmatprep.subr.mxu1 %v10704_v5  ;;  %6667 = vmatprep.subr.msk.mxu0 %vm574_vm0, %v10705_v12  ;;  %v10713_v5 = vld [vmem:[#allocation38_spill] sm:$0xff] }
 0x2f6   :  { %1766 = vmatpush1.msra.mxu1 %v10706_v37  ;;  %v10714_v37 = vld [vmem:[#allocation28_spill] sm:$0xff] }
 0x2f7   :  { %6661 = vmatprep.subr.msk.mxu1 %vm574_vm0, %v10707_v42  ;;  %v10715_v42 = vld [vmem:[#allocation39_spill] sm:$0xff] }
 0x3a5   :  { %v1515_v43 = vpop.f32.mrf.mxu1  ;;  %v1590_v48 = vpop.f32.mrf.mxu0 }
 0x3a6   :  { %v8131_v46 = vmax.f32 %v1515_v43, %v1590_v48  ;;  %v10716_v43 = vld [vmem:[#allocation30_spill] sm:$0xff] }
 0x3a7   :  { %v1517_v60 = vpop.f32.mrf.mxu1  ;;  %v1592_v1 = vpop.f32.mrf.mxu0 }
 0x3a8   :  { %10708 = vst [vmem:[#allocation25_spill] sm:$0xff] %v8131_v46  ;;  %v10717_v60 = vld [vmem:[#allocation40_spill] sm:$0xff] }
 0x3a9   :  { %v1595_v52 = vpop.f32.mrf.mxu0 }
 0x3aa   :  { %v1520_v23 = vpop.f32.mrf.mxu1 }
 0x3ab   :  { %v8133_v45 = vmax.f32 %v1520_v23, %v1595_v52  ;;  %v1597_v57 = vpop.f32.mrf.mxu0  ;;  %v10718_v52 = vld [vmem:[#allocation32_spill] sm:$0xff]  ;;  %v10719_v23 = vld [vmem:[#allocation41_spill] sm:$0xff] }
 0x3ac   :  { %v1522_v63 = vpop.f32.mrf.mxu1 }
 0x3ad   :  { %10709 = vst [vmem:[#allocation35_spill] sm:$0xff] %v8133_v45  ;;  %v10720_v63 = vld [vmem:[#allocation34_spill] sm:$0xff] }
 0x3ae   :  { %v8135_v0 = vpop.f32.mrf.mxu1 }
 0x3af   :  { %v1721_v25 = vrot.slane %v8135_v0, 1 }
 0x3b0   :  { %v8137_v33 = vpop.f32.mrf.mxu1 }
 0x3b1   :  { %v1720_v28 = vrot.slane %v8137_v33, 1  ;;  %6657 = vmatmul.mubr.msk.f32.vlgmr.msra.gmra.mxu0 %vm561_vm1, %v8137_v33  ;;  %v2033_v57 = vrot.slane %v8137_v33, 3 }
 0x3b2   :  { %v8143_v21 = vpop.f32.mrf.mxu1  ;;  %1902 = vmatprep.mubr.f32.mxu0 %v10675_v38  ;;  %6668 = vmatpush1.msk.msra.mxu0 %vm574_vm0, %v10710_v2  ;;  %v1921_v2 = vrot.slane %v8137_v33, 2 }
 0x3b3   :  { %v1722_v17 = vsel %vm667_vm2, %v1720_v28, %v1721_v25  ;;  %2074 = vmatprep.subr.mxu0 %v10711_v35  ;;  %v1725_v48 = vrot.slane %v8143_v21, 1  ;;  %v10721_v28 = vld [vmem:[#allocation42_spill] sm:$0xff] }
 0x3b4   :  { %v8150_v7 = vpop.f32.mrf.mxu1  ;;  %6651 = vmatmul.mubr.msk.f32.vlgmr.msra.gmra.mxu1 %vm561_vm1, %v1722_v17  ;;  %2075 = vmatpush1.msra.mxu0 %v10712_v4  ;;  %v10722_v17 = vld [vmem:[#allocation43_spill] sm:$0xff] }
 0x3b5   :  { %6658 = vmatmul.mubr.msk.f32.gmra.mxu0 %vm561_vm1, %v8135_v0  ;;  %1805 = vmatprep.mubr.f32.mxu1 %v10675_v38  ;;  %v1723_v9 = vrot.slane %v8150_v7, 1  ;;  %v2036_v4 = vrot.slane %v8150_v7, 3 }
 0x3b6   :  { %1908 = vmatprep.mubr.f32.mxu0 %v10675_v38  ;;  %6662 = vmatpush1.msk.msra.mxu1 %vm574_vm0, %v10713_v5  ;;  %v10723_v5 = vld [vmem:[#allocation44_spill] sm:$0xff] }
 0x3b7   :  { %v1724_v12 = vsel %vm667_vm2, %v1721_v25, %v1723_v9  ;;  %2076 = vmatprep.subr.mxu0 %v10714_v37  ;;  %1962 = vmatprep.subr.mxu1 %v10715_v42  ;;  %v1726_v1 = vsel %vm667_vm2, %v1723_v9, %v1725_v48  ;;  %v2034_v25 = vrot.slane %v8135_v0, 3  ;;  %v1922_v9 = vrot.slane %v8135_v0, 2  ;;  %v10724_v42 = vld [vmem:[#allocation45_spill] sm:$0xff] }
 0x3b8   :  { %6652 = vmatmul.mubr.msk.f32.gmra.mxu1 %vm561_vm1, %v1724_v12  ;;  %2077 = vmatpush1.msra.mxu0 %v10716_v43  ;;  %v1924_v37 = vrot.slane %v8150_v7, 2 }
 0x3b9   :  { %6659 = vmatmul.mubr.msk.f32.gmra.mxu0 %vm561_vm1, %v8150_v7  ;;  %1811 = vmatprep.mubr.f32.mxu1 %v10675_v38  ;;  %v2035_v35 = vsel %vm1000_vm3, %v2033_v57, %v2034_v25  ;;  %v1923_v12 = vsel %vm881_vm4, %v1921_v2, %v1922_v9  ;;  %v2037_v43 = vsel %vm1000_vm3, %v2034_v25, %v2036_v4  ;;  %v1926_v57 = vrot.slane %v8143_v21, 2  ;;  %v10729_v2 = vld [vmem:[#allocation50_spill] sm:$0xff] }
 0x3ba   :  { %1914 = vmatprep.mubr.f32.mxu0 %v10675_v38  ;;  %1963 = vmatpush1.msra.mxu1 %v10717_v60  ;;  %v10725_v60 = vld [vmem:[#allocation46_spill] sm:$0xff] }
 0x3bb   :  { %2078 = vmatprep.subr.mxu0 %v10718_v52  ;;  %1964 = vmatprep.subr.mxu1 %v10719_v23  ;;  %v10726_v52 = vld [vmem:[#allocation47_spill] sm:$0xff]  ;;  %v1927_v25 = vsel %vm881_vm4, %v1924_v37, %v1926_v57 }
 0x3bc   :  { %6653 = vmatmul.mubr.msk.f32.gmra.mxu1 %vm561_vm1, %v1726_v1  ;;  %2079 = vmatpush1.msra.mxu0 %v10720_v63  ;;  %v1925_v1 = vsel %vm881_vm4, %v1922_v9, %v1924_v37  ;;  %v10727_v63 = vld [vmem:[#allocation48_spill] sm:$0xff]  ;;  %v10733_v37 = vld [vmem:[#allocation54_spill] sm:$0xff] }
 0x3bd   :  { %6660 = vmatmul.mubr.msk.f32.gmra.mxu0 %vm561_vm1, %v8143_v21  ;;  %1817 = vmatprep.mubr.f32.mxu1 %v10675_v38  ;;  %v10731_v9 = vld [vmem:[#allocation52_spill] sm:$0xff] }
 0x3be   :  { %2112 = vmatprep.mubr.f32.mxu0 %v10675_v38  ;;  %1965 = vmatpush1.msra.mxu1 %v10721_v28  ;;  %v10728_v28 = vld [vmem:[#allocation49_spill] sm:$0xff] }
 0x3bf   :  { %1966 = vmatprep.subr.mxu1 %v10722_v17  ;;  %v2145_v17 = vrot.slane %v8137_v33, 4  ;;  %v10732_v33 = vld [vmem:[#allocation53_spill] sm:$0xff] }
 0x3c0   :  { %6654 = vmatmul.mubr.msk.f32.gmra.mxu1 %vm561_vm1, %v1725_v48  ;;  %v2038_v48 = vrot.slane %v8143_v21, 3 }
 0x3c1   :  { %6669 = vmatmul.mubr.msk.f32.vlgmr.msra.gmra.mxu0 %vm561_vm1, %v2035_v35  ;;  %1967 = vmatpush1.msra.mxu1 %v10723_v5  ;;  %v10730_v35 = vld [vmem:[#allocation51_spill] sm:$0xff] }
 0x3c2   :  { %2000 = vmatprep.mubr.f32.mxu1 %v10675_v38  ;;  %2118 = vmatprep.mubr.f32.mxu0 %v10675_v38  ;;  %v2039_v23 = vsel %vm1000_vm3, %v2036_v4, %v2038_v48  ;;  %v2146_v4 = vrot.slane %v8135_v0, 4 }
 0x3c3   :  { %6673 = vmatprep.subr.msk.mxu1 %vm574_vm0, %v10724_v42  ;;  %v10734_v42 = vld [vmem:[#allocation55_spill] sm:$0xff] }
 0x3c4   :  { %6663 = vmatmul.mubr.msk.f32.vlgmr.msra.gmra.mxu1 %vm561_vm1, %v1923_v12  ;;  %v2147_v5 = vsel %vm574_vm0, %v2145_v17, %v2146_v4  ;;  %v2148_v12 = vrot.slane %v8150_v7, 4  ;;  %v2150_v7 = vrot.slane %v8143_v21, 4  ;;  %v10738_v21 = vld [vmem:[#allocation59_spill] sm:$0xff] }
 0x3c5   :  { %6670 = vmatmul.mubr.msk.f32.gmra.mxu0 %vm561_vm1, %v2037_v43  ;;  %2006 = vmatprep.mubr.f32.mxu1 %v10675_v38  ;;  %v10746_v17 = vld [vmem:[#allocation67_spill] sm:$0xff] }
 0x3c6   :  { %2124 = vmatprep.mubr.f32.mxu0 %v10675_v38  ;;  %6674 = vmatpush1.msk.msra.mxu1 %vm574_vm0, %v10725_v60  ;;  %v2149_v0 = vsel %vm574_vm0, %v2146_v4, %v2148_v12  ;;  %v2151_v43 = vsel %vm574_vm0, %v2148_v12, %v2150_v7  ;;  %v10736_v60 = vld [vmem:[#allocation57_spill] sm:$0xff] }
 0x3c7   :  { %2186 = vmatprep.subr.mxu1 %v10726_v52  ;;  %v10739_v52 = vld [vmem:[#allocation60_spill] sm:$0xff]  ;;  %v10748_v4 = vld [vmem:[#allocation69_spill] sm:$0xff] }
 0x3c8   :  { %6664 = vmatmul.mubr.msk.f32.gmra.mxu1 %vm561_vm1, %v1925_v1  ;;  %v10737_v1 = vld [vmem:[#allocation58_spill] sm:$0xff] }
 0x3c9   :  { %6671 = vmatmul.mubr.msk.f32.gmra.mxu0 %vm561_vm1, %v2039_v23  ;;  %2012 = vmatprep.mubr.f32.mxu1 %v10675_v38  ;;  %v10740_v23 = vld [vmem:[#allocation61_spill] sm:$0xff] }
 0x3ca   :  { %2130 = vmatprep.mubr.f32.mxu0 %v10675_v38  ;;  %2187 = vmatpush1.msra.mxu1 %v10727_v63  ;;  %v10742_v63 = vld [vmem:[#allocation63_spill] sm:$0xff] }
 0x3cb   :  { %2188 = vmatprep.subr.mxu1 %v10728_v28  ;;  %v10744_v28 = vld [vmem:[#allocation65_spill] sm:$0xff] }
 0x3cc   :  { %6665 = vmatmul.mubr.msk.f32.gmra.mxu1 %vm561_vm1, %v1927_v25  ;;  %v10743_v25 = vld [vmem:[#allocation64_spill] sm:$0xff] }
 0x3cd   :  { %6672 = vmatmul.mubr.msk.f32.gmra.mxu0 %vm561_vm1, %v2038_v48  ;;  %2018 = vmatprep.mubr.f32.mxu1 %v10675_v38  ;;  %v10735_v48 = vld [vmem:[#allocation56_spill] sm:$0xff] }
 0x3ce   :  { %2189 = vmatpush1.msra.mxu1 %v10729_v2  ;;  %2343 = vmatprep.mubr.f32.mxu0 %v10675_v38  ;;  %v10745_v2 = vld [vmem:[#allocation66_spill] sm:$0xff] }
 0x3cf   :  { %2190 = vmatprep.subr.mxu1 %v10730_v35  ;;  %v10747_v35 = vld [vmem:[#allocation68_spill] sm:$0xff] }
 0x3d0   :  { %6666 = vmatmul.mubr.msk.f32.gmra.mxu1 %vm561_vm1, %v1926_v57  ;;  %v10741_v57 = vld [vmem:[#allocation62_spill] sm:$0xff] }
 0x3d1   :  { %2191 = vmatpush1.msra.mxu1 %v10731_v9  ;;  %2224 = vmatprep.mubr.f32.mxu1 %v10675_v38  ;;  %v10749_v9 = vld [vmem:[#allocation70_spill] sm:$0xff] }
 0x3d2   :  { %2443 = vmatprep.subr.mxu1 %v10675_v38 }
 0x3d4   :  { %6675 = vmatmul.mubr.msk.f32.vlgmr.msra.gmra.mxu1 %vm561_vm1, %v2147_v5  ;;  %v10750_v5 = vld [vmem:[#allocation71_spill] sm:$0xff] }
 0x3d5   :  { %2230 = vmatprep.mubr.f32.mxu1 %v10675_v38  ;;  %2444 = vmatpush1.msra.mxu1 %v10732_v33 }
 0x3d6   :  { %2445 = vmatprep.subr.mxu1 %v10675_v38 }
 0x3d7   :  { %2446 = vmatpush1.msra.mxu1 %v10733_v37 }
 0x3d8   :  { %6676 = vmatmul.mubr.msk.f32.gmra.mxu1 %vm561_vm1, %v2149_v0  ;;  %2447 = vmatprep.subr.mxu1 %v10675_v38 }
 0x3d9   :  { %2236 = vmatprep.mubr.f32.mxu1 %v10675_v38  ;;  %2448 = vmatpush1.msra.mxu1 %v10734_v42 }
 0x3da   :  { %2449 = vmatprep.subr.mxu1 %v10675_v38 }
 0x3db   :  { %2450 = vmatpush1.msra.mxu1 %v10735_v48 }
 0x3dc   :  { %6677 = vmatmul.mubr.msk.f32.gmra.mxu1 %vm561_vm1, %v2151_v43  ;;  %2451 = vmatprep.subr.mxu1 %v10675_v38 }
 0x3dd   :  { %2242 = vmatprep.mubr.f32.mxu1 %v10675_v38  ;;  %2452 = vmatpush1.msra.mxu1 %v10736_v60 }
 0x3de   :  { %2453 = vmatprep.subr.mxu1 %v10675_v38 }
 0x3df   :  { %2454 = vmatpush1.msra.mxu1 %v10737_v1 }
 0x3e0   :  { %6678 = vmatmul.mubr.msk.f32.gmra.mxu1 %vm561_vm1, %v2150_v7  ;;  %2455 = vmatprep.subr.mxu1 %v10675_v38  ;;  %vm5064_vm1 = vcmask 130048  }
 0x3e1   :  { %2456 = vmatpush1.msra.mxu1 %v10738_v21 }
 0x3e2   :  { %2457 = vmatprep.subr.mxu1 %v10675_v38 }
 0x3e3   :  { %2458 = vmatpush1.msra.mxu1 %v10739_v52 }
 0x3e4   :  { %2459 = vmatprep.subr.mxu1 %v10675_v38 }
 0x3e5   :  { %2460 = vmatpush1.msra.mxu1 %v10740_v23 }
 0x3e6   :  { %2461 = vmatprep.subr.mxu1 %v10675_v38 }
 0x3e7   :  { %2462 = vmatpush1.msra.mxu1 %v10741_v57 }
 0x3e8   :  { %2463 = vmatprep.subr.mxu1 %v10675_v38 }
 0x3e9   :  { %2464 = vmatpush1.msra.mxu1 %v10742_v63 }
 0x3ea   :  { %2465 = vmatprep.subr.mxu1 %v10675_v38 }
 0x3eb   :  { %2466 = vmatpush1.msra.mxu1 %v10743_v25 }
 0x3ec   :  { %2467 = vmatprep.subr.mxu1 %v10675_v38 }
 0x3ed   :  { %2468 = vmatpush1.msra.mxu1 %v10744_v28 }
 0x3ee   :  { %2469 = vmatprep.subr.mxu1 %v10675_v38 }
 0x3ef   :  { %2470 = vmatpush1.msra.mxu1 %v10745_v2 }
 0x3f0   :  { %2471 = vmatprep.subr.mxu1 %v10675_v38 }
 0x3f1   :  { %2472 = vmatpush1.msra.mxu1 %v10746_v17 }
 0x3f2   :  { %2473 = vmatprep.subr.mxu1 %v10675_v38 }
 0x3f3   :  { %2474 = vmatpush1.msra.mxu1 %v10747_v35 }
 0x3f4   :  { %2487 = vmatprep.subr.mxu1 %v10675_v38 }
 0x3f5   :  { %2488 = vmatpush2.msra.mxu1 %v10748_v4 }
 0x3f6   :  { %2489 = vmatprep.subr.mxu1 %v10675_v38 }
 0x3f7   :  { %2490 = vmatpush2.msra.mxu1 %v10749_v9 }
 0x3f8   :  { %2491 = vmatprep.subr.mxu1 %v10675_v38 }
 0x3f9   :  { %2492 = vmatpush2.msra.mxu1 %v10750_v5 }
 0x3fa   :  { %2493 = vmatprep.subr.mxu1 %v10675_v38 }
 0x3fb   :  { %2494 = vmatpush2.msra.mxu1 %v8020_v36 }
 0x3fc   :  { %2495 = vmatprep.subr.mxu1 %v10675_v38 }
 0x3fd   :  { %2496 = vmatpush2.msra.mxu1 %v8030_v22 }
 0x3fe   :  { %2497 = vmatprep.subr.mxu1 %v10675_v38 }
 0x3ff   :  { %2498 = vmatpush2.msra.mxu1 %v8040_v49 }
 0x400   :  { %2499 = vmatprep.subr.mxu1 %v10675_v38 }
 0x401   :  { %2500 = vmatpush2.msra.mxu1 %v8050_v16 }
 0x402   :  { %2501 = vmatprep.subr.mxu1 %v10675_v38 }
 0x403   :  { %2502 = vmatpush2.msra.mxu1 %v8060_v11 }
 0x404   :  { %2503 = vmatprep.subr.mxu1 %v10675_v38 }
 0x405   :  { %2504 = vmatpush2.msra.mxu1 %v8070_v14 }
 0x406   :  { %2505 = vmatprep.subr.mxu1 %v10675_v38 }
 0x407   :  { %2506 = vmatpush2.msra.mxu1 %v8080_v24 }
 0x408   :  { %6934 = vmatprep.subr.mxu1 %v10675_v38 }
 0x471   :  { %v1898_v36 = vpop.f32.mrf.mxu0 }
 0x473   :  { %v1900_v22 = vpop.f32.mrf.mxu0 }
 0x474   :  { %v1801_v49 = vpop.f32.mrf.mxu1 }
 0x475   :  { %v1904_v12 = vpop.f32.mrf.mxu0  ;;  %v1899_v62 = vadd.f32 %v1898_v36, %v1801_v49 }
 0x476   :  { %v1803_v33 = vpop.f32.mrf.mxu1 }
 0x477   :  { %v1906_v16 = vpop.f32.mrf.mxu0  ;;  %v1901_v6 = vadd.f32 %v1900_v22, %v1803_v33  ;;  %v10761_v33 = vld [vmem:[#allocation85_spill] sm:$0xff] }
 0x478   :  { %v1807_v0 = vpop.f32.mrf.mxu1 }
 0x479   :  { %v1910_v37 = vpop.f32.mrf.mxu0  ;;  %v1905_v59 = vadd.f32 %v1904_v12, %v1807_v0 }
 0x47a   :  { %v1809_v7 = vpop.f32.mrf.mxu1 }
 0x47b   :  { %v1912_v11 = vpop.f32.mrf.mxu0  ;;  %v1907_v10 = vadd.f32 %v1906_v16, %v1809_v7 }
 0x47c   :  { %v1813_v42 = vpop.f32.mrf.mxu1 }
 0x47d   :  { %v1916_v43 = vpop.f32.mrf.mxu0  ;;  %v1911_v20 = vadd.f32 %v1910_v37, %v1813_v42 }
 0x47e   :  { %v1815_v48 = vpop.f32.mrf.mxu1 }
 0x47f   :  { %v1918_v14 = vpop.f32.mrf.mxu0  ;;  %v1913_v58 = vadd.f32 %v1912_v11, %v1815_v48 }
 0x480   :  { %v1819_v60 = vpop.f32.mrf.mxu1 }
 0x481   :  { %v2114_v21 = vpop.f32.mrf.mxu0  ;;  %v1917_v55 = vadd.f32 %v1916_v43, %v1819_v60  ;;  %v10763_v60 = vld [vmem:[#allocation87_spill] sm:$0xff] }
 0x482   :  { %v1821_v1 = vpop.f32.mrf.mxu1 }
 0x483   :  { %v2116_v23 = vpop.f32.mrf.mxu0  ;;  %v1919_v50 = vadd.f32 %v1918_v14, %v1821_v1  ;;  %v10762_v14 = vld [vmem:[#allocation86_spill] sm:$0xff]  ;;  %v10764_v1 = vld [vmem:[#allocation88_spill] sm:$0xff] }
 0x484   :  { %v2002_v24 = vpop.f32.mrf.mxu1 }
 0x485   :  { %v2120_v25 = vpop.f32.mrf.mxu0  ;;  %v2025_v43 = vadd.f32 %v2002_v24, %v1899_v62  ;;  %v10766_v24 = vld [vmem:[#allocation90_spill] sm:$0xff] }
 0x486   :  { %v2004_v52 = vpop.f32.mrf.mxu1 }
 0x487   :  { %v2122_v17 = vpop.f32.mrf.mxu0  ;;  %v2026_v29 = vadd.f32 %v2004_v52, %v1901_v6  ;;  %v2137_v36 = vadd.f32 %v2114_v21, %v2025_v43  ;;  %v10765_v21 = vld [vmem:[#allocation89_spill] sm:$0xff]  ;;  %v10767_v52 = vld [vmem:[#allocation91_spill] sm:$0xff] }
 0x488   :  { %v2008_v57 = vpop.f32.mrf.mxu1  ;;  %v10773_v43 = vld [vmem:[#allocation35_spill] sm:$0xff] }
 0x489   :  { %v2126_v9 = vpop.f32.mrf.mxu0  ;;  %v2027_v19 = vadd.f32 %v2008_v57, %v1905_v59  ;;  %v2138_v22 = vadd.f32 %v2116_v23, %v2026_v29  ;;  %v10768_v23 = vld [vmem:[#allocation92_spill] sm:$0xff]  ;;  %v10769_v57 = vld [vmem:[#allocation93_spill] sm:$0xff] }
 0x48a   :  { %v2010_v63 = vpop.f32.mrf.mxu1 }
 0x48b   :  { %v2128_v45 = vpop.f32.mrf.mxu0  ;;  %v2028_v53 = vadd.f32 %v2010_v63, %v1907_v10  ;;  %v10770_v63 = vld [vmem:[#allocation94_spill] sm:$0xff] }
 0x48c   :  { %v2014_v28 = vpop.f32.mrf.mxu1 }
 0x48d   :  { %v2029_v13 = vadd.f32 %v2014_v28, %v1911_v20  ;;  %v2132_v15 = vpop.f32.mrf.mxu0  ;;  %v2140_v7 = vadd.f32 %v2122_v17, %v2028_v53  ;;  %v2139_v20 = vadd.f32 %v2120_v25, %v2027_v19  ;;  %v10771_v25 = vld [vmem:[#allocation95_spill] sm:$0xff]  ;;  %v10772_v28 = vld [vmem:[#allocation96_spill] sm:$0xff] }
 0x48e   :  { %v2016_v2 = vpop.f32.mrf.mxu1 }
 0x48f   :  { %v2030_v31 = vadd.f32 %v2016_v2, %v1913_v58  ;;  %v2134_v37 = vpop.f32.mrf.mxu0  ;;  %v2141_v42 = vadd.f32 %v2126_v9, %v2029_v13 }
 0x490   :  { %v2020_v35 = vpop.f32.mrf.mxu1 }
 0x491   :  { %v2031_v30 = vadd.f32 %v2020_v35, %v1917_v55  ;;  %v2142_v47 = vadd.f32 %v2128_v45, %v2030_v31 }
 0x492   :  { %v2022_v4 = vpop.f32.mrf.mxu1 }
 0x493   :  { %v2032_v3 = vadd.f32 %v2022_v4, %v1919_v50  ;;  %v2143_v11 = vadd.f32 %v2132_v15, %v2031_v30 }
 0x494   :  { %v2226_v5 = vpop.f32.mrf.mxu1 }
 0x495   :  { %v2144_v12 = vadd.f32 %v2134_v37, %v2032_v3  ;;  %v2249_v13 = vadd.f32 %v2226_v5, %v2137_v36  ;;  %v1604_v37 = vsel %vm1603_vm8, %v10773_v43, 0.0  ;;  %v8393_v36 = vld [vmem:[%s7373_s8 + $0x48] sm:$0xff] }
 0x496   :  { %v2228_v46 = vpop.f32.mrf.mxu1 }
 0x497   :  { %v2250_v31 = vadd.f32 %v2228_v46, %v2138_v22  ;;  %v2257_v30 = vadd.f32 %v2249_v13, %v7883_v8  ;;  %v8421_v13 = vld [vmem:[%s7373_s8 + $0x28] sm:$0xff] }
 0x498   :  { %v2232_v18 = vpop.f32.mrf.mxu1 }
 0x499   :  { %v2251_v59 = vadd.f32 %v2232_v18, %v2139_v20  ;;  %v2258_v53 = vadd.f32 %v2250_v31, %v7886_v61  ;;  %v2265_v49 = vmax.f32 %v2257_v30, 0.0  ;;  %v8379_v20 = vld [vmem:[%s7373_s8 + $0x58] sm:$0xff] }
 0x49a   :  { %v2234_v51 = vpop.f32.mrf.mxu1  ;;  %v8407_v31 = vld [vmem:[%s7373_s8 + $0x38] sm:$0xff] }
 0x49b   :  { %v2252_v10 = vadd.f32 %v2234_v51, %v2140_v7  ;;  %v2259_v3 = vadd.f32 %v2251_v59, %v7883_v8  ;;  %v2266_v45 = vmax.f32 %v2258_v53, 0.0  ;;  %v8372_v7 = vld [vmem:[%s7373_s8 + $0x60] sm:$0xff] }
 0x49c   :  { %v2238_v32 = vpop.f32.mrf.mxu1  ;;  %v8400_v59 = vld [vmem:[%s7373_s8 + $0x40] sm:$0xff] }
 0x49d   :  { %v2253_v0 = vadd.f32 %v2238_v32, %v2141_v42  ;;  %v2267_v46 = vmax.f32 %v2259_v3, 0.0  ;;  %v8442_v3 = vld [vmem:[%s7373_s8 + $0x10] sm:$0xff] }
 0x49e   :  { %v2240_v54 = vpop.f32.mrf.mxu1 }
 0x49f   :  { %v2254_v58 = vadd.f32 %v2240_v54, %v2142_v47  ;;  %v2261_v47 = vadd.f32 %v2253_v0, %v7883_v8  ;;  %v2260_v54 = vadd.f32 %v2252_v10, %v7886_v61  ;;  %v8388_v10 = vld [vmem:[%s7373_s8 + $0x50] sm:$0xff] }
 0x4a0   :  { %v2244_v16 = vpop.f32.mrf.mxu1 }
 0x4a1   :  { %v2255_v55 = vadd.f32 %v2244_v16, %v2143_v11  ;;  %v2262_v62 = vadd.f32 %v2254_v58, %v7886_v61  ;;  %v2269_v51 = vmax.f32 %v2261_v47, 0.0  ;;  %v2268_v18 = vmax.f32 %v2260_v54, 0.0  ;;  %v10774_v58 = vld [vmem:[#allocation25_spill] sm:$0xff] }
 0x4a2   :  { %v2246_v48 = vpop.f32.mrf.mxu1  ;;  %v8428_v47 = vld [vmem:[%s7373_s8 + $0x20] sm:$0xff]  ;;  %v1612_v30 = vmul.f32 %v10774_v58, %v10774_v58 }
 0x4a3   :  { %v2256_v50 = vadd.f32 %v2246_v48, %v2144_v12  ;;  %v2263_v6 = vadd.f32 %v2255_v55, %v7883_v8  ;;  %v2270_v32 = vmax.f32 %v2262_v62, 0.0  ;;  %v10751_v8 = vld [vmem:[#allocation75_spill] sm:$0xff]  ;;  %v1602_v55 = vsel %vm1601_vm9, %v10774_v58, 0.0 }
 0x4a4   :  { %v1605_v0 = vadd.f32 %v1604_v37, %v1602_v55  ;;  %v8414_v62 = vld [vmem:[%s7373_s8 + $0x30] sm:$0xff] }
 0x4a5   :  { %v2264_v15 = vadd.f32 %v2256_v50, %v7886_v61  ;;  %v2271_v29 = vmax.f32 %v2263_v6, 0.0  ;;  %v10752_v61 = vld [vmem:[#allocation76_spill] sm:$0xff] }
 0x4a6   :  { %v1606_v50 = vrot.slane %v1605_v0, 4 }
 0x4a7   :  { %v2272_v19 = vmax.f32 %v2264_v15, 0.0 }
 0x4a8   :  { %v1607_v6 = vadd.f32 %v1606_v50, %v1605_v0  ;;  %v213_v50 = vld [vmem:[%s7388_s24] sm:$0xff]  ;;  %s11049_s24 = sld [smem:[#allocation16_spill]] }
 0x4a9   :  { %6679 = vmatprep.subr.msk.mxu0 %vm1271_vm5, %v2272_v19 }
 0x4aa   :  { %6680 = vmatpush1.msk.msra.mxu0 %vm1271_vm5, %v2271_v29  ;;  %v1608_v15 = vrot.slane %v1607_v6, 2 }
 0x4ab   :  { %2305 = vmatprep.subr.mxu0 %v2270_v32 }
 0x4ac   :  { %2306 = vmatpush1.msra.mxu0 %v2269_v51  ;;  %v1609_v54 = vadd.f32 %v1608_v15, %v1607_v6 }
 0x4ad   :  { %2307 = vmatprep.subr.mxu0 %v2268_v18 }
 0x4ae   :  { %2308 = vmatpush1.msra.mxu0 %v2267_v46  ;;  %v1610_v53 = vrot.slane %v1609_v54, 1 }
 0x4af   :  { %2309 = vmatprep.subr.mxu0 %v2266_v45 }
 0x4b0   :  { %2310 = vmatpush1.msra.mxu0 %v2265_v49 }
 0x4b1   :  { %6681 = vmatmul.mubr.msk.f32.vlgmr.msra.gmra.mxu0 %vm1264_vm6, %v7899_v34  ;;  %6683 = vmatprep.subr.msk.mxu0 %vm1271_vm5, %v2272_v19  ;;  %v10753_v34 = vld [vmem:[#allocation77_spill] sm:$0xff]  ;;  %v8435_v19 = vld [vmem:[%s7373_s8 + $0x18] sm:$0xff] }
 0x4b2   :  { %6684 = vmatpush1.msk.msra.mxu0 %vm1271_vm5, %v2271_v29  ;;  %2349 = vmatprep.mubr.f32.mxu0 %v10675_v38  ;;  %v1613_v29 = vmul.f32 %v10773_v43, %v10773_v43 }
 0x4b3   :  { %2382 = vmatprep.subr.mxu0 %v2270_v32  ;;  %v8451_v32 = vld [vmem:[%s7373_s8 + $0x8] sm:$0xff] }
 0x4b4   :  { %2383 = vmatpush1.msra.mxu0 %v2269_v51  ;;  %v8460_v51 = vld [vmem:[%s7373_s8] sm:$0xff]  ;;  %s10990_s8 = sld [smem:[#allocation12_spill]] }
 0x4b5   :  { %6682 = vmatmul.mubr.msk.f32.gmra.mxu0 %vm1264_vm6, %v7907_v39  ;;  %2384 = vmatprep.subr.mxu0 %v2268_v18  ;;  %v10754_v39 = vld [vmem:[#allocation78_spill] sm:$0xff]  ;;  %v1615_v18 = vsel %vm1603_vm8, %v1613_v29, 0.0  ;;  %v2911_v29 = vld [vmem:[%s7378_s14] sm:$0x1]  ;;  %s11041_s14 = sld [smem:[#allocation18_spill]] }
 0x4b6   :  { %2385 = vmatpush1.msra.mxu0 %v2267_v46  ;;  %2420 = vmatprep.mubr.f32.mxu0 %v10675_v38  ;;  %v1611_v46 = vadd.f32 %v1610_v53, %v1609_v54 }
 0x4b7   :  { %2386 = vmatprep.subr.mxu0 %v2266_v45  ;;  %v1614_v45 = vsel %vm1601_vm9, %v1612_v30, 0.0  ;;  %v2915_v30 = vld [vmem:[%s7383_s19] sm:$0x1]  ;;  %s11045_s19 = sld [smem:[#allocation15_spill]] }
 0x4b8   :  { %2387 = vmatpush1.msra.mxu0 %v2265_v49  ;;  %v1616_v49 = vadd.f32 %v1615_v18, %v1614_v45  ;;  %v8563_v45 = vld [vmem:[%s7398_s6 + $0xc8] sm:$0xff] }
 0x4b9   :  { %6685 = vmatmul.mubr.msk.f32.vlgmr.msra.gmra.mxu0 %vm1264_vm6, %v7913_v40  ;;  %2518 = vmatprep.subr.mxu0 %v10675_v38  ;;  %v10755_v40 = vld [vmem:[#allocation79_spill] sm:$0xff] }
 0x4ba   :  { %2426 = vmatprep.mubr.f32.mxu0 %v10675_v38  ;;  %2519 = vmatpush1.msra.mxu0 %v7916_v41  ;;  %v10756_v41 = vld [vmem:[#allocation80_spill] sm:$0xff] }
 0x4bb   :  { %2520 = vmatprep.subr.mxu0 %v10675_v38 }
 0x4bc   :  { %2521 = vmatpush1.msra.mxu0 %v7922_v27  ;;  %v10757_v27 = vld [vmem:[#allocation81_spill] sm:$0xff] }
 0x4bd   :  { %6686 = vmatmul.mubr.msk.f32.gmra.mxu0 %vm1264_vm6, %v7926_v26  ;;  %2522 = vmatprep.subr.mxu0 %v10675_v38  ;;  %v10758_v26 = vld [vmem:[#allocation82_spill] sm:$0xff]  ;;  %vm6125_vm6 = vcmask 588800  }
 0x4be   :  { %2523 = vmatpush1.msra.mxu0 %v7931_v44  ;;  %v10759_v44 = vld [vmem:[#allocation83_spill] sm:$0xff] }
 0x4bf   :  { %2524 = vmatprep.subr.mxu0 %v10675_v38 }
 0x4c0   :  { %2525 = vmatpush1.msra.mxu0 %v7938_v56  ;;  %v10760_v56 = vld [vmem:[#allocation84_spill] sm:$0xff] }
 0x4c1   :  { %2526 = vmatprep.subr.mxu0 %v10675_v38 }
 0x4c2   :  { %2527 = vmatpush1.msra.mxu0 %v10751_v8  ;;  %v1617_v8 = vrot.slane %v1616_v49, 4 }
 0x4c3   :  { %2528 = vmatprep.subr.mxu0 %v10675_v38 }
 0x4c4   :  { %2529 = vmatpush1.msra.mxu0 %v10752_v61  ;;  %v1618_v61 = vadd.f32 %v1617_v8, %v1616_v49  ;;  %v343_v49 = vld [vmem:[%s7398_s6 + $0xc0] sm:$0xff]  ;;  %v342_v8 = vld [vmem:[%s7398_s6 + $0xb8] sm:$0xff] }
 0x4c5   :  { %2530 = vmatprep.subr.mxu0 %v10675_v38 }
 0x4c6   :  { %2531 = vmatpush1.msra.mxu0 %v10753_v34  ;;  %v1619_v34 = vrot.slane %v1618_v61, 2 }
 0x4c7   :  { %2532 = vmatprep.subr.mxu0 %v10675_v38 }
 0x4c8   :  { %2533 = vmatpush1.msra.mxu0 %v10754_v39  ;;  %v1620_v39 = vadd.f32 %v1619_v34, %v1618_v61  ;;  %v341_v61 = vld [vmem:[%s7398_s6 + $0xb0] sm:$0xff]  ;;  %v340_v34 = vld [vmem:[%s7398_s6 + $0xa8] sm:$0xff] }
 0x4c9   :  { %2534 = vmatprep.subr.mxu0 %v10675_v38 }
 0x4ca   :  { %2535 = vmatpush1.msra.mxu0 %v10755_v40  ;;  %v1621_v40 = vrot.slane %v1620_v39, 1 }
 0x4cb   :  { %2536 = vmatprep.subr.mxu0 %v10675_v38 }
 0x4cc   :  { %2537 = vmatpush1.msra.mxu0 %v10756_v41  ;;  %v1622_v41 = vadd.f32 %v1621_v40, %v1620_v39  ;;  %v339_v39 = vld [vmem:[%s7398_s6 + $0xa0] sm:$0xff]  ;;  %v338_v40 = vld [vmem:[%s7398_s6 + $0x98] sm:$0xff] }
 0x4cd   :  { %2538 = vmatprep.subr.mxu0 %v10675_v38 }
 0x4ce   :  { %2539 = vmatpush1.msra.mxu0 %v10757_v27 }
 0x4cf   :  { %2540 = vmatprep.subr.mxu0 %v10675_v38 }
 0x4d0   :  { %2541 = vmatpush1.msra.mxu0 %v10758_v26 }
 0x4d1   :  { %2542 = vmatprep.subr.mxu0 %v10675_v38 }
 0x4d2   :  { %2543 = vmatpush1.msra.mxu0 %v10759_v44 }
 0x4d3   :  { %2544 = vmatprep.subr.mxu0 %v10675_v38 }
 0x4d4   :  { %2545 = vmatpush1.msra.mxu0 %v10760_v56 }
 0x4d5   :  { %2546 = vmatprep.subr.mxu0 %v10675_v38 }
 0x4d6   :  { %2547 = vmatpush1.msra.mxu0 %v10761_v33 }
 0x4d7   :  { %2548 = vmatprep.subr.mxu0 %v10675_v38 }
 0x4d8   :  { %2549 = vmatpush1.msra.mxu0 %v10762_v14 }
 0x4d9   :  { %2562 = vmatprep.subr.mxu0 %v10675_v38 }
 0x4da   :  { %2563 = vmatpush2.msra.mxu0 %v10763_v60 }
 0x4db   :  { %2564 = vmatprep.subr.mxu0 %v10675_v38 }
 0x4dc   :  { %2565 = vmatpush2.msra.mxu0 %v10764_v1 }
 0x4dd   :  { %2566 = vmatprep.subr.mxu0 %v10675_v38 }
 0x4de   :  { %2567 = vmatpush2.msra.mxu0 %v10765_v21 }
 0x4df   :  { %2568 = vmatprep.subr.mxu0 %v10675_v38 }
 0x4e0   :  { %2569 = vmatpush2.msra.mxu0 %v10766_v24 }
 0x4e1   :  { %2570 = vmatprep.subr.mxu0 %v10675_v38 }
 0x4e2   :  { %2571 = vmatpush2.msra.mxu0 %v10767_v52 }
 0x4e3   :  { %2572 = vmatprep.subr.mxu0 %v10675_v38 }
 0x4e4   :  { %2573 = vmatpush2.msra.mxu0 %v10768_v23 }
 0x4e5   :  { %2574 = vmatprep.subr.mxu0 %v10675_v38 }
 0x4e6   :  { %2575 = vmatpush2.msra.mxu0 %v10769_v57 }
 0x4e7   :  { %2576 = vmatprep.subr.mxu0 %v10675_v38 }
 0x4e8   :  { %2577 = vmatpush2.msra.mxu0 %v10770_v63 }
 0x4e9   :  { %2578 = vmatprep.subr.mxu0 %v10675_v38 }
 0x4ea   :  { %2579 = vmatpush2.msra.mxu0 %v10771_v25 }
 0x4eb   :  { %2580 = vmatprep.subr.mxu0 %v10675_v38 }
 0x4ec   :  { %2581 = vmatpush2.msra.mxu0 %v10772_v28 }
 0x4ed   :  { %6963 = vmatprep.subr.mxu0 %v10675_v38 }
 0x571   :  { %v2345_v2 = vpop.f32.mrf.mxu0 }
 0x573   :  { %v2347_v17 = vpop.f32.mrf.mxu0 }
 0x575   :  { %v2351_v35 = vpop.f32.mrf.mxu0 }
 0x577   :  { %v2353_v4 = vpop.f32.mrf.mxu0 }
 0x579   :  { %v2422_v9 = vpop.f32.mrf.mxu0 }
 0x57a   :  { %v2433_v42 = vmax.f32 %v2345_v2, %v2422_v9 }
 0x57b   :  { %v2424_v5 = vpop.f32.mrf.mxu0 }
 0x57c   :  { %v2434_v11 = vmax.f32 %v2347_v17, %v2424_v5 }
 0x57d   :  { %v2428_v16 = vpop.f32.mrf.mxu0 }
 0x57e   :  { %6687 = vmatprep.mubr.msk.f32.mxu1 %vm1442_vm7, %v2434_v11  ;;  %6689 = vmatprep.mubr.msk.f32.mxu0 %vm1442_vm7, %v2434_v11  ;;  %v2435_v22 = vmax.f32 %v2351_v35, %v2428_v16 }
 0x57f   :  { %v2430_v12 = vpop.f32.mrf.mxu0  ;;  %2508 = vmatmul.mubr.f32.vlgmr.msra.gmra.mxu1 %v2433_v42  ;;  %2583 = vmatmul.mubr.f32.vlgmr.msra.gmra.mxu0 %v2433_v42 }
 0x580   :  { %v2436_v48 = vmax.f32 %v2353_v4, %v2430_v12  ;;  %6964 = vmatpush3.msra.mxu0 %v8372_v7  ;;  %6935 = vmatpush3.msra.mxu1 %v8372_v7 }
 0x581   :  { %6965 = vmatprep.subr.mxu0 %v10675_v38  ;;  %6936 = vmatprep.subr.mxu1 %v10675_v38 }
 0x582   :  { %6966 = vmatpush3.msra.mxu0 %v8379_v20  ;;  %6688 = vmatprep.mubr.msk.f32.mxu1 %vm1442_vm7, %v2436_v48 }
 0x583   :  { %6690 = vmatprep.mubr.msk.f32.mxu0 %vm1442_vm7, %v2436_v48  ;;  %6967 = vmatprep.subr.mxu0 %v10675_v38 }
 0x584   :  { %2513 = vmatmul.mubr.f32.gmra.mxu1 %v2435_v22  ;;  %2588 = vmatmul.mubr.f32.gmra.mxu0 %v2435_v22 }
 0x585   :  { %6968 = vmatpush3.msra.mxu0 %v8388_v10  ;;  %6989 = vmatprep.mubr.msk.f32.mxu0 %vm7323_vm10, %v10675_v38 }
 0x586   :  { %6969 = vmatprep.subr.mxu0 %v10675_v38  ;;  %6937 = vmatpush3.msra.mxu1 %v8379_v20 }
 0x587   :  { %6970 = vmatpush3.msra.mxu0 %v8393_v36  ;;  %6938 = vmatprep.subr.mxu1 %v10675_v38 }
 0x588   :  { %6971 = vmatprep.subr.mxu0 %v10675_v38  ;;  %6939 = vmatpush3.msra.mxu1 %v8388_v10 }
 0x589   :  { %6972 = vmatpush3.msra.mxu0 %v8400_v59  ;;  %6940 = vmatprep.subr.mxu1 %v10675_v38 }
 0x58a   :  { %6973 = vmatprep.subr.mxu0 %v10675_v38  ;;  %6941 = vmatpush3.msra.mxu1 %v8393_v36 }
 0x58b   :  { %6974 = vmatpush3.msra.mxu0 %v8407_v31  ;;  %6942 = vmatprep.subr.mxu1 %v10675_v38 }
 0x58c   :  { %6975 = vmatprep.subr.mxu0 %v10675_v38  ;;  %6943 = vmatpush3.msra.mxu1 %v8400_v59 }
 0x58d   :  { %6976 = vmatpush3.msra.mxu0 %v8414_v62  ;;  %6944 = vmatprep.subr.mxu1 %v10675_v38 }
 0x58e   :  { %6977 = vmatprep.subr.mxu0 %v10675_v38  ;;  %6945 = vmatpush3.msra.mxu1 %v8407_v31 }
 0x58f   :  { %6978 = vmatpush3.msra.mxu0 %v8421_v13  ;;  %6946 = vmatprep.subr.mxu1 %v10675_v38 }
 0x590   :  { %6979 = vmatprep.subr.mxu0 %v10675_v38  ;;  %6947 = vmatpush3.msra.mxu1 %v8414_v62 }
 0x591   :  { %6980 = vmatpush3.msra.mxu0 %v8428_v47  ;;  %6948 = vmatprep.subr.mxu1 %v10675_v38 }
 0x592   :  { %6981 = vmatprep.subr.mxu0 %v10675_v38  ;;  %6949 = vmatpush3.msra.mxu1 %v8421_v13 }
 0x593   :  { %6982 = vmatpush3.msra.mxu0 %v8435_v19  ;;  %6950 = vmatprep.subr.mxu1 %v10675_v38 }
 0x594   :  { %6983 = vmatprep.subr.mxu0 %v10675_v38  ;;  %6951 = vmatpush3.msra.mxu1 %v8428_v47 }
 0x595   :  { %6984 = vmatpush3.msra.mxu0 %v8442_v3  ;;  %6952 = vmatprep.subr.mxu1 %v10675_v38 }
 0x596   :  { %6985 = vmatprep.subr.mxu0 %v10675_v38  ;;  %6953 = vmatpush3.msra.mxu1 %v8435_v19 }
 0x597   :  { %6986 = vmatpush3.msra.mxu0 %v8451_v32  ;;  %6954 = vmatprep.subr.mxu1 %v10675_v38 }
 0x598   :  { %6987 = vmatprep.subr.mxu0 %v10675_v38  ;;  %6955 = vmatpush3.msra.mxu1 %v8442_v3 }
 0x599   :  { %6988 = vmatpush3.msra.mxu0 %v8460_v51  ;;  %6956 = vmatprep.subr.mxu1 %v10675_v38 }
 0x59a   :  { %6990 = vmatmul.mubr.msk.f32.vlgmr.msra.gmra.mxu0 %vm1601_vm9, %v1611_v46  ;;  %7021 = vmatprep.subr.mxu0 %v10675_v38  ;;  %v214_v46 = vld [vmem:[%s7393_s30] sm:$0xff] }
 0x59b   :  { %7022 = vmatpush3.msra.mxu0 %v8372_v7  ;;  %7047 = vmatprep.mubr.msk.f32.mxu0 %vm7323_vm10, %v10675_v38 }
 0x59c   :  { %7023 = vmatprep.subr.mxu0 %v10675_v38  ;;  %6957 = vmatpush3.msra.mxu1 %v8451_v32 }
 0x59d   :  { %7024 = vmatpush3.msra.mxu0 %v8379_v20  ;;  %6958 = vmatprep.subr.mxu1 %v10675_v38 }
 0x59e   :  { %7025 = vmatprep.subr.mxu0 %v10675_v38  ;;  %6959 = vmatpush3.msra.mxu1 %v8460_v51 }
 0x59f   :  { %7026 = vmatpush3.msra.mxu0 %v8388_v10  ;;  %6960 = vmatprep.mubr.msk.f32.mxu1 %vm7323_vm10, %v10675_v38 }
 0x5a0   :  { %7027 = vmatprep.subr.mxu0 %v10675_v38  ;;  %6992 = vmatprep.subr.mxu1 %v10675_v38 }
 0x5a1   :  { %7028 = vmatpush3.msra.mxu0 %v8393_v36 }
 0x5a2   :  { %7029 = vmatprep.subr.mxu0 %v10675_v38 }
 0x5a3   :  { %7030 = vmatpush3.msra.mxu0 %v8400_v59 }
 0x5a4   :  { %7031 = vmatprep.subr.mxu0 %v10675_v38 }
 0x5a5   :  { %7032 = vmatpush3.msra.mxu0 %v8407_v31 }
 0x5a6   :  { %7033 = vmatprep.subr.mxu0 %v10675_v38 }
 0x5a7   :  { %7034 = vmatpush3.msra.mxu0 %v8414_v62 }
 0x5a8   :  { %7035 = vmatprep.subr.mxu0 %v10675_v38 }
 0x5a9   :  { %7036 = vmatpush3.msra.mxu0 %v8421_v13 }
 0x5aa   :  { %7037 = vmatprep.subr.mxu0 %v10675_v38 }
 0x5ab   :  { %7038 = vmatpush3.msra.mxu0 %v8428_v47 }
 0x5ac   :  { %7039 = vmatprep.subr.mxu0 %v10675_v38 }
 0x5ad   :  { %7040 = vmatpush3.msra.mxu0 %v8435_v19 }
 0x5ae   :  { %7041 = vmatprep.subr.mxu0 %v10675_v38 }
 0x5af   :  { %7042 = vmatpush3.msra.mxu0 %v8442_v3 }
 0x5b0   :  { %7043 = vmatprep.subr.mxu0 %v10675_v38 }
 0x5b1   :  { %7044 = vmatpush3.msra.mxu0 %v8451_v32 }
 0x5b2   :  { %7045 = vmatprep.subr.mxu0 %v10675_v38 }
 0x5b3   :  { %7046 = vmatpush3.msra.mxu0 %v8460_v51 }
 0x5b4   :  { %7048 = vmatmul.mubr.msk.f32.vlgmr.msra.gmra.mxu0 %vm1601_vm9, %v1622_v41  ;;  %3258 = vmatprep.subr.mxu0 %v8563_v45  ;;  %v337_v41 = vld [vmem:[%s7398_s6 + $0x90] sm:$0xff] }
 0x5b5   :  { %3316 = vmatprep.mubr.f32.mxu0 %v10675_v38  ;;  %3259 = vmatpush1.msra.mxu0 %v343_v49  ;;  %v8700_v49 = vld [vmem:[%s7398_s6 + $0xe8] sm:$0xff] }
 0x5b6   :  { %3260 = vmatprep.subr.mxu0 %v342_v8  ;;  %v8703_v8 = vld [vmem:[%s7398_s6] sm:$0xff] }
 0x5b7   :  { %3261 = vmatpush1.msra.mxu0 %v341_v61  ;;  %v8708_v61 = vld [vmem:[%s7398_s6 + $0xe0] sm:$0xff] }
 0x5b8   :  { %3262 = vmatprep.subr.mxu0 %v340_v34  ;;  %10776 = vst [vmem:[#allocation23_spill] sm:$0xff] %v8708_v61  ;;  %v8711_v34 = vld [vmem:[%s7398_s6 + $0x338] sm:$0xff] }
 0x5b9   :  { %3263 = vmatpush1.msra.mxu0 %v339_v39  ;;  %10777 = vst [vmem:[#allocation27_spill] sm:$0xff] %v8711_v34  ;;  %v8716_v39 = vld [vmem:[%s7398_s6 + $0xd8] sm:$0xff] }
 0x5ba   :  { %3264 = vmatprep.subr.mxu0 %v338_v40  ;;  %10778 = vst [vmem:[#allocation36_spill] sm:$0xff] %v8716_v39  ;;  %v8720_v40 = vld [vmem:[%s7398_s6 + $0xd0] sm:$0xff] }
 0x5bb   :  { %3265 = vmatpush1.msra.mxu0 %v337_v41  ;;  %10779 = vst [vmem:[#allocation29_spill] sm:$0xff] %v8720_v40  ;;  %v8724_v41 = vld [vmem:[%s7398_s6 + $0x268] sm:$0xff] }
 0x5bc   :  { %10780 = vst [vmem:[#allocation31_spill] sm:$0xff] %v8724_v41 }
 0x63f   :  { %v2509_v27 = vpop.f32.mrf.mxu1  ;;  %v2584_v26 = vpop.f32.mrf.mxu0 }
 0x640   :  { %v8508_v33 = vmax.f32 %v2509_v27, %v2584_v26  ;;  %v336_v27 = vld [vmem:[%s7398_s6 + $0x88] sm:$0xff]  ;;  %v335_v26 = vld [vmem:[%s7398_s6 + $0x80] sm:$0xff] }
 0x641   :  { %v2511_v44 = vpop.f32.mrf.mxu1  ;;  %v2586_v56 = vpop.f32.mrf.mxu0  ;;  %3266 = vmatprep.subr.mxu0 %v336_v27 }
 0x642   :  { %v2595_v52 = vsel %vm1601_vm9, %v8508_v33, 0.0  ;;  %v2604_v35 = vmul.f32 %v8508_v33, %v8508_v33  ;;  %v334_v44 = vld [vmem:[%s7398_s6 + $0x78] sm:$0xff]  ;;  %v333_v56 = vld [vmem:[%s7398_s6 + $0x70] sm:$0xff]  ;;  %3267 = vmatpush1.msra.mxu0 %v335_v26 }
 0x643   :  { %3268 = vmatprep.subr.mxu0 %v334_v44  ;;  %v8730_v26 = vld [vmem:[%s7398_s6 + $0x330] sm:$0xff] }
 0x644   :  { %v2514_v14 = vpop.f32.mrf.mxu1  ;;  %v2589_v60 = vpop.f32.mrf.mxu0  ;;  %v2606_v11 = vsel %vm1601_vm9, %v2604_v35, 0.0  ;;  %3269 = vmatpush1.msra.mxu0 %v333_v56  ;;  %10781 = vst [vmem:[#allocation21_spill] sm:$0xff] %v8730_v26  ;;  %v8735_v56 = vld [vmem:[%s7398_s6 + $0x328] sm:$0xff] }
 0x645   :  { %v8510_v1 = vmax.f32 %v2514_v14, %v2589_v60  ;;  %v332_v14 = vld [vmem:[%s7398_s6 + $0x68] sm:$0xff]  ;;  %v331_v60 = vld [vmem:[%s7398_s6 + $0x60] sm:$0xff]  ;;  %10782 = vst [vmem:[#allocation33_spill] sm:$0xff] %v8735_v56 }
 0x646   :  { %v2516_v21 = vpop.f32.mrf.mxu1  ;;  %v2591_v24 = vpop.f32.mrf.mxu0  ;;  %3270 = vmatprep.subr.mxu0 %v332_v14 }
 0x647   :  { %v2596_v23 = vsel %vm1603_vm8, %v8510_v1, 0.0  ;;  %v2605_v2 = vmul.f32 %v8510_v1, %v8510_v1  ;;  %v330_v21 = vld [vmem:[%s7398_s6 + $0x58] sm:$0xff]  ;;  %v329_v24 = vld [vmem:[%s7398_s6 + $0x50] sm:$0xff]  ;;  %3271 = vmatpush1.msra.mxu0 %v331_v60 }
 0x648   :  { %v2597_v57 = vadd.f32 %v2596_v23, %v2595_v52  ;;  %v328_v52 = vld [vmem:[%s7398_s6 + $0x48] sm:$0xff]  ;;  %3272 = vmatprep.subr.mxu0 %v330_v21  ;;  %v327_v23 = vld [vmem:[%s7398_s6 + $0x40] sm:$0xff] }
 0x649   :  { %v2607_v9 = vsel %vm1603_vm8, %v2605_v2, 0.0  ;;  %3273 = vmatpush1.msra.mxu0 %v329_v24  ;;  %v322_v2 = vld [vmem:[%s7398_s6 + $0x18] sm:$0xff]  ;;  %v8742_v21 = vld [vmem:[%s7398_s6 + $0x320] sm:$0xff]  ;;  %vm6328_vm8 = vcmask 74752  }
 0x64a   :  { %v2598_v63 = vrot.slane %v2597_v57, 4  ;;  %v2608_v37 = vadd.f32 %v2607_v9, %v2606_v11  ;;  %3274 = vmatprep.subr.mxu0 %v328_v52  ;;  %10783 = vst [vmem:[#allocation37_spill] sm:$0xff] %v8742_v21  ;;  %v8747_v24 = vld [vmem:[%s7398_s6 + $0x260] sm:$0xff]  ;;  %v8750_v52 = vld [vmem:[%s7398_s6 + $0x318] sm:$0xff] }
 0x64b   :  { %3275 = vmatpush1.msra.mxu0 %v327_v23  ;;  %10784 = vst [vmem:[#allocation22_spill] sm:$0xff] %v8747_v24  ;;  %10785 = vst [vmem:[#allocation24_spill] sm:$0xff] %v8750_v52 }
 0x64c   :  { %v2599_v25 = vadd.f32 %v2598_v63, %v2597_v57  ;;  %v2609_v42 = vrot.slane %v2608_v37, 4  ;;  %v326_v57 = vld [vmem:[%s7398_s6 + $0x38] sm:$0xff]  ;;  %v325_v63 = vld [vmem:[%s7398_s6 + $0x30] sm:$0xff] }
 0x64d   :  { %3276 = vmatprep.subr.mxu0 %v326_v57  ;;  %v8755_v57 = vld [vmem:[%s7398_s6 + $0x258] sm:$0xff] }
 0x64e   :  { %v2600_v28 = vrot.slane %v2599_v25, 2  ;;  %v2610_v12 = vadd.f32 %v2609_v42, %v2608_v37  ;;  %3277 = vmatpush1.msra.mxu0 %v325_v63  ;;  %10786 = vst [vmem:[#allocation26_spill] sm:$0xff] %v8755_v57  ;;  %v8760_v63 = vld [vmem:[%s7398_s6 + $0x310] sm:$0xff] }
 0x64f   :  { %10787 = vst [vmem:[#allocation38_spill] sm:$0xff] %v8760_v63 }
 0x650   :  { %v2601_v17 = vadd.f32 %v2600_v28, %v2599_v25  ;;  %v324_v25 = vld [vmem:[%s7398_s6 + $0x28] sm:$0xff]  ;;  %v323_v28 = vld [vmem:[%s7398_s6 + $0x20] sm:$0xff] }
 0x651   :  { %3278 = vmatprep.subr.mxu0 %v324_v25  ;;  %v8763_v25 = vld [vmem:[%s7398_s6 + $0x250] sm:$0xff] }
 0x652   :  { %v2602_v4 = vrot.slane %v2601_v17, 1  ;;  %3279 = vmatpush1.msra.mxu0 %v323_v28  ;;  %10788 = vst [vmem:[#allocation28_spill] sm:$0xff] %v8763_v25  ;;  %v8768_v28 = vld [vmem:[%s7398_s6 + $0x308] sm:$0xff] }
 0x653   :  { %3280 = vmatprep.subr.mxu0 %v322_v2  ;;  %10789 = vst [vmem:[#allocation39_spill] sm:$0xff] %v8768_v28  ;;  %v8774_v2 = vld [vmem:[%s7398_s6 + $0x248] sm:$0xff] }
 0x654   :  { %v2603_v5 = vadd.f32 %v2602_v4, %v2601_v17  ;;  %v321_v17 = vld [vmem:[%s7398_s6 + $0x10] sm:$0xff]  ;;  %v10775_v4 = vld [vmem:[#allocation73_spill] sm:$0xff]  ;;  %10790 = vst [vmem:[#allocation30_spill] sm:$0xff] %v8774_v2 }
 0x655   :  { %3281 = vmatpush1.msra.mxu0 %v321_v17  ;;  %v8777_v17 = vld [vmem:[%s7398_s6 + $0x300] sm:$0xff] }
 0x656   :  { %6961 = vmatmul.mubr.msk.f32.vlgmr.msra.gmra.mxu1 %vm1601_vm9, %v2603_v5  ;;  %10791 = vst [vmem:[#allocation40_spill] sm:$0xff] %v8777_v17 }
 0x657   :  { %6993 = vmatpush3.msra.mxu1 %v8372_v7  ;;  %7018 = vmatprep.mubr.msk.f32.mxu1 %vm7323_vm10, %v10675_v38  ;;  %v2611_v7 = vrot.slane %v2610_v12, 2 }
 0x658   :  { %6994 = vmatprep.subr.mxu1 %v10675_v38 }
 0x659   :  { %6995 = vmatpush3.msra.mxu1 %v8379_v20  ;;  %v2612_v20 = vadd.f32 %v2611_v7, %v2610_v12 }
 0x65a   :  { %v2757_v16 = vpop.f32.mrf.mxu0  ;;  %6996 = vmatprep.subr.mxu1 %v10675_v38 }
 0x65b   :  { %6997 = vmatpush3.msra.mxu1 %v8388_v10  ;;  %v2613_v0 = vrot.slane %v2612_v20, 1 }
 0x65c   :  { %v6991_v55 = vpop.f32.mrf.mxu0  ;;  %6998 = vmatprep.subr.mxu1 %v10675_v38 }
 0x65d   :  { %6999 = vmatpush3.msra.mxu1 %v8393_v36  ;;  %v2614_v48 = vadd.f32 %v2613_v0, %v2612_v20 }
 0x65e   :  { %7000 = vmatprep.subr.mxu1 %v10675_v38 }
 0x65f   :  { %7001 = vmatpush3.msra.mxu1 %v8400_v59 }
 0x660   :  { %7002 = vmatprep.subr.mxu1 %v10675_v38 }
 0x661   :  { %7003 = vmatpush3.msra.mxu1 %v8407_v31 }
 0x662   :  { %7004 = vmatprep.subr.mxu1 %v10675_v38 }
 0x663   :  { %7005 = vmatpush3.msra.mxu1 %v8414_v62 }
 0x664   :  { %7006 = vmatprep.subr.mxu1 %v10675_v38 }
 0x665   :  { %7007 = vmatpush3.msra.mxu1 %v8421_v13 }
 0x666   :  { %7008 = vmatprep.subr.mxu1 %v10675_v38 }
 0x667   :  { %7009 = vmatpush3.msra.mxu1 %v8428_v47 }
 0x668   :  { %7010 = vmatprep.subr.mxu1 %v10675_v38 }
 0x669   :  { %7011 = vmatpush3.msra.mxu1 %v8435_v19 }
 0x66a   :  { %7012 = vmatprep.subr.mxu1 %v10675_v38 }
 0x66b   :  { %7013 = vmatpush3.msra.mxu1 %v8442_v3 }
 0x66c   :  { %7014 = vmatprep.subr.mxu1 %v10675_v38 }
 0x66d   :  { %7015 = vmatpush3.msra.mxu1 %v8451_v32 }
 0x66e   :  { %7016 = vmatprep.subr.mxu1 %v10675_v38 }
 0x66f   :  { %7017 = vmatpush3.msra.mxu1 %v8460_v51 }
 0x670   :  { %7019 = vmatmul.mubr.msk.f32.vlgmr.msra.gmra.mxu1 %vm1601_vm9, %v2614_v48  ;;  %7050 = vmatprep.subr.mxu1 %v10675_v38 }
 0x671   :  { %7052 = vmatprep.mubr.msk.f32.mxu1 %vm7323_vm10, %v10675_v38  ;;  %7051 = vmatpush3.msra.mxu1 %v213_v50 }
 0x672   :  { %7055 = vmatprep.subr.mxu1 %v10675_v38 }
 0x674   :  { %v2903_v22 = vpop.f32.mrf.mxu0 }
 0x676   :  { %v7049_v10 = vpop.f32.mrf.mxu0 }
 0x677   :  { %v8617_v10 = vld [vmem:[%s7398_s6 + $0x180] sm:$0xff] }
 0x716   :  { %v2684_v36 = vpop.f32.mrf.mxu1 }
 0x717   :  { %v2758_v6 = vadd.f32 %v2757_v16, %v2684_v36  ;;  %v8626_v36 = vld [vmem:[%s7398_s6 + $0x170] sm:$0xff] }
 0x718   :  { %v6962_v59 = vpop.f32.mrf.mxu1 }
 0x719   :  { %v2907_v31 = vmul.f32 0.00295858, %v2758_v6  ;;  %v8630_v59 = vld [vmem:[%s7398_s6 + $0x168] sm:$0xff]  ;;  %v8634_v6 = vld [vmem:[%s7398_s6 + $0x160] sm:$0xff] }
 0x71b   :  { %v2909_v47 = vmul.f32 %v2907_v31, %v2907_v31 }
 0x730   :  { %v2830_v62 = vpop.f32.mrf.mxu1 }
 0x731   :  { %v2904_v15 = vadd.f32 %v2903_v22, %v2830_v62  ;;  %v8608_v22 = vld [vmem:[%s7398_s6 + $0x190] sm:$0xff] }
 0x732   :  { %v7020_v13 = vpop.f32.mrf.mxu1  ;;  %v8642_v62 = vld [vmem:[%s7398_s6 + $0x150] sm:$0xff] }
 0x733   :  { %v2908_v54 = vmul.f32 0.00295858, %v2904_v15  ;;  %v8646_v15 = vld [vmem:[%s7398_s6 + $0x148] sm:$0xff]  ;;  %v8650_v13 = vld [vmem:[%s7398_s6 + $0x140] sm:$0xff] }
 0x735   :  { %v2910_v19 = vsub.f32 %v2908_v54, %v2909_v47  ;;  %v8654_v47 = vld [vmem:[%s7398_s6 + $0x138] sm:$0xff]  ;;  %v8658_v54 = vld [vmem:[%s7398_s6 + $0x130] sm:$0xff] }
 0x737   :  { %v2912_v3 = vadd.f32 1e-05, %v2910_v19  ;;  %v8662_v19 = vld [vmem:[%s7398_s6 + $0x128] sm:$0xff] }
 0x739   :  { %7233 = vrsqrt.f32 %v2912_v3  ;;  %v8666_v3 = vld [vmem:[%s7398_s6 + $0x120] sm:$0xff] }
 0x746   :  { %v7234_v53 = vpop.eup %7233 }
 0x747   :  { %v2914_v32 = vmul.f32 %v7234_v53, %v2911_v29  ;;  %v8670_v29 = vld [vmem:[%s7398_s6 + $0x118] sm:$0xff]  ;;  %v8674_v53 = vld [vmem:[%s7398_s6 + $0x110] sm:$0xff] }
 0x749   :  { %7053 = vmatmul.mubr.msk.f32.vlgmr.msra.gmra.mxu1 %vm2918_vm11, %v2914_v32  ;;  %v2916_v51 = vmul.f32 %v2914_v32, %v2907_v31  ;;  %v8638_v31 = vld [vmem:[%s7398_s6 + $0x158] sm:$0xff]  ;;  %v8678_v32 = vld [vmem:[%s7398_s6 + $0x108] sm:$0xff] }
 0x74a   :  { %7056 = vmatpush3.msra.mxu1 %v213_v50  ;;  %7057 = vmatprep.mubr.msk.f32.mxu1 %vm7323_vm10, %v10675_v38  ;;  %v8621_v50 = vld [vmem:[%s7398_s6 + $0x178] sm:$0xff] }
 0x74b   :  { %v2917_v18 = vsub.f32 %v2915_v30, %v2916_v51  ;;  %v8682_v30 = vld [vmem:[%s7398_s6 + $0x100] sm:$0xff]  ;;  %v8686_v51 = vld [vmem:[%s7398_s6 + $0xf8] sm:$0xff] }
 0x74d   :  { %7058 = vmatmul.mubr.msk.f32.vlgmr.msra.gmra.mxu1 %vm2918_vm11, %v2917_v18  ;;  %v8692_v18 = vld [vmem:[%s7398_s6 + $0xf0] sm:$0xff] }
 0x74e   :  { %7064 = vmatprep.mubr.msk.f32.mxu1 %vm3077_vm12, %v214_v46  ;;  %v8695_v46 = vld [vmem:[%s7398_s6 + $0x8] sm:$0xff] }
 0x74f   :  { %3282 = vmatprep.subr.mxu0 %v8695_v46 }
 0x750   :  { %3283 = vmatpush1.msra.mxu0 %v8703_v8 }
 0x751   :  { %3430 = vmatprep.subr.mxu0 %v8711_v34 }
 0x809   :  { %v2988_v35 = vpop.f32.mrf.mxu1 }
 0x80a   :  { %v3068_v9 = vrot.slane %v2988_v35, %v10775_v4  ;;  %v8782_v35 = vld [vmem:[%s7398_s6 + $0x2f8] sm:$0xff] }
 0x80b   :  { %v7054_v5 = vpop.f32.mrf.mxu1  ;;  %10792 = vst [vmem:[#allocation32_spill] sm:$0xff] %v8782_v35 }
 0x80c   :  { %v3070_v37 = vmul.f32 %v3068_v9, %v10773_v43  ;;  %v3932_v42 = vmul.f32 %v3068_v9, %v8510_v1  ;;  %v3931_v55 = vmul.f32 %v3068_v9, %v8508_v33  ;;  %v3069_v20 = vmul.f32 %v3068_v9, %v10774_v58  ;;  %v8602_v1 = vld [vmem:[%s7393_s30 + $0x8] sm:$0x7f]  ;;  %v8605_v33 = vld [vmem:[%s7398_s6 + $0x198] sm:$0xff]  ;;  %v8787_v9 = vld [vmem:[%s7398_s6 + $0x240] sm:$0xff] }
 0x80d   :  { %v3061_v11 = vpop.f32.mrf.mxu1  ;;  %v8611_v58 = vld [vmem:[%s7398_s6 + $0x188] sm:$0xff]  ;;  %10793 = vst [vmem:[#allocation41_spill] sm:$0xff] %v8787_v9  ;;  %v8790_v5 = vld [vmem:[%s7398_s6 + $0x2f0] sm:$0xff] }
 0x80e   :  { %v3074_v16 = vrot.slane %v3061_v11, %v10775_v4  ;;  %10794 = vst [vmem:[#allocation34_spill] sm:$0xff] %v8790_v5  ;;  %v8795_v11 = vld [vmem:[%s7398_s6 + $0x238] sm:$0xff] }
 0x80f   :  { %v7059_v12 = vpop.f32.mrf.mxu1  ;;  %10795 = vst [vmem:[#allocation42_spill] sm:$0xff] %v8795_v11 }
 0x810   :  { %v3076_v7 = vadd.f32 %v3074_v16, %v3070_v37  ;;  %v8595_v0 = vadd.f32 %v3932_v42, %v3074_v16  ;;  %v8597_v48 = vadd.f32 %v3931_v55, %v3074_v16  ;;  %v3075_v43 = vadd.f32 %v3074_v16, %v3069_v20  ;;  %v8798_v37 = vld [vmem:[%s7398_s6 + $0x2e8] sm:$0xff]  ;;  %v8803_v42 = vld [vmem:[%s7398_s6 + $0x230] sm:$0xff]  ;;  %v8806_v16 = vld [vmem:[%s7398_s6 + $0x2e0] sm:$0xff] }
 0x811   :  { %10796 = vst [vmem:[#allocation43_spill] sm:$0xff] %v8798_v37  ;;  %10797 = vst [vmem:[#allocation44_spill] sm:$0xff] %v8803_v42  ;;  %v8811_v55 = vld [vmem:[%s7398_s6 + $0x228] sm:$0xff]  ;;  %v8814_v12 = vld [vmem:[%s7398_s6 + $0x2d8] sm:$0xff] }
 0x812   :  { %7060 = vmatprep.subr.msk.mxu1 %vm1000_vm3, %v3076_v7  ;;  %10798 = vst [vmem:[#allocation45_spill] sm:$0xff] %v8806_v16  ;;  %10799 = vst [vmem:[#allocation46_spill] sm:$0xff] %v8811_v55  ;;  %v8822_v20 = vld [vmem:[%s7398_s6 + $0x2d0] sm:$0xff] }
 0x813   :  { %7061 = vmatpush3.msk.msra.mxu1 %vm1000_vm3, %v3076_v7  ;;  %10800 = vst [vmem:[#allocation47_spill] sm:$0xff] %v8814_v12  ;;  %v8819_v7 = vld [vmem:[%s7398_s6 + $0x220] sm:$0xff]  ;;  %10802 = vst [vmem:[#allocation49_spill] sm:$0xff] %v8822_v20 }
 0x814   :  { %7062 = vmatprep.subr.mxu1 %v3075_v43  ;;  %10801 = vst [vmem:[#allocation48_spill] sm:$0xff] %v8819_v7 }
 0x815   :  { %7063 = vmatpush3.msra.mxu1 %v3075_v43  ;;  %v8827_v43 = vld [vmem:[%s7398_s6 + $0x218] sm:$0xff] }
 0x816   :  { %7065 = vmatmul.mubr.msk.f32.vlgmr.msra.gmra.mxu1 %vm3077_vm12, %v8602_v1  ;;  %3177 = vmatprep.subr.mxu1 %v8605_v33  ;;  %10803 = vst [vmem:[#allocation50_spill] sm:$0xff] %v8827_v43 }
 0x817   :  { %3178 = vmatpush1.msra.mxu1 %v8608_v22  ;;  %3235 = vmatprep.mubr.f32.mxu1 %v10675_v38 }
 0x818   :  { %3179 = vmatprep.subr.mxu1 %v8611_v58 }
 0x819   :  { %3180 = vmatpush1.msra.mxu1 %v8617_v10 }
 0x81a   :  { %3181 = vmatprep.subr.mxu1 %v8621_v50 }
 0x81b   :  { %3182 = vmatpush1.msra.mxu1 %v8626_v36 }
 0x81c   :  { %3183 = vmatprep.subr.mxu1 %v8630_v59 }
 0x81d   :  { %3184 = vmatpush1.msra.mxu1 %v8634_v6 }
 0x81e   :  { %3185 = vmatprep.subr.mxu1 %v8638_v31 }
 0x81f   :  { %3186 = vmatpush1.msra.mxu1 %v8642_v62 }
 0x820   :  { %3187 = vmatprep.subr.mxu1 %v8646_v15 }
 0x821   :  { %3188 = vmatpush1.msra.mxu1 %v8650_v13 }
 0x822   :  { %3189 = vmatprep.subr.mxu1 %v8654_v47 }
 0x823   :  { %3190 = vmatpush1.msra.mxu1 %v8658_v54 }
 0x824   :  { %3191 = vmatprep.subr.mxu1 %v8662_v19 }
 0x825   :  { %3192 = vmatpush1.msra.mxu1 %v8666_v3 }
 0x826   :  { %3193 = vmatprep.subr.mxu1 %v8670_v29 }
 0x827   :  { %3194 = vmatpush1.msra.mxu1 %v8674_v53 }
 0x828   :  { %3195 = vmatprep.subr.mxu1 %v8678_v32 }
 0x829   :  { %3196 = vmatpush1.msra.mxu1 %v8682_v30 }
 0x82a   :  { %3197 = vmatprep.subr.mxu1 %v8686_v51 }
 0x82b   :  { %3198 = vmatpush1.msra.mxu1 %v8692_v18 }
 0x82c   :  { %3199 = vmatprep.subr.mxu1 %v8700_v49 }
 0x82d   :  { %3200 = vmatpush1.msra.mxu1 %v8708_v61  ;;  %v10876_v61 = vld [vmem:[#allocation74_spill] sm:$0xff] }
 0x82e   :  { %3201 = vmatprep.subr.mxu1 %v8716_v39 }
 0x82f   :  { %3202 = vmatpush1.msra.mxu1 %v8720_v40 }
 0x830   :  { %3342 = vmatprep.subr.mxu1 %v8724_v41 }
 0x8d6   :  { %v8727_v27 = vpop.f32.mrf.mxu1 }
 0x8d7   :  { %v3165_v14 = vrot.slane %v8727_v27, 1 }
 0x8d8   :  { %v8732_v44 = vpop.f32.mrf.mxu1 }
 0x8d9   :  { %v3164_v60 = vrot.slane %v8732_v44, 1  ;;  %6702 = vmatmul.mubr.msk.f32.vlgmr.msra.gmra.mxu0 %vm1601_vm9, %v8732_v44 }
 0x8da   :  { %3431 = vmatpush1.msra.mxu0 %v8730_v26  ;;  %3322 = vmatprep.mubr.f32.mxu0 %v10675_v38 }
 0x8db   :  { %3432 = vmatprep.subr.mxu0 %v8735_v56  ;;  %v3166_v23 = vsel %vm667_vm2, %v3164_v60, %v3165_v14  ;;  %v8835_v60 = vld [vmem:[%s7398_s6 + $0x210] sm:$0xff] }
 0x8dc   :  { %3433 = vmatpush1.msra.mxu0 %v8742_v21  ;;  %6700 = vmatmul.mubr.msk.f32.vlgmr.msra.gmra.mxu1 %vm1601_vm9, %v3166_v23  ;;  %10805 = vst [vmem:[#allocation52_spill] sm:$0xff] %v8835_v60  ;;  %v8838_v23 = vld [vmem:[%s7398_s6 + $0x2c0] sm:$0xff] }
 0x8dd   :  { %3343 = vmatpush1.msra.mxu1 %v8747_v24  ;;  %3434 = vmatprep.subr.mxu0 %v8750_v52  ;;  %10806 = vst [vmem:[#allocation53_spill] sm:$0xff] %v8838_v23  ;;  %v216_v21 = vld [vmem:[%s10875_s5] sm:$0x3] }
 0x8de   :  { %6703 = vmatmul.mubr.msk.f32.gmra.mxu0 %vm1601_vm9, %v8727_v27  ;;  %3344 = vmatprep.subr.mxu1 %v8755_v57 }
 0x8df   :  { %3435 = vmatpush1.msra.mxu0 %v8760_v63  ;;  %3345 = vmatpush1.msra.mxu1 %v8763_v25 }
 0x8e0   :  { %3436 = vmatprep.subr.mxu0 %v8768_v28  ;;  %3241 = vmatprep.mubr.f32.mxu1 %v10675_v38 }
 0x8e1   :  { %3346 = vmatprep.subr.mxu1 %v8774_v2  ;;  %3437 = vmatpush1.msra.mxu0 %v8777_v17 }
 0x8e2   :  { %6701 = vmatmul.mubr.msk.f32.gmra.mxu1 %vm1601_vm9, %v3165_v14  ;;  %3438 = vmatprep.subr.mxu0 %v8782_v35  ;;  %v8830_v14 = vld [vmem:[%s7398_s6 + $0x2c8] sm:$0xff] }
 0x8e3   :  { %3347 = vmatpush1.msra.mxu1 %v8787_v9  ;;  %3439 = vmatpush1.msra.mxu0 %v8790_v5  ;;  %10804 = vst [vmem:[#allocation51_spill] sm:$0xff] %v8830_v14 }
 0x8e4   :  { %3348 = vmatprep.subr.mxu1 %v8795_v11  ;;  %3440 = vmatprep.subr.mxu0 %v8798_v37  ;;  %v3417_v37 = vrot.slane %v8732_v44, 3 }
 0x8e5   :  { %3349 = vmatpush1.msra.mxu1 %v8803_v42  ;;  %3441 = vmatpush1.msra.mxu0 %v8806_v16  ;;  %v8843_v16 = vld [vmem:[%s7398_s6 + $0x208] sm:$0xff]  ;;  %v8846_v42 = vld [vmem:[%s7398_s6 + $0x2b8] sm:$0xff] }
 0x8e6   :  { %3350 = vmatprep.subr.mxu1 %v8811_v55  ;;  %3442 = vmatprep.subr.mxu0 %v8814_v12  ;;  %10807 = vst [vmem:[#allocation54_spill] sm:$0xff] %v8843_v16  ;;  %10808 = vst [vmem:[#allocation55_spill] sm:$0xff] %v8846_v42  ;;  %v8851_v12 = vld [vmem:[%s7398_s6 + $0x200] sm:$0xff]  ;;  %v8854_v55 = vld [vmem:[%s7398_s6 + $0x2b0] sm:$0xff] }
 0x8e7   :  { %3351 = vmatpush1.msra.mxu1 %v8819_v7  ;;  %3443 = vmatpush1.msra.mxu0 %v8822_v20  ;;  %10809 = vst [vmem:[#allocation56_spill] sm:$0xff] %v8851_v12  ;;  %10810 = vst [vmem:[#allocation57_spill] sm:$0xff] %v8854_v55  ;;  %v8859_v20 = vld [vmem:[%s7398_s6 + $0x1f8] sm:$0xff]  ;;  %v8862_v7 = vld [vmem:[%s7398_s6 + $0x2a8] sm:$0xff] }
 0x8e8   :  { %3352 = vmatprep.subr.mxu1 %v8827_v43  ;;  %3444 = vmatprep.subr.mxu0 %v8830_v14  ;;  %10811 = vst [vmem:[#allocation58_spill] sm:$0xff] %v8859_v20  ;;  %10812 = vst [vmem:[#allocation59_spill] sm:$0xff] %v8862_v7  ;;  %v8867_v14 = vld [vmem:[%s7398_s6 + $0x1f0] sm:$0xff]  ;;  %v8870_v43 = vld [vmem:[%s7398_s6 + $0x2a0] sm:$0xff] }
 0x8e9   :  { %3353 = vmatpush1.msra.mxu1 %v8835_v60  ;;  %3445 = vmatpush1.msra.mxu0 %v8838_v23  ;;  %10813 = vst [vmem:[#allocation60_spill] sm:$0xff] %v8867_v14  ;;  %10814 = vst [vmem:[#allocation61_spill] sm:$0xff] %v8870_v43  ;;  %v8875_v23 = vld [vmem:[%s7398_s6 + $0x1e8] sm:$0xff]  ;;  %v8878_v60 = vld [vmem:[%s7398_s6 + $0x298] sm:$0xff] }
 0x8ea   :  { %3354 = vmatprep.subr.mxu1 %v8843_v16  ;;  %3446 = vmatprep.subr.mxu0 %v8846_v42  ;;  %10815 = vst [vmem:[#allocation62_spill] sm:$0xff] %v8875_v23  ;;  %10816 = vst [vmem:[#allocation63_spill] sm:$0xff] %v8878_v60  ;;  %v8883_v42 = vld [vmem:[%s7398_s6 + $0x1e0] sm:$0xff]  ;;  %v8886_v16 = vld [vmem:[%s7398_s6 + $0x290] sm:$0xff] }
 0x8eb   :  { %3355 = vmatpush1.msra.mxu1 %v8851_v12  ;;  %3447 = vmatpush1.msra.mxu0 %v8854_v55  ;;  %10817 = vst [vmem:[#allocation64_spill] sm:$0xff] %v8883_v42  ;;  %10818 = vst [vmem:[#allocation65_spill] sm:$0xff] %v8886_v16  ;;  %v8891_v55 = vld [vmem:[%s7398_s6 + $0x1d8] sm:$0xff]  ;;  %v8894_v12 = vld [vmem:[%s7398_s6 + $0x288] sm:$0xff] }
 0x8ec   :  { %3356 = vmatprep.subr.mxu1 %v8859_v20  ;;  %3448 = vmatprep.subr.mxu0 %v8862_v7  ;;  %10819 = vst [vmem:[#allocation66_spill] sm:$0xff] %v8891_v55  ;;  %10820 = vst [vmem:[#allocation67_spill] sm:$0xff] %v8894_v12  ;;  %v8899_v7 = vld [vmem:[%s7398_s6 + $0x1d0] sm:$0xff]  ;;  %v8902_v20 = vld [vmem:[%s7398_s6 + $0x280] sm:$0xff] }
 0x8ed   :  { %3357 = vmatpush1.msra.mxu1 %v8867_v14  ;;  %3449 = vmatpush1.msra.mxu0 %v8870_v43  ;;  %10821 = vst [vmem:[#allocation68_spill] sm:$0xff] %v8899_v7  ;;  %10822 = vst [vmem:[#allocation69_spill] sm:$0xff] %v8902_v20  ;;  %v8907_v14 = vld [vmem:[%s7398_s6 + $0x1c8] sm:$0xff]  ;;  %v8910_v43 = vld [vmem:[%s7398_s6 + $0x278] sm:$0xff] }
 0x8ee   :  { %3358 = vmatprep.subr.mxu1 %v8875_v23  ;;  %3450 = vmatprep.subr.mxu0 %v8878_v60  ;;  %10823 = vst [vmem:[#allocation70_spill] sm:$0xff] %v8907_v14  ;;  %10824 = vst [vmem:[#allocation71_spill] sm:$0xff] %v8910_v43  ;;  %v8916_v60 = vld [vmem:[%s7398_s6 + $0x1c0] sm:$0xff]  ;;  %v8919_v23 = vld [vmem:[%s7398_s6 + $0x270] sm:$0xff] }
 0x8ef   :  { %3359 = vmatpush1.msra.mxu1 %v8883_v42  ;;  %3451 = vmatpush1.msra.mxu0 %v8886_v16  ;;  %10825 = vst [vmem:[#allocation75_spill] sm:$0xff] %v8916_v60  ;;  %10826 = vst [vmem:[#allocation76_spill] sm:$0xff] %v8919_v23  ;;  %v8924_v16 = vld [vmem:[%s7398_s6 + $0x1b8] sm:$0xff]  ;;  %v3418_v42 = vrot.slane %v8727_v27, 3 }
 0x8f0   :  { %3360 = vmatprep.subr.mxu1 %v8891_v55  ;;  %3452 = vmatprep.subr.mxu0 %v8894_v12  ;;  %10827 = vst [vmem:[#allocation77_spill] sm:$0xff] %v8924_v16  ;;  %v8930_v12 = vld [vmem:[%s7398_s6 + $0x1b0] sm:$0xff]  ;;  %v3329_v55 = vrot.slane %v8732_v44, 2 }
 0x8f1   :  { %3361 = vmatpush1.msra.mxu1 %v8899_v7  ;;  %3453 = vmatpush1.msra.mxu0 %v8902_v20  ;;  %10828 = vst [vmem:[#allocation78_spill] sm:$0xff] %v8930_v12  ;;  %v8936_v20 = vld [vmem:[%s7398_s6 + $0x1a8] sm:$0xff]  ;;  %v3330_v7 = vrot.slane %v8727_v27, 2 }
 0x8f2   :  { %3362 = vmatprep.subr.mxu1 %v8907_v14  ;;  %3454 = vmatprep.subr.mxu0 %v8910_v43  ;;  %10829 = vst [vmem:[#allocation79_spill] sm:$0xff] %v8936_v20  ;;  %v3419_v14 = vsel %vm1000_vm3, %v3417_v37, %v3418_v42  ;;  %v8942_v43 = vld [vmem:[%s7398_s6 + $0x1a0] sm:$0xff] }
 0x8f3   :  { %3363 = vmatpush1.msra.mxu1 %v8916_v60  ;;  %3455 = vmatpush1.msra.mxu0 %v8919_v23  ;;  %10830 = vst [vmem:[#allocation80_spill] sm:$0xff] %v8942_v43  ;;  %v8948_v23 = vld [vmem:[%s7398_s6 + $0x408] sm:$0xff]  ;;  %v3331_v37 = vsel %vm881_vm4, %v3329_v55, %v3330_v7  ;;  %v8974_v55 = vld [vmem:[%s7398_s6 + $0x3e0] sm:$0xff] }
 0x8f4   :  { %3364 = vmatprep.subr.mxu1 %v8924_v16  ;;  %3488 = vmatprep.mubr.f32.mxu0 %v10675_v38  ;;  %10831 = vst [vmem:[#allocation81_spill] sm:$0xff] %v8948_v23  ;;  %v8953_v16 = vld [vmem:[%s7398_s6 + $0x400] sm:$0xff]  ;;  %10836 = vst [vmem:[#allocation86_spill] sm:$0xff] %v8974_v55 }
 0x8f5   :  { %3365 = vmatpush1.msra.mxu1 %v8930_v12  ;;  %6706 = vmatmul.mubr.msk.f32.vlgmr.msra.gmra.mxu0 %vm1601_vm9, %v3419_v14  ;;  %10832 = vst [vmem:[#allocation82_spill] sm:$0xff] %v8953_v16  ;;  %v8959_v12 = vld [vmem:[%s7398_s6 + $0x3f8] sm:$0xff]  ;;  %v8964_v14 = vld [vmem:[%s7398_s6 + $0x3f0] sm:$0xff] }
 0x8f6   :  { %3366 = vmatprep.subr.mxu1 %v8936_v20  ;;  %3400 = vmatprep.mubr.f32.mxu1 %v10675_v38  ;;  %10833 = vst [vmem:[#allocation83_spill] sm:$0xff] %v8959_v12  ;;  %10834 = vst [vmem:[#allocation84_spill] sm:$0xff] %v8964_v14 }
 0x8f7   :  { %3367 = vmatpush1.msra.mxu1 %v8942_v43  ;;  %3494 = vmatprep.mubr.f32.mxu0 %v10675_v38  ;;  %v8969_v43 = vld [vmem:[%s7398_s6 + $0x3e8] sm:$0xff] }
 0x8f8   :  { %6704 = vmatmul.mubr.msk.f32.vlgmr.msra.gmra.mxu1 %vm1601_vm9, %v3331_v37  ;;  %3518 = vmatprep.subr.mxu1 %v8948_v23  ;;  %10835 = vst [vmem:[#allocation85_spill] sm:$0xff] %v8969_v43  ;;  %v8978_v37 = vld [vmem:[%s7398_s6 + $0x3d8] sm:$0xff] }
 0x8f9   :  { %6707 = vmatmul.mubr.msk.f32.gmra.mxu0 %vm1601_vm9, %v3418_v42  ;;  %3519 = vmatpush1.msra.mxu1 %v8953_v16  ;;  %10837 = vst [vmem:[#allocation87_spill] sm:$0xff] %v8978_v37  ;;  %v8984_v42 = vld [vmem:[%s7398_s6 + $0x3d0] sm:$0xff]  ;;  %v9037_v16 = vld [vmem:[%s7398_s6 + $0x368] sm:$0xff] }
 0x8fa   :  { %3520 = vmatprep.subr.mxu1 %v8959_v12  ;;  %3406 = vmatprep.mubr.f32.mxu1 %v10675_v38  ;;  %10838 = vst [vmem:[#allocation88_spill] sm:$0xff] %v8984_v42  ;;  %v8988_v12 = vld [vmem:[%s7398_s6 + $0x3c8] sm:$0xff]  ;;  %10851 = vst [vmem:[#allocation99_spill] sm:$0xff] %v9037_v16 }
 0x8fb   :  { %3521 = vmatpush1.msra.mxu1 %v8964_v14  ;;  %3687 = vmatprep.mubr.f32.mxu0 %v10675_v38  ;;  %10839 = vst [vmem:[#allocation89_spill] sm:$0xff] %v8988_v12  ;;  %v8993_v14 = vld [vmem:[%s7398_s6 + $0x3c0] sm:$0xff] }
 0x8fc   :  { %6705 = vmatmul.mubr.msk.f32.gmra.mxu1 %vm1601_vm9, %v3330_v7  ;;  %3522 = vmatprep.subr.mxu1 %v8969_v43  ;;  %10840 = vst [vmem:[#allocation90_spill] sm:$0xff] %v8993_v14  ;;  %v8997_v7 = vld [vmem:[%s7398_s6 + $0x3b8] sm:$0xff]  ;;  %v9001_v43 = vld [vmem:[%s7398_s6 + $0x3b0] sm:$0xff] }
 0x8fd   :  { %3523 = vmatpush1.msra.mxu1 %v8974_v55  ;;  %3576 = vmatprep.mubr.f32.mxu1 %v10675_v38  ;;  %10841 = vst [vmem:[#allocation91_spill] sm:$0xff] %v8997_v7  ;;  %10842 = vst [vmem:[#allocation92_spill] sm:$0xff] %v9001_v43  ;;  %v9005_v55 = vld [vmem:[%s7398_s6 + $0x3a8] sm:$0xff] }
 0x8fe   :  { %3524 = vmatprep.subr.mxu1 %v8978_v37  ;;  %10843 = vst [vmem:[#allocation93_spill] sm:$0xff] %v9005_v55  ;;  %v9009_v37 = vld [vmem:[%s7398_s6 + $0x3a0] sm:$0xff] }
 0x8ff   :  { %3525 = vmatpush1.msra.mxu1 %v8984_v42  ;;  %10844 = vst [vmem:[#allocation94_spill] sm:$0xff] %v9009_v37  ;;  %v9013_v42 = vld [vmem:[%s7398_s6 + $0x398] sm:$0xff] }
 0x900   :  { %3526 = vmatprep.subr.mxu1 %v8988_v12  ;;  %10845 = vst [vmem:[#allocation95_spill] sm:$0xff] %v9013_v42  ;;  %v9017_v12 = vld [vmem:[%s7398_s6 + $0x390] sm:$0xff] }
 0x901   :  { %3527 = vmatpush1.msra.mxu1 %v8993_v14  ;;  %10846 = vst [vmem:[#allocation96_spill] sm:$0xff] %v9017_v12  ;;  %v9021_v14 = vld [vmem:[%s7398_s6 + $0x388] sm:$0xff] }
 0x902   :  { %3528 = vmatprep.subr.mxu1 %v8997_v7  ;;  %10847 = vst [vmem:[#allocation35_spill] sm:$0xff] %v9021_v14  ;;  %v9025_v7 = vld [vmem:[%s7398_s6 + $0x380] sm:$0xff] }
 0x903   :  { %3529 = vmatpush1.msra.mxu1 %v9001_v43  ;;  %10848 = vst [vmem:[#allocation25_spill] sm:$0xff] %v9025_v7  ;;  %v9029_v43 = vld [vmem:[%s7398_s6 + $0x378] sm:$0xff] }
 0x904   :  { %3530 = vmatprep.subr.mxu1 %v9005_v55  ;;  %10849 = vst [vmem:[#allocation97_spill] sm:$0xff] %v9029_v43  ;;  %v9033_v55 = vld [vmem:[%s7398_s6 + $0x370] sm:$0xff] }
 0x905   :  { %3531 = vmatpush1.msra.mxu1 %v9009_v37  ;;  %10850 = vst [vmem:[#allocation98_spill] sm:$0xff] %v9033_v55  ;;  %v9041_v37 = vld [vmem:[%s7398_s6 + $0x360] sm:$0xff] }
 0x906   :  { %3532 = vmatprep.subr.mxu1 %v9013_v42  ;;  %10852 = vst [vmem:[#allocation100_spill] sm:$0xff] %v9041_v37  ;;  %v9045_v42 = vld [vmem:[%s7398_s6 + $0x358] sm:$0xff] }
 0x907   :  { %3533 = vmatpush1.msra.mxu1 %v9017_v12  ;;  %10853 = vst [vmem:[#allocation101_spill] sm:$0xff] %v9045_v42  ;;  %v9049_v12 = vld [vmem:[%s7398_s6 + $0x350] sm:$0xff] }
 0x908   :  { %3534 = vmatprep.subr.mxu1 %v9021_v14  ;;  %10855 = vst [vmem:[#allocation102_spill] sm:$0xff] %v9049_v12  ;;  %v3505_v14 = vrot.slane %v8732_v44, 4 }
 0x909   :  { %3535 = vmatpush1.msra.mxu1 %v9025_v7  ;;  %v9054_v7 = vld [vmem:[%s7398_s6 + $0x348] sm:$0xff] }
 0x90a   :  { %3536 = vmatprep.subr.mxu1 %v9029_v43  ;;  %10856 = vst [vmem:[#allocation103_spill] sm:$0xff] %v9054_v7  ;;  %v9058_v43 = vld [vmem:[%s7398_s6 + $0x340] sm:$0xff] }
 0x90b   :  { %3537 = vmatpush1.msra.mxu1 %v9033_v55  ;;  %10857 = vst [vmem:[#allocation104_spill] sm:$0xff] %v9058_v43  ;;  %v3506_v55 = vrot.slane %v8727_v27, 4  ;;  %v9070_v27 = vld [vmem:[%s10854_s0 + $0x78] sm:$0xff] }
 0x90c   :  { %3538 = vmatprep.subr.mxu1 %v9037_v16  ;;  %10858 = vst [vmem:[#allocation105_spill] sm:$0xff] %v9070_v27 }
 0x90d   :  { %3539 = vmatpush1.msra.mxu1 %v9041_v37  ;;  %v3507_v44 = vsel %vm574_vm0, %v3505_v14, %v3506_v55  ;;  %v9078_v14 = vld [vmem:[%s10854_s0 + $0x68] sm:$0xff] }
 0x90e   :  { %3540 = vmatprep.subr.mxu1 %v9045_v42  ;;  %10860 = vst [vmem:[#allocation107_spill] sm:$0xff] %v9078_v14 }
 0x90f   :  { %3541 = vmatpush1.msra.mxu1 %v9049_v12  ;;  %v9073_v12 = vld [vmem:[%s10854_s0 + $0x70] sm:$0xff] }
 0x910   :  { %3542 = vmatprep.subr.mxu1 %v9054_v7  ;;  %10859 = vst [vmem:[#allocation106_spill] sm:$0xff] %v9073_v12 }
 0x911   :  { %3543 = vmatpush1.msra.mxu1 %v9058_v43 }
 0x912   :  { %6708 = vmatmul.mubr.msk.f32.vlgmr.msra.gmra.mxu1 %vm1601_vm9, %v3507_v44  ;;  %3844 = vmatprep.subr.mxu1 %v10675_v38  ;;  %v9083_v44 = vld [vmem:[%s10854_s0 + $0x60] sm:$0xff] }
 0x913   :  { %3582 = vmatprep.mubr.f32.mxu1 %v10675_v38  ;;  %3845 = vmatpush1.msra.mxu1 %v9070_v27  ;;  %10861 = vst [vmem:[#allocation108_spill] sm:$0xff] %v9083_v44  ;;  %v9093_v27 = vld [vmem:[%s10854_s0 + $0x50] sm:$0xff] }
 0x914   :  { %3846 = vmatprep.subr.mxu1 %v10675_v38  ;;  %10863 = vst [vmem:[#allocation110_spill] sm:$0xff] %v9093_v27 }
 0x915   :  { %3847 = vmatpush1.msra.mxu1 %v9073_v12  ;;  %v9098_v12 = vld [vmem:[%s10854_s0 + $0x48] sm:$0xff] }
 0x916   :  { %6709 = vmatmul.mubr.msk.f32.gmra.mxu1 %vm1601_vm9, %v3506_v55  ;;  %3848 = vmatprep.subr.mxu1 %v10675_v38  ;;  %v9088_v55 = vld [vmem:[%s10854_s0 + $0x58] sm:$0xff]  ;;  %10864 = vst [vmem:[#allocation111_spill] sm:$0xff] %v9098_v12 }
 0x917   :  { %3849 = vmatpush1.msra.mxu1 %v9078_v14  ;;  %10862 = vst [vmem:[#allocation109_spill] sm:$0xff] %v9088_v55  ;;  %v9103_v14 = vld [vmem:[%s10854_s0 + $0x40] sm:$0xff] }
 0x918   :  { %3850 = vmatprep.subr.mxu1 %v10675_v38  ;;  %10865 = vst [vmem:[#allocation112_spill] sm:$0xff] %v9103_v14 }
 0x919   :  { %3851 = vmatpush1.msra.mxu1 %v9083_v44  ;;  %v9108_v44 = vld [vmem:[%s10854_s0 + $0x38] sm:$0xff] }
 0x91a   :  { %3852 = vmatprep.subr.mxu1 %v10675_v38  ;;  %10866 = vst [vmem:[#allocation113_spill] sm:$0xff] %v9108_v44 }
 0x91b   :  { %3853 = vmatpush1.msra.mxu1 %v9088_v55  ;;  %v9113_v55 = vld [vmem:[%s10854_s0 + $0x30] sm:$0xff] }
 0x91c   :  { %3854 = vmatprep.subr.mxu1 %v10675_v38  ;;  %10867 = vst [vmem:[#allocation114_spill] sm:$0xff] %v9113_v55 }
 0x91d   :  { %3855 = vmatpush1.msra.mxu1 %v9093_v27  ;;  %v9118_v27 = vld [vmem:[%s10854_s0 + $0x28] sm:$0xff] }
 0x91e   :  { %3856 = vmatprep.subr.mxu1 %v10675_v38  ;;  %10868 = vst [vmem:[#allocation115_spill] sm:$0xff] %v9118_v27 }
 0x91f   :  { %3857 = vmatpush1.msra.mxu1 %v9098_v12  ;;  %v9123_v12 = vld [vmem:[%s10854_s0 + $0x20] sm:$0xff] }
 0x920   :  { %3858 = vmatprep.subr.mxu1 %v10675_v38  ;;  %10869 = vst [vmem:[#allocation116_spill] sm:$0xff] %v9123_v12 }
 0x921   :  { %3859 = vmatpush1.msra.mxu1 %v9103_v14  ;;  %v9128_v14 = vld [vmem:[%s10854_s0 + $0x18] sm:$0xff] }
 0x922   :  { %3860 = vmatprep.subr.mxu1 %v10675_v38  ;;  %10870 = vst [vmem:[#allocation117_spill] sm:$0xff] %v9128_v14 }
 0x923   :  { %3861 = vmatpush1.msra.mxu1 %v9108_v44  ;;  %v9133_v44 = vld [vmem:[%s10854_s0 + $0x10] sm:$0xff] }
 0x924   :  { %3862 = vmatprep.subr.mxu1 %v10675_v38  ;;  %10871 = vst [vmem:[#allocation118_spill] sm:$0xff] %v9133_v44 }
 0x925   :  { %3863 = vmatpush1.msra.mxu1 %v9113_v55  ;;  %v9138_v55 = vld [vmem:[%s10854_s0 + $0x8] sm:$0xff] }
 0x926   :  { %3864 = vmatprep.subr.mxu1 %v10675_v38  ;;  %10872 = vst [vmem:[#allocation119_spill] sm:$0xff] %v9138_v55 }
 0x927   :  { %3865 = vmatpush1.msra.mxu1 %v9118_v27  ;;  %v9143_v27 = vld [vmem:[%s10854_s0] sm:$0xff] }
 0x928   :  { %3866 = vmatprep.subr.mxu1 %v10675_v38  ;;  %10873 = vst [vmem:[#allocation120_spill] sm:$0xff] %v9143_v27 }
 0x929   :  { %3867 = vmatpush1.msra.mxu1 %v9123_v12  ;;  %v9148_v12 = vld [vmem:[%s10854_s0 + $0xa8] sm:$0xff] }
 0x92a   :  { %3868 = vmatprep.subr.mxu1 %v10675_v38  ;;  %10874 = vst [vmem:[#allocation121_spill] sm:$0xff] %v9148_v12 }
 0x92b   :  { %3869 = vmatpush1.msra.mxu1 %v9128_v14 }
 0x92c   :  { %3870 = vmatprep.subr.mxu1 %v10675_v38 }
 0x92d   :  { %3871 = vmatpush1.msra.mxu1 %v9133_v44 }
 0x92e   :  { %3872 = vmatprep.subr.mxu1 %v10675_v38 }
 0x92f   :  { %3873 = vmatpush1.msra.mxu1 %v9138_v55 }
 0x930   :  { %3874 = vmatprep.subr.mxu1 %v10675_v38 }
 0x931   :  { %3875 = vmatpush1.msra.mxu1 %v9143_v27 }
 0x932   :  { %3896 = vmatprep.subr.mxu1 %v10675_v38 }
 0x933   :  { %3897 = vmatpush2.msra.mxu1 %v9148_v12 }
 0x934   :  { %3898 = vmatprep.subr.mxu1 %v10675_v38 }
 0x999   :  { %v3318_v43 = vpop.f32.mrf.mxu0 }
 0x99b   :  { %v3320_v42 = vpop.f32.mrf.mxu0 }
 0x99c   :  { %v3237_v14 = vpop.f32.mrf.mxu1 }
 0x99d   :  { %v3319_v35 = vadd.f32 %v3318_v43, %v3237_v14  ;;  %v9240_v14 = vld [vmem:[%s10879_s17 + $0x18] sm:$0xff] }
 0x99e   :  { %v3239_v44 = vpop.f32.mrf.mxu1  ;;  %v3324_v16 = vpop.f32.mrf.mxu0 }
 0x99f   :  { %v3321_v5 = vadd.f32 %v3320_v42, %v3239_v44  ;;  %v9156_v42 = vrot.slane %v216_v21, %v10876_v61  ;;  %v9245_v44 = vld [vmem:[%s10879_s17 + $0x10] sm:$0xff] }
 0x9a0   :  { %v3326_v23 = vpop.f32.mrf.mxu0 }
 0x9a2   :  { %v3243_v7 = vpop.f32.mrf.mxu1 }
 0x9a3   :  { %v3325_v9 = vadd.f32 %v3324_v16, %v3243_v7  ;;  %v9230_v7 = vld [vmem:[%s10879_s17 + $0x28] sm:$0xff] }
 0x9a4   :  { %v3245_v37 = vpop.f32.mrf.mxu1 }
 0x9a5   :  { %v3327_v17 = vadd.f32 %v3326_v23, %v3245_v37  ;;  %v9220_v23 = vld [vmem:[%s10879_s17 + $0x38] sm:$0xff]  ;;  %v9225_v37 = vld [vmem:[%s10879_s17 + $0x30] sm:$0xff] }
 0x9b5   :  { %v3490_v60 = vpop.f32.mrf.mxu0 }
 0x9b7   :  { %v3492_v27 = vpop.f32.mrf.mxu0 }
 0x9b8   :  { %v3402_v55 = vpop.f32.mrf.mxu1 }
 0x9b9   :  { %v3413_v25 = vadd.f32 %v3402_v55, %v3319_v35  ;;  %v3496_v63 = vpop.f32.mrf.mxu0  ;;  %v9159_v35 = vrot.slane %v216_v21, %v10775_v4  ;;  %v9179_v21 = vld [vmem:[%s10879_s17 + $0x78] sm:$0xff]  ;;  %v9250_v55 = vld [vmem:[%s10879_s17 + $0x8] sm:$0xff] }
 0x9ba   :  { %v3404_v20 = vpop.f32.mrf.mxu1 }
 0x9bb   :  { %v3414_v2 = vadd.f32 %v3404_v20, %v3321_v5  ;;  %v3498_v41 = vpop.f32.mrf.mxu0  ;;  %v3501_v40 = vadd.f32 %v3490_v60, %v3413_v25  ;;  %v9210_v20 = vld [vmem:[%s10879_s17 + $0x48] sm:$0xff]  ;;  %v9215_v60 = vld [vmem:[%s10879_s17 + $0x40] sm:$0xff] }
 0x9bc   :  { %v3408_v11 = vpop.f32.mrf.mxu1 }
 0x9bd   :  { %v3415_v28 = vadd.f32 %v3408_v11, %v3325_v9  ;;  %v3502_v56 = vadd.f32 %v3492_v27, %v3414_v2  ;;  %v9200_v2 = vld [vmem:[%s10879_s17 + $0x58] sm:$0xff]  ;;  %v9235_v27 = vld [vmem:[%s10879_s17 + $0x20] sm:$0xff] }
 0x9be   :  { %v3410_v12 = vpop.f32.mrf.mxu1 }
 0x9bf   :  { %v3416_v52 = vadd.f32 %v3410_v12, %v3327_v17  ;;  %v3503_v26 = vadd.f32 %v3496_v63, %v3415_v28  ;;  %v9195_v28 = vld [vmem:[%s10879_s17 + $0x60] sm:$0xff]  ;;  %v9205_v12 = vld [vmem:[%s10879_s17 + $0x50] sm:$0xff] }
 0x9c1   :  { %v3504_v43 = vadd.f32 %v3498_v41, %v3416_v52  ;;  %v9185_v52 = vld [vmem:[%s10879_s17 + $0x70] sm:$0xff] }
 0x9d2   :  { %v3578_v57 = vpop.f32.mrf.mxu1 }
 0x9d3   :  { %v3589_v5 = vadd.f32 %v3578_v57, %v3501_v40  ;;  %v9190_v57 = vld [vmem:[%s10879_s17 + $0x68] sm:$0xff] }
 0x9d4   :  { %v3580_v24 = vpop.f32.mrf.mxu1 }
 0x9d5   :  { %v3590_v34 = vadd.f32 %v3580_v24, %v3502_v56  ;;  %v3604_v56 = vadd.f32 %v9159_v35, %v3589_v5  ;;  %v9265_v5 = vld [vmem:[%s10879_s17 + $0xa0] sm:$0xff] }
 0x9d6   :  { %v3584_v39 = vpop.f32.mrf.mxu1 }
 0x9d7   :  { %v3591_v16 = vadd.f32 %v3584_v39, %v3503_v26  ;;  %v3605_v63 = vadd.f32 %v9156_v42, %v3590_v34  ;;  %v3608_v40 = vmax.f32 %v3604_v56, 0.0  ;;  %v9168_v26 = vld [vmem:[%s10877_s9] sm:$0x1f]  ;;  %v9298_v56 = vld [vmem:[%s10854_s0 + $0x98] sm:$0xff] }
 0x9d8   :  { %v3586_v9 = vpop.f32.mrf.mxu1  ;;  %v9176_v34 = vld [vmem:[%s10878_s13] sm:$0x1f] }
 0x9d9   :  { %v3592_v17 = vadd.f32 %v3586_v9, %v3504_v43  ;;  %v3606_v11 = vadd.f32 %v9159_v35, %v3591_v16  ;;  %v3609_v41 = vmax.f32 %v3605_v63, 0.0  ;;  %v9255_v16 = vld [vmem:[%s10879_s17] sm:$0xff]  ;;  %v9260_v43 = vld [vmem:[%s10879_s17 + $0xa8] sm:$0xff]  ;;  %v9270_v9 = vld [vmem:[%s10879_s17 + $0x98] sm:$0xff] }
 0x9da   :  { %10880 = vst [vmem:[#allocation122_spill] sm:$0xff] %v9270_v9  ;;  %v9285_v63 = vld [vmem:[%s10879_s17 + $0x80] sm:$0xff] }
 0x9db   :  { %v3607_v25 = vadd.f32 %v9156_v42, %v3592_v17  ;;  %v3610_v39 = vmax.f32 %v3606_v11, 0.0  ;;  %v9275_v17 = vld [vmem:[%s10879_s17 + $0x90] sm:$0xff]  ;;  %v9280_v11 = vld [vmem:[%s10879_s17 + $0x88] sm:$0xff]  ;;  %10883 = vst [vmem:[#allocation125_spill] sm:$0xff] %v9285_v63 }
 0x9dc   :  { %10881 = vst [vmem:[#allocation123_spill] sm:$0xff] %v9275_v17  ;;  %10882 = vst [vmem:[#allocation124_spill] sm:$0xff] %v9280_v11 }
 0x9dd   :  { %v3611_v24 = vmax.f32 %v3607_v25, 0.0  ;;  %v9293_v25 = vld [vmem:[%s10854_s0 + $0xa0] sm:$0xff] }
 0x9de   :  { %3899 = vmatpush2.msra.mxu1 %v9293_v25 }
 0x9df   :  { %6710 = vmatprep.subr.msk.mxu0 %vm3616_vm13, %v3611_v24  ;;  %3900 = vmatprep.subr.mxu1 %v10675_v38 }
 0x9e0   :  { %6711 = vmatpush1.msk.msra.mxu0 %vm3616_vm13, %v3610_v39  ;;  %3901 = vmatpush2.msra.mxu1 %v9298_v56 }
 0x9e1   :  { %3653 = vmatprep.subr.mxu0 %v3609_v41  ;;  %3902 = vmatprep.subr.mxu1 %v10675_v38 }
 0x9e2   :  { %3654 = vmatpush1.msra.mxu0 %v3608_v40 }
 0x9e3   :  { %6712 = vmatmul.mubr.msk.f32.vlgmr.msra.gmra.mxu0 %vm3612_vm14, %v9168_v26  ;;  %6713 = vmatprep.subr.msk.mxu0 %vm3616_vm13, %v3611_v24  ;;  %v9303_v24 = vld [vmem:[%s10854_s0 + $0x90] sm:$0xff] }
 0x9e4   :  { %6714 = vmatpush1.msk.msra.mxu0 %vm3616_vm13, %v3610_v39  ;;  %3761 = vmatprep.mubr.f32.mxu0 %v10675_v38  ;;  %v9308_v39 = vld [vmem:[%s10854_s0 + $0x88] sm:$0xff] }
 0x9e5   :  { %3727 = vmatprep.subr.mxu0 %v3609_v41  ;;  %3903 = vmatpush2.msra.mxu1 %v9303_v24  ;;  %v9313_v41 = vld [vmem:[%s10854_s0 + $0x80] sm:$0xff] }
 0x9e6   :  { %3728 = vmatpush1.msra.mxu0 %v3608_v40  ;;  %3904 = vmatprep.subr.mxu1 %v10675_v38 }
 0x9e7   :  { %6715 = vmatmul.mubr.msk.f32.vlgmr.msra.gmra.mxu0 %vm3612_vm14, %v9176_v34  ;;  %3774 = vmatprep.subr.mxu0 %v10675_v38 }
 0x9e8   :  { %3775 = vmatpush1.msra.mxu0 %v9179_v21  ;;  %3905 = vmatpush2.msra.mxu1 %v9308_v39 }
 0x9e9   :  { %3776 = vmatprep.subr.mxu0 %v10675_v38  ;;  %3906 = vmatprep.subr.mxu1 %v10675_v38 }
 0x9ea   :  { %3777 = vmatpush1.msra.mxu0 %v9185_v52  ;;  %3907 = vmatpush2.msra.mxu1 %v9313_v41 }
 0x9eb   :  { %3778 = vmatprep.subr.mxu0 %v10675_v38  ;;  %4109 = vmatprep.subr.mxu1 %v8563_v45  ;;  %v7243_v45 = vld [vmem:[%s7393_s30] sm:$0xff]  ;;  %s11050_s30 = sld [smem:[#allocation17_spill]] }
 0x9ec   :  { %3779 = vmatpush1.msra.mxu0 %v9190_v57 }
 0x9ed   :  { %3780 = vmatprep.subr.mxu0 %v10675_v38 }
 0x9ee   :  { %3781 = vmatpush1.msra.mxu0 %v9195_v28 }
 0x9ef   :  { %3782 = vmatprep.subr.mxu0 %v10675_v38 }
 0x9f0   :  { %3783 = vmatpush1.msra.mxu0 %v9200_v2 }
 0x9f1   :  { %3784 = vmatprep.subr.mxu0 %v10675_v38 }
 0x9f2   :  { %3785 = vmatpush1.msra.mxu0 %v9205_v12 }
 0x9f3   :  { %3786 = vmatprep.subr.mxu0 %v10675_v38 }
 0x9f4   :  { %3787 = vmatpush1.msra.mxu0 %v9210_v20 }
 0x9f5   :  { %3788 = vmatprep.subr.mxu0 %v10675_v38 }
 0x9f6   :  { %3789 = vmatpush1.msra.mxu0 %v9215_v60 }
 0x9f7   :  { %3790 = vmatprep.subr.mxu0 %v10675_v38 }
 0x9f8   :  { %3791 = vmatpush1.msra.mxu0 %v9220_v23 }
 0x9f9   :  { %3792 = vmatprep.subr.mxu0 %v10675_v38 }
 0x9fa   :  { %3793 = vmatpush1.msra.mxu0 %v9225_v37 }
 0x9fb   :  { %3794 = vmatprep.subr.mxu0 %v10675_v38 }
 0x9fc   :  { %3795 = vmatpush1.msra.mxu0 %v9230_v7 }
 0x9fd   :  { %3796 = vmatprep.subr.mxu0 %v10675_v38 }
 0x9fe   :  { %3797 = vmatpush1.msra.mxu0 %v9235_v27 }
 0x9ff   :  { %3798 = vmatprep.subr.mxu0 %v10675_v38 }
 0xa00   :  { %3799 = vmatpush1.msra.mxu0 %v9240_v14 }
 0xa01   :  { %3800 = vmatprep.subr.mxu0 %v10675_v38 }
 0xa02   :  { %3801 = vmatpush1.msra.mxu0 %v9245_v44 }
 0xa03   :  { %3802 = vmatprep.subr.mxu0 %v10675_v38 }
 0xa04   :  { %3803 = vmatpush1.msra.mxu0 %v9250_v55 }
 0xa05   :  { %3804 = vmatprep.subr.mxu0 %v10675_v38 }
 0xa06   :  { %3805 = vmatpush1.msra.mxu0 %v9255_v16 }
 0xa07   :  { %3826 = vmatprep.subr.mxu0 %v10675_v38 }
 0xa08   :  { %3827 = vmatpush2.msra.mxu0 %v9260_v43 }
 0xa09   :  { %3828 = vmatprep.subr.mxu0 %v10675_v38 }
 0xa0a   :  { %3829 = vmatpush2.msra.mxu0 %v9265_v5 }
 0xa0b   :  { %3830 = vmatprep.subr.mxu0 %v10675_v38 }
 0xa0c   :  { %3831 = vmatpush2.msra.mxu0 %v9270_v9  ;;  %v7244_v9 = vld [vmem:[%s7398_s6 + $0xc0] sm:$0xff] }
 0xa0d   :  { %3832 = vmatprep.subr.mxu0 %v10675_v38 }
 0xa0e   :  { %3833 = vmatpush2.msra.mxu0 %v9275_v17 }
 0xa0f   :  { %3834 = vmatprep.subr.mxu0 %v10675_v38 }
 0xa10   :  { %3835 = vmatpush2.msra.mxu0 %v9280_v11 }
 0xa11   :  { %3836 = vmatprep.subr.mxu0 %v10675_v38 }
 0xa12   :  { %3837 = vmatpush2.msra.mxu0 %v9285_v63 }
 0xa13   :  { %7067 = vmatprep.subr.msk.mxu0 %vm1000_vm3, %v8595_v0 }
 0xaa3   :  { %v3689_v40 = vpop.f32.mrf.mxu0 }
 0xaa5   :  { %v3691_v61 = vpop.f32.mrf.mxu0 }
 0xaa7   :  { %v3763_v4 = vpop.f32.mrf.mxu0 }
 0xaa8   :  { %v3768_v17 = vmax.f32 %v3689_v40, %v3763_v4  ;;  %v7245_v4 = vld [vmem:[%s7398_s6 + $0xb8] sm:$0xff] }
 0xaa9   :  { %v3765_v63 = vpop.f32.mrf.mxu0 }
 0xaaa   :  { %v3769_v11 = vmax.f32 %v3691_v61, %v3765_v63  ;;  %v7247_v61 = vld [vmem:[%s7398_s6 + $0xa8] sm:$0xff] }
 0xaac   :  { %6716 = vmatprep.mubr.msk.f32.mxu0 %vm3770_vm15, %v3769_v11  ;;  %6717 = vmatprep.mubr.msk.f32.mxu1 %vm3770_vm15, %v3769_v11 }
 0xaad   :  { %3839 = vmatmul.mubr.f32.vlgmr.msra.gmra.mxu0 %v3768_v17  ;;  %3909 = vmatmul.mubr.f32.vlgmr.msra.gmra.mxu1 %v3768_v17 }
 0xaae   :  { %7068 = vmatpush3.msk.msra.mxu0 %vm1000_vm3, %v8595_v0  ;;  %7071 = vmatprep.mubr.msk.f32.mxu0 %vm3077_vm12, %v7243_v45  ;;  %v7246_v0 = vld [vmem:[%s7398_s6 + $0xb0] sm:$0xff] }
 0xaaf   :  { %7069 = vmatprep.subr.mxu0 %v8597_v48  ;;  %4110 = vmatpush1.msra.mxu1 %v7244_v9  ;;  %v7249_v9 = vld [vmem:[%s7398_s6 + $0x98] sm:$0xff] }
 0xab0   :  { %7070 = vmatpush3.msra.mxu0 %v8597_v48  ;;  %4111 = vmatprep.subr.mxu1 %v7245_v4  ;;  %v7248_v48 = vld [vmem:[%s7398_s6 + $0xa0] sm:$0xff] }
 0xab1   :  { %7072 = vmatmul.mubr.msk.f32.vlgmr.msra.gmra.mxu0 %vm3077_vm12, %v8602_v1  ;;  %4028 = vmatprep.subr.mxu0 %v8605_v33  ;;  %v7250_v1 = vld [vmem:[%s7398_s6 + $0x90] sm:$0xff]  ;;  %v7251_v33 = vld [vmem:[%s7398_s6 + $0x88] sm:$0xff] }
 0xab2   :  { %4112 = vmatpush1.msra.mxu1 %v7246_v0  ;;  %4029 = vmatpush1.msra.mxu0 %v8608_v22  ;;  %v7252_v22 = vld [vmem:[%s7398_s6 + $0x80] sm:$0xff] }
 0xab3   :  { %4113 = vmatprep.subr.mxu1 %v7247_v61  ;;  %4030 = vmatprep.subr.mxu0 %v8611_v58  ;;  %v7253_v58 = vld [vmem:[%s7398_s6 + $0x78] sm:$0xff]  ;;  %v10889_v4 = vld [vmem:[#allocation21_spill] sm:$0xff] }
 0xab4   :  { %4114 = vmatpush1.msra.mxu1 %v7248_v48  ;;  %4031 = vmatpush1.msra.mxu0 %v8617_v10  ;;  %v7254_v10 = vld [vmem:[%s7398_s6 + $0x70] sm:$0xff]  ;;  %v10890_v0 = vld [vmem:[#allocation33_spill] sm:$0xff] }
 0xab5   :  { %4115 = vmatprep.subr.mxu1 %v7249_v9  ;;  %4032 = vmatprep.subr.mxu0 %v8621_v50  ;;  %v7255_v50 = vld [vmem:[%s7398_s6 + $0x68] sm:$0xff] }
 0xab6   :  { %4116 = vmatpush1.msra.mxu1 %v7250_v1  ;;  %4033 = vmatpush1.msra.mxu0 %v8626_v36  ;;  %v7256_v36 = vld [vmem:[%s7398_s6 + $0x60] sm:$0xff]  ;;  %v10892_v9 = vld [vmem:[#allocation22_spill] sm:$0xff] }
 0xab7   :  { %4117 = vmatprep.subr.mxu1 %v7251_v33  ;;  %4034 = vmatprep.subr.mxu0 %v8630_v59  ;;  %v7257_v59 = vld [vmem:[%s7398_s6 + $0x58] sm:$0xff]  ;;  %v10891_v48 = vld [vmem:[#allocation37_spill] sm:$0xff]  ;;  %v10894_v33 = vld [vmem:[#allocation26_spill] sm:$0xff] }
 0xab8   :  { %4118 = vmatpush1.msra.mxu1 %v7252_v22  ;;  %4035 = vmatpush1.msra.mxu0 %v8634_v6  ;;  %v7258_v6 = vld [vmem:[%s7398_s6 + $0x50] sm:$0xff]  ;;  %v10893_v1 = vld [vmem:[#allocation24_spill] sm:$0xff] }
 0xab9   :  { %4119 = vmatprep.subr.mxu1 %v7253_v58  ;;  %4036 = vmatprep.subr.mxu0 %v8638_v31  ;;  %v7259_v31 = vld [vmem:[%s7398_s6 + $0x48] sm:$0xff]  ;;  %v10896_v58 = vld [vmem:[#allocation28_spill] sm:$0xff] }
 0xaba   :  { %4120 = vmatpush1.msra.mxu1 %v7254_v10  ;;  %4037 = vmatpush1.msra.mxu0 %v8642_v62  ;;  %v7260_v62 = vld [vmem:[%s7398_s6 + $0x40] sm:$0xff]  ;;  %v10895_v22 = vld [vmem:[#allocation38_spill] sm:$0xff]  ;;  %v10897_v10 = vld [vmem:[#allocation39_spill] sm:$0xff] }
 0xabb   :  { %4121 = vmatprep.subr.mxu1 %v7255_v50  ;;  %4038 = vmatprep.subr.mxu0 %v8646_v15  ;;  %v7261_v15 = vld [vmem:[%s7398_s6 + $0x38] sm:$0xff]  ;;  %v10898_v50 = vld [vmem:[#allocation30_spill] sm:$0xff] }
 0xabc   :  { %4122 = vmatpush1.msra.mxu1 %v7256_v36  ;;  %4039 = vmatpush1.msra.mxu0 %v8650_v13  ;;  %v7262_v13 = vld [vmem:[%s7398_s6 + $0x30] sm:$0xff]  ;;  %v10899_v36 = vld [vmem:[#allocation40_spill] sm:$0xff] }
 0xabd   :  { %4123 = vmatprep.subr.mxu1 %v7257_v59  ;;  %4040 = vmatprep.subr.mxu0 %v8654_v47  ;;  %v7263_v47 = vld [vmem:[%s7398_s6 + $0x28] sm:$0xff]  ;;  %v10900_v59 = vld [vmem:[#allocation32_spill] sm:$0xff] }
 0xabe   :  { %4124 = vmatpush1.msra.mxu1 %v7258_v6  ;;  %4041 = vmatpush1.msra.mxu0 %v8658_v54  ;;  %v7264_v54 = vld [vmem:[%s7398_s6 + $0x20] sm:$0xff] }
 0xabf   :  { %4125 = vmatprep.subr.mxu1 %v7259_v31  ;;  %4042 = vmatprep.subr.mxu0 %v8662_v19  ;;  %v7265_v19 = vld [vmem:[%s7398_s6 + $0x18] sm:$0xff]  ;;  %v10901_v6 = vld [vmem:[#allocation41_spill] sm:$0xff]  ;;  %v10902_v31 = vld [vmem:[#allocation34_spill] sm:$0xff] }
 0xac0   :  { %4126 = vmatpush1.msra.mxu1 %v7260_v62  ;;  %4043 = vmatpush1.msra.mxu0 %v8666_v3  ;;  %v7266_v3 = vld [vmem:[%s7398_s6 + $0x10] sm:$0xff]  ;;  %s11051_s6 = sld [smem:[#allocation19_spill]] }
 0xac1   :  { %4127 = vmatprep.subr.mxu1 %v7261_v15  ;;  %4044 = vmatprep.subr.mxu0 %v8670_v29  ;;  %v10884_v29 = vld [vmem:[#allocation23_spill] sm:$0xff]  ;;  %v10903_v62 = vld [vmem:[#allocation42_spill] sm:$0xff] }
 0xac2   :  { %4128 = vmatpush1.msra.mxu1 %v7262_v13  ;;  %4045 = vmatpush1.msra.mxu0 %v8674_v53  ;;  %v10885_v53 = vld [vmem:[#allocation27_spill] sm:$0xff]  ;;  %v10905_v13 = vld [vmem:[#allocation44_spill] sm:$0xff] }
 0xac3   :  { %4129 = vmatprep.subr.mxu1 %v7263_v47  ;;  %4046 = vmatprep.subr.mxu0 %v8678_v32  ;;  %v10886_v32 = vld [vmem:[#allocation36_spill] sm:$0xff]  ;;  %v10904_v15 = vld [vmem:[#allocation43_spill] sm:$0xff]  ;;  %v10906_v47 = vld [vmem:[#allocation45_spill] sm:$0xff] }
 0xac4   :  { %4130 = vmatpush1.msra.mxu1 %v7264_v54  ;;  %4047 = vmatpush1.msra.mxu0 %v8682_v30  ;;  %v10887_v30 = vld [vmem:[#allocation29_spill] sm:$0xff]  ;;  %v10907_v54 = vld [vmem:[#allocation46_spill] sm:$0xff] }
 0xac5   :  { %4131 = vmatprep.subr.mxu1 %v7265_v19  ;;  %4048 = vmatprep.subr.mxu0 %v8686_v51  ;;  %v10888_v51 = vld [vmem:[#allocation31_spill] sm:$0xff] }
 0xac6   :  { %4132 = vmatpush1.msra.mxu1 %v7266_v3  ;;  %4049 = vmatpush1.msra.mxu0 %v8692_v18  ;;  %v10908_v19 = vld [vmem:[#allocation47_spill] sm:$0xff]  ;;  %v10909_v3 = vld [vmem:[#allocation48_spill] sm:$0xff] }
 0xac7   :  { %4133 = vmatprep.subr.mxu1 %v8695_v46  ;;  %4050 = vmatprep.subr.mxu0 %v8700_v49 }
 0xac8   :  { %4134 = vmatpush1.msra.mxu1 %v8703_v8  ;;  %4051 = vmatpush1.msra.mxu0 %v10884_v29  ;;  %v10910_v29 = vld [vmem:[#allocation49_spill] sm:$0xff] }
 0xac9   :  { %4167 = vmatprep.mubr.f32.mxu1 %v10675_v38  ;;  %4281 = vmatprep.subr.mxu1 %v10885_v53  ;;  %v10911_v53 = vld [vmem:[#allocation50_spill] sm:$0xff] }
 0xaca   :  { %4052 = vmatprep.subr.mxu0 %v10886_v32  ;;  %4086 = vmatprep.mubr.f32.mxu0 %v10675_v38  ;;  %v10912_v32 = vld [vmem:[#allocation51_spill] sm:$0xff] }
 0xacb   :  { %4053 = vmatpush1.msra.mxu0 %v10887_v30  ;;  %v10913_v30 = vld [vmem:[#allocation52_spill] sm:$0xff] }
 0xacc   :  { %4193 = vmatprep.subr.mxu0 %v10888_v51  ;;  %v10914_v51 = vld [vmem:[#allocation53_spill] sm:$0xff] }
 0xb6d   :  { %v3840_v18 = vpop.f32.mrf.mxu0  ;;  %v3910_v46 = vpop.f32.mrf.mxu1 }
 0xb6e   :  { %v9382_v17 = vmax.f32 %v3840_v18, %v3910_v46  ;;  %v10915_v18 = vld [vmem:[#allocation54_spill] sm:$0xff]  ;;  %v10916_v46 = vld [vmem:[#allocation55_spill] sm:$0xff] }
 0xb6f   :  { %v3842_v49 = vpop.f32.mrf.mxu0  ;;  %v3912_v8 = vpop.f32.mrf.mxu1 }
 0xb70   :  { %v10917_v49 = vld [vmem:[#allocation56_spill] sm:$0xff]  ;;  %v10918_v8 = vld [vmem:[#allocation57_spill] sm:$0xff] }
 0xb71   :  { %v9384_v11 = vpop.f32.mrf.mxu0 }
 0xb72   :  { %v4016_v40 = vrot.slane %v9384_v11, 1 }
 0xb73   :  { %v9386_v63 = vpop.f32.mrf.mxu0 }
 0xb74   :  { %v4015_v45 = vrot.slane %v9386_v63, 1  ;;  %6723 = vmatmul.mubr.msk.f32.vlgmr.msra.gmra.mxu1 %vm1601_vm9, %v9386_v63 }
 0xb75   :  { %4282 = vmatpush1.msra.mxu1 %v10889_v4  ;;  %4173 = vmatprep.mubr.f32.mxu1 %v10675_v38  ;;  %v10921_v4 = vld [vmem:[#allocation60_spill] sm:$0xff] }
 0xb76   :  { %4283 = vmatprep.subr.mxu1 %v10890_v0  ;;  %v4017_v61 = vsel %vm667_vm2, %v4015_v45, %v4016_v40  ;;  %v10920_v45 = vld [vmem:[#allocation59_spill] sm:$0xff]  ;;  %v10922_v0 = vld [vmem:[#allocation61_spill] sm:$0xff] }
 0xb77   :  { %4284 = vmatpush1.msra.mxu1 %v10891_v48  ;;  %6721 = vmatmul.mubr.msk.f32.vlgmr.msra.gmra.mxu0 %vm1601_vm9, %v4017_v61  ;;  %v10923_v61 = vld [vmem:[#allocation62_spill] sm:$0xff]  ;;  %v10924_v48 = vld [vmem:[#allocation63_spill] sm:$0xff] }
 0xb78   :  { %4194 = vmatpush1.msra.mxu0 %v10892_v9  ;;  %4285 = vmatprep.subr.mxu1 %v10893_v1  ;;  %v10925_v9 = vld [vmem:[#allocation64_spill] sm:$0xff]  ;;  %v10926_v1 = vld [vmem:[#allocation65_spill] sm:$0xff] }
 0xb79   :  { %6724 = vmatmul.mubr.msk.f32.gmra.mxu1 %vm1601_vm9, %v9384_v11  ;;  %4195 = vmatprep.subr.mxu0 %v10894_v33  ;;  %v4268_v33 = vrot.slane %v9386_v63, 3 }
 0xb7a   :  { %4286 = vmatpush1.msra.mxu1 %v10895_v22  ;;  %4196 = vmatpush1.msra.mxu0 %v10896_v58  ;;  %v10927_v22 = vld [vmem:[#allocation66_spill] sm:$0xff]  ;;  %v10928_v58 = vld [vmem:[#allocation67_spill] sm:$0xff] }
 0xb7b   :  { %4287 = vmatprep.subr.mxu1 %v10897_v10  ;;  %4092 = vmatprep.mubr.f32.mxu0 %v10675_v38  ;;  %v10929_v10 = vld [vmem:[#allocation68_spill] sm:$0xff] }
 0xb7c   :  { %4197 = vmatprep.subr.mxu0 %v10898_v50  ;;  %4288 = vmatpush1.msra.mxu1 %v10899_v36  ;;  %v10930_v50 = vld [vmem:[#allocation69_spill] sm:$0xff]  ;;  %v4269_v36 = vrot.slane %v9384_v11, 3 }
 0xb7d   :  { %6722 = vmatmul.mubr.msk.f32.gmra.mxu0 %vm1601_vm9, %v4016_v40  ;;  %4289 = vmatprep.subr.mxu1 %v10900_v59  ;;  %v10919_v40 = vld [vmem:[#allocation58_spill] sm:$0xff] }
 0xb7e   :  { %4198 = vmatpush1.msra.mxu0 %v10901_v6  ;;  %4290 = vmatpush1.msra.mxu1 %v10902_v31  ;;  %v10931_v59 = vld [vmem:[#allocation70_spill] sm:$0xff]  ;;  %v10932_v6 = vld [vmem:[#allocation71_spill] sm:$0xff]  ;;  %v4180_v31 = vrot.slane %v9386_v63, 2 }
 0xb7f   :  { %4199 = vmatprep.subr.mxu0 %v10903_v62  ;;  %4291 = vmatprep.subr.mxu1 %v10904_v15  ;;  %v10933_v62 = vld [vmem:[#allocation75_spill] sm:$0xff]  ;;  %v10934_v15 = vld [vmem:[#allocation76_spill] sm:$0xff] }
 0xb80   :  { %4200 = vmatpush1.msra.mxu0 %v10905_v13  ;;  %4292 = vmatpush1.msra.mxu1 %v10906_v47  ;;  %v10935_v13 = vld [vmem:[#allocation77_spill] sm:$0xff]  ;;  %v4270_v47 = vsel %vm1000_vm3, %v4268_v33, %v4269_v36  ;;  %v10954_v33 = vld [vmem:[#allocation96_spill] sm:$0xff] }
 0xb81   :  { %4201 = vmatprep.subr.mxu0 %v10907_v54  ;;  %4293 = vmatprep.subr.mxu1 %v10908_v19  ;;  %v4181_v54 = vrot.slane %v9384_v11, 2  ;;  %v10936_v19 = vld [vmem:[#allocation78_spill] sm:$0xff] }
 0xb82   :  { %4202 = vmatpush1.msra.mxu0 %v10909_v3  ;;  %4294 = vmatpush1.msra.mxu1 %v10910_v29  ;;  %v10937_v3 = vld [vmem:[#allocation79_spill] sm:$0xff]  ;;  %v10938_v29 = vld [vmem:[#allocation80_spill] sm:$0xff] }
 0xb83   :  { %4203 = vmatprep.subr.mxu0 %v10911_v53  ;;  %4295 = vmatprep.subr.mxu1 %v10912_v32  ;;  %v4182_v53 = vsel %vm881_vm4, %v4180_v31, %v4181_v54  ;;  %v10939_v32 = vld [vmem:[#allocation81_spill] sm:$0xff]  ;;  %vm6028_vm4 = vcmask 582656  }
 0xb84   :  { %4204 = vmatpush1.msra.mxu0 %v10913_v30  ;;  %4296 = vmatpush1.msra.mxu1 %v10914_v51  ;;  %v10940_v30 = vld [vmem:[#allocation82_spill] sm:$0xff]  ;;  %v10941_v51 = vld [vmem:[#allocation83_spill] sm:$0xff]  ;;  %v10961_v31 = vld [vmem:[#allocation101_spill] sm:$0xff] }
 0xb85   :  { %4205 = vmatprep.subr.mxu0 %v10915_v18  ;;  %4297 = vmatprep.subr.mxu1 %v10916_v46  ;;  %v10942_v18 = vld [vmem:[#allocation84_spill] sm:$0xff]  ;;  %v10943_v46 = vld [vmem:[#allocation85_spill] sm:$0xff] }
 0xb86   :  { %4206 = vmatpush1.msra.mxu0 %v10917_v49  ;;  %4298 = vmatpush1.msra.mxu1 %v10918_v8  ;;  %v10944_v49 = vld [vmem:[#allocation86_spill] sm:$0xff]  ;;  %v10945_v8 = vld [vmem:[#allocation87_spill] sm:$0xff] }
 0xb87   :  { %4207 = vmatprep.subr.mxu0 %v10919_v40  ;;  %4299 = vmatprep.subr.mxu1 %v10920_v45  ;;  %v10946_v40 = vld [vmem:[#allocation88_spill] sm:$0xff]  ;;  %v10947_v45 = vld [vmem:[#allocation89_spill] sm:$0xff] }
 0xb88   :  { %4208 = vmatpush1.msra.mxu0 %v10921_v4  ;;  %4300 = vmatpush1.msra.mxu1 %v10922_v0  ;;  %v10948_v4 = vld [vmem:[#allocation90_spill] sm:$0xff]  ;;  %v10949_v0 = vld [vmem:[#allocation91_spill] sm:$0xff] }
 0xb89   :  { %4209 = vmatprep.subr.mxu0 %v10923_v61  ;;  %4301 = vmatprep.subr.mxu1 %v10924_v48  ;;  %v10950_v61 = vld [vmem:[#allocation92_spill] sm:$0xff]  ;;  %v10951_v48 = vld [vmem:[#allocation93_spill] sm:$0xff] }
 0xb8a   :  { %4210 = vmatpush1.msra.mxu0 %v10925_v9  ;;  %4302 = vmatpush1.msra.mxu1 %v10926_v1  ;;  %v10952_v9 = vld [vmem:[#allocation94_spill] sm:$0xff]  ;;  %v10953_v1 = vld [vmem:[#allocation95_spill] sm:$0xff] }
 0xb8b   :  { %4211 = vmatprep.subr.mxu0 %v10927_v22  ;;  %4303 = vmatprep.subr.mxu1 %v10928_v58  ;;  %v10955_v22 = vld [vmem:[#allocation35_spill] sm:$0xff]  ;;  %v10956_v58 = vld [vmem:[#allocation25_spill] sm:$0xff] }
 0xb8c   :  { %4212 = vmatpush1.msra.mxu0 %v10929_v10  ;;  %4304 = vmatpush1.msra.mxu1 %v10930_v50  ;;  %v10957_v10 = vld [vmem:[#allocation97_spill] sm:$0xff]  ;;  %v10958_v50 = vld [vmem:[#allocation98_spill] sm:$0xff] }
 0xb8d   :  { %4213 = vmatprep.subr.mxu0 %v10931_v59  ;;  %4305 = vmatprep.subr.mxu1 %v10932_v6  ;;  %v4356_v59 = vrot.slane %v9386_v63, 4  ;;  %v10960_v6 = vld [vmem:[#allocation100_spill] sm:$0xff]  ;;  %v10965_v63 = vld [vmem:[#allocation105_spill] sm:$0xff] }
 0xb8e   :  { %4214 = vmatpush1.msra.mxu0 %v10933_v62  ;;  %4306 = vmatpush1.msra.mxu1 %v10934_v15  ;;  %v4357_v62 = vrot.slane %v9384_v11, 4  ;;  %v10962_v15 = vld [vmem:[#allocation102_spill] sm:$0xff]  ;;  %v10967_v11 = vld [vmem:[#allocation107_spill] sm:$0xff] }
 0xb8f   :  { %4215 = vmatprep.subr.mxu0 %v10935_v13  ;;  %4339 = vmatprep.mubr.f32.mxu1 %v10675_v38  ;;  %v10963_v13 = vld [vmem:[#allocation103_spill] sm:$0xff] }
 0xb90   :  { %4216 = vmatpush1.msra.mxu0 %v10936_v19  ;;  %6727 = vmatmul.mubr.msk.f32.vlgmr.msra.gmra.mxu1 %vm1601_vm9, %v4270_v47  ;;  %v10964_v47 = vld [vmem:[#allocation104_spill] sm:$0xff]  ;;  %v10966_v19 = vld [vmem:[#allocation106_spill] sm:$0xff] }
 0xb91   :  { %4217 = vmatprep.subr.mxu0 %v10937_v3  ;;  %4251 = vmatprep.mubr.f32.mxu0 %v10675_v38  ;;  %v10968_v3 = vld [vmem:[#allocation108_spill] sm:$0xff] }
 0xb92   :  { %4218 = vmatpush1.msra.mxu0 %v10938_v29  ;;  %4345 = vmatprep.mubr.f32.mxu1 %v10675_v38  ;;  %v10969_v29 = vld [vmem:[#allocation109_spill] sm:$0xff] }
 0xb93   :  { %6725 = vmatmul.mubr.msk.f32.vlgmr.msra.gmra.mxu0 %vm1601_vm9, %v4182_v53  ;;  %4369 = vmatprep.subr.mxu0 %v10939_v32  ;;  %v10970_v53 = vld [vmem:[#allocation110_spill] sm:$0xff]  ;;  %v10971_v32 = vld [vmem:[#allocation111_spill] sm:$0xff] }
 0xb94   :  { %6728 = vmatmul.mubr.msk.f32.gmra.mxu1 %vm1601_vm9, %v4269_v36  ;;  %4370 = vmatpush1.msra.mxu0 %v10940_v30  ;;  %v10959_v36 = vld [vmem:[#allocation99_spill] sm:$0xff]  ;;  %v10972_v30 = vld [vmem:[#allocation112_spill] sm:$0xff] }
 0xb95   :  { %4371 = vmatprep.subr.mxu0 %v10941_v51  ;;  %4257 = vmatprep.mubr.f32.mxu0 %v10675_v38  ;;  %v10973_v51 = vld [vmem:[#allocation113_spill] sm:$0xff] }
 0xb96   :  { %4372 = vmatpush1.msra.mxu0 %v10942_v18  ;;  %4522 = vmatprep.mubr.f32.mxu1 %v10675_v38  ;;  %v10974_v18 = vld [vmem:[#allocation114_spill] sm:$0xff] }
 0xb97   :  { %6726 = vmatmul.mubr.msk.f32.gmra.mxu0 %vm1601_vm9, %v4181_v54  ;;  %4373 = vmatprep.subr.mxu0 %v10943_v46  ;;  %v4358_v54 = vsel %vm574_vm0, %v4356_v59, %v4357_v62  ;;  %v10975_v46 = vld [vmem:[#allocation115_spill] sm:$0xff]  ;;  %vm3915_vm0 = vcmask 651264  }
 0xb98   :  { %4374 = vmatpush1.msra.mxu0 %v10944_v49  ;;  %4427 = vmatprep.mubr.f32.mxu0 %v10675_v38  ;;  %v10976_v49 = vld [vmem:[#allocation116_spill] sm:$0xff] }
 0xb99   :  { %4375 = vmatprep.subr.mxu0 %v10945_v8  ;;  %v10977_v8 = vld [vmem:[#allocation117_spill] sm:$0xff] }
 0xb9a   :  { %4376 = vmatpush1.msra.mxu0 %v10946_v40  ;;  %v10978_v40 = vld [vmem:[#allocation118_spill] sm:$0xff] }
 0xb9b   :  { %4377 = vmatprep.subr.mxu0 %v10947_v45  ;;  %v10979_v45 = vld [vmem:[#allocation119_spill] sm:$0xff] }
 0xb9c   :  { %4378 = vmatpush1.msra.mxu0 %v10948_v4  ;;  %v10980_v4 = vld [vmem:[#allocation120_spill] sm:$0xff] }
 0xb9d   :  { %4379 = vmatprep.subr.mxu0 %v10949_v0  ;;  %v10981_v0 = vld [vmem:[#allocation121_spill] sm:$0xff] }
 0xb9e   :  { %4380 = vmatpush1.msra.mxu0 %v10950_v61 }
 0xb9f   :  { %4381 = vmatprep.subr.mxu0 %v10951_v48 }
 0xba0   :  { %4382 = vmatpush1.msra.mxu0 %v10952_v9 }
 0xba1   :  { %4383 = vmatprep.subr.mxu0 %v10953_v1 }
 0xba2   :  { %4384 = vmatpush1.msra.mxu0 %v10954_v33 }
 0xba3   :  { %4385 = vmatprep.subr.mxu0 %v10955_v22 }
 0xba4   :  { %4386 = vmatpush1.msra.mxu0 %v10956_v58 }
 0xba5   :  { %4387 = vmatprep.subr.mxu0 %v10957_v10 }
 0xba6   :  { %4388 = vmatpush1.msra.mxu0 %v10958_v50 }
 0xba7   :  { %4389 = vmatprep.subr.mxu0 %v10959_v36 }
 0xba8   :  { %4390 = vmatpush1.msra.mxu0 %v10960_v6 }
 0xba9   :  { %4391 = vmatprep.subr.mxu0 %v10961_v31 }
 0xbaa   :  { %4392 = vmatpush1.msra.mxu0 %v10962_v15 }
 0xbab   :  { %4393 = vmatprep.subr.mxu0 %v10963_v13 }
 0xbac   :  { %4394 = vmatpush1.msra.mxu0 %v10964_v47 }
 0xbad   :  { %6729 = vmatmul.mubr.msk.f32.vlgmr.msra.gmra.mxu0 %vm1601_vm9, %v4358_v54  ;;  %4675 = vmatprep.subr.mxu0 %v10675_v38 }
 0xbae   :  { %4433 = vmatprep.mubr.f32.mxu0 %v10675_v38  ;;  %4676 = vmatpush1.msra.mxu0 %v10965_v63 }
 0xbaf   :  { %4677 = vmatprep.subr.mxu0 %v10675_v38 }
 0xbb0   :  { %4678 = vmatpush1.msra.mxu0 %v10966_v19 }
 0xbb1   :  { %6730 = vmatmul.mubr.msk.f32.gmra.mxu0 %vm1601_vm9, %v4357_v62  ;;  %4679 = vmatprep.subr.mxu0 %v10675_v38 }
 0xbb2   :  { %4680 = vmatpush1.msra.mxu0 %v10967_v11 }
 0xbb3   :  { %4681 = vmatprep.subr.mxu0 %v10675_v38 }
 0xbb4   :  { %4682 = vmatpush1.msra.mxu0 %v10968_v3 }
 0xbb5   :  { %4683 = vmatprep.subr.mxu0 %v10675_v38 }
 0xbb6   :  { %4684 = vmatpush1.msra.mxu0 %v10969_v29 }
 0xbb7   :  { %4685 = vmatprep.subr.mxu0 %v10675_v38 }
 0xbb8   :  { %4686 = vmatpush1.msra.mxu0 %v10970_v53 }
 0xbb9   :  { %4687 = vmatprep.subr.mxu0 %v10675_v38 }
 0xbba   :  { %4688 = vmatpush1.msra.mxu0 %v10971_v32 }
 0xbbb   :  { %4689 = vmatprep.subr.mxu0 %v10675_v38 }
 0xbbc   :  { %4690 = vmatpush1.msra.mxu0 %v10972_v30 }
 0xbbd   :  { %4691 = vmatprep.subr.mxu0 %v10675_v38 }
 0xbbe   :  { %4692 = vmatpush1.msra.mxu0 %v10973_v51 }
 0xbbf   :  { %4693 = vmatprep.subr.mxu0 %v10675_v38 }
 0xbc0   :  { %4694 = vmatpush1.msra.mxu0 %v10974_v18 }
 0xbc1   :  { %4695 = vmatprep.subr.mxu0 %v10675_v38 }
 0xbc2   :  { %4696 = vmatpush1.msra.mxu0 %v10975_v46 }
 0xbc3   :  { %4697 = vmatprep.subr.mxu0 %v10675_v38 }
 0xbc4   :  { %4698 = vmatpush1.msra.mxu0 %v10976_v49 }
 0xbc5   :  { %4699 = vmatprep.subr.mxu0 %v10675_v38 }
 0xbc6   :  { %4700 = vmatpush1.msra.mxu0 %v10977_v8 }
 0xbc7   :  { %4701 = vmatprep.subr.mxu0 %v10675_v38 }
 0xbc8   :  { %4702 = vmatpush1.msra.mxu0 %v10978_v40 }
 0xbc9   :  { %4703 = vmatprep.subr.mxu0 %v10675_v38 }
 0xbca   :  { %4704 = vmatpush1.msra.mxu0 %v10979_v45 }
 0xbcb   :  { %4705 = vmatprep.subr.mxu0 %v10675_v38 }
 0xbcc   :  { %4706 = vmatpush1.msra.mxu0 %v10980_v4 }
 0xbcd   :  { %4727 = vmatprep.subr.mxu0 %v10675_v38 }
 0xbce   :  { %4728 = vmatpush2.msra.mxu0 %v10981_v0 }
 0xbcf   :  { %4729 = vmatprep.subr.mxu0 %v10675_v38 }
 0xbd0   :  { %4730 = vmatpush2.msra.mxu0 %v9293_v25 }
 0xbd1   :  { %4731 = vmatprep.subr.mxu0 %v10675_v38 }
 0xbd2   :  { %4732 = vmatpush2.msra.mxu0 %v9298_v56 }
 0xbd3   :  { %4733 = vmatprep.subr.mxu0 %v10675_v38 }
 0xbd4   :  { %4734 = vmatpush2.msra.mxu0 %v9303_v24 }
 0xbd5   :  { %4735 = vmatprep.subr.mxu0 %v10675_v38 }
 0xbd6   :  { %4736 = vmatpush2.msra.mxu0 %v9308_v39 }
 0xbd7   :  { %4737 = vmatprep.subr.mxu0 %v10675_v38 }
 0xbd8   :  { %4738 = vmatpush2.msra.mxu0 %v9313_v41 }
 0xbd9   :  { %7097 = vmatprep.subr.mxu0 %v10675_v38 }
 0xc34   :  { %v4169_v48 = vpop.f32.mrf.mxu1 }
 0xc36   :  { %v4171_v1 = vpop.f32.mrf.mxu1 }
 0xc37   :  { %v4088_v61 = vpop.f32.mrf.mxu0 }
 0xc38   :  { %v4170_v6 = vadd.f32 %v4169_v48, %v4088_v61 }
 0xc39   :  { %v4090_v25 = vpop.f32.mrf.mxu0  ;;  %v4175_v33 = vpop.f32.mrf.mxu1 }
 0xc3a   :  { %v4172_v39 = vadd.f32 %v4171_v1, %v4090_v25  ;;  %v3923_v1 = vmul.f32 %v9382_v17, %v9382_v17 }
 0xc3b   :  { %v4177_v58 = vpop.f32.mrf.mxu1 }
 0xc3d   :  { %v4094_v9 = vpop.f32.mrf.mxu0 }
 0xc3e   :  { %v4176_v59 = vadd.f32 %v4175_v33, %v4094_v9 }
 0xc3f   :  { %v4096_v56 = vpop.f32.mrf.mxu0 }
 0xc40   :  { %v4178_v41 = vadd.f32 %v4177_v58, %v4096_v56  ;;  %v9652_v56 = vld [vmem:[%s10984_s21 + $0x10] sm:$0xff]  ;;  %v3924_v58 = vsel %vm3915_vm0, %v3923_v1, 0.0 }
 0xc50   :  { %v4341_v10 = vpop.f32.mrf.mxu1 }
 0xc52   :  { %v4343_v36 = vpop.f32.mrf.mxu1 }
 0xc53   :  { %v4253_v22 = vpop.f32.mrf.mxu0 }
 0xc54   :  { %v4264_v13 = vadd.f32 %v4253_v22, %v4170_v6  ;;  %v4347_v47 = vpop.f32.mrf.mxu1  ;;  %v9659_v22 = vld [vmem:[%s10984_s21 + $0x8] sm:$0xff] }
 0xc55   :  { %v4255_v24 = vpop.f32.mrf.mxu0 }
 0xc56   :  { %v4265_v62 = vadd.f32 %v4255_v24, %v4172_v39  ;;  %v4349_v29 = vpop.f32.mrf.mxu1  ;;  %v4352_v53 = vadd.f32 %v4341_v10, %v4264_v13  ;;  %v9667_v24 = vld [vmem:[%s10984_s21] sm:$0xff] }
 0xc57   :  { %v4259_v50 = vpop.f32.mrf.mxu0 }
 0xc58   :  { %v4266_v15 = vadd.f32 %v4259_v50, %v4176_v59  ;;  %v4353_v11 = vadd.f32 %v4343_v36, %v4265_v62  ;;  %v3925_v50 = vrot.slane %v3924_v58, 4 }
 0xc59   :  { %v4261_v31 = vpop.f32.mrf.mxu0 }
 0xc5a   :  { %v4267_v63 = vadd.f32 %v4261_v31, %v4178_v41  ;;  %v4354_v3 = vadd.f32 %v4347_v47, %v4266_v15  ;;  %v3926_v36 = vadd.f32 %v3925_v50, %v3924_v58  ;;  %v9798_v50 = vld [vmem:[%s10988_s29 + $0x80] sm:$0xff] }
 0xc5c   :  { %v4355_v18 = vadd.f32 %v4349_v29, %v4267_v63  ;;  %v3927_v39 = vrot.slane %v3926_v36, 2 }
 0xc5e   :  { %v3928_v59 = vadd.f32 %v3927_v39, %v3926_v36  ;;  %v9802_v36 = vld [vmem:[%s10988_s29 + $0x78] sm:$0xff]  ;;  %v9807_v39 = vld [vmem:[%s10988_s29 + $0x70] sm:$0xff] }
 0xc60   :  { %v3929_v6 = vrot.slane %v3928_v59, 1 }
 0xc62   :  { %v3930_v31 = vadd.f32 %v3929_v6, %v3928_v59  ;;  %v9811_v59 = vld [vmem:[%s10988_s29 + $0x68] sm:$0xff]  ;;  %v9815_v6 = vld [vmem:[%s10988_s29 + $0x60] sm:$0xff] }
 0xc6d   :  { %v4429_v54 = vpop.f32.mrf.mxu0 }
 0xc6e   :  { %v4440_v46 = vadd.f32 %v4429_v54, %v4352_v53 }
 0xc6f   :  { %v4431_v19 = vpop.f32.mrf.mxu0 }
 0xc70   :  { %v4441_v30 = vadd.f32 %v4431_v19, %v4353_v11  ;;  %v4444_v0 = vadd.f32 %v4440_v46, %v9159_v35 }
 0xc71   :  { %v4435_v32 = vpop.f32.mrf.mxu0 }
 0xc72   :  { %v4442_v51 = vadd.f32 %v4435_v32, %v4354_v3  ;;  %v4445_v45 = vadd.f32 %v4441_v30, %v9156_v42  ;;  %v4448_v9 = vmax.f32 %v4444_v0, 0.0 }
 0xc73   :  { %v4437_v49 = vpop.f32.mrf.mxu0 }
 0xc74   :  { %v4443_v8 = vadd.f32 %v4437_v49, %v4355_v18  ;;  %v4446_v40 = vadd.f32 %v4442_v51, %v9159_v35  ;;  %v4449_v48 = vmax.f32 %v4445_v45, 0.0  ;;  %v10983_v35 = vld [vmem:[#allocation123_spill] sm:$0xff] }
 0xc76   :  { %v4447_v4 = vadd.f32 %v4443_v8, %v9156_v42  ;;  %v4450_v25 = vmax.f32 %v4446_v40, 0.0  ;;  %v10982_v42 = vld [vmem:[#allocation122_spill] sm:$0xff] }
 0xc78   :  { %v4451_v61 = vmax.f32 %v4447_v4, 0.0 }
 0xc7a   :  { %6731 = vmatprep.subr.msk.mxu1 %vm3616_vm13, %v4451_v61 }
 0xc7b   :  { %6732 = vmatpush1.msk.msra.mxu1 %vm3616_vm13, %v4450_v25 }
 0xc7c   :  { %4488 = vmatprep.subr.mxu1 %v4449_v48 }
 0xc7d   :  { %4489 = vmatpush1.msra.mxu1 %v4448_v9 }
 0xc7e   :  { %6733 = vmatmul.mubr.msk.f32.vlgmr.msra.gmra.mxu1 %vm3612_vm14, %v9168_v26  ;;  %6734 = vmatprep.subr.msk.mxu1 %vm3616_vm13, %v4451_v61  ;;  %v10985_v26 = vld [vmem:[#allocation124_spill] sm:$0xff] }
 0xc7f   :  { %6735 = vmatpush1.msk.msra.mxu1 %vm3616_vm13, %v4450_v25  ;;  %4593 = vmatprep.mubr.f32.mxu1 %v10675_v38  ;;  %v274_v25 = vld [vmem:[%s10987_s25 + $0x8] sm:$0xff] }
 0xc80   :  { %4559 = vmatprep.subr.mxu1 %v4449_v48  ;;  %v273_v48 = vld [vmem:[%s10987_s25] sm:$0xff] }
 0xc81   :  { %4560 = vmatpush1.msra.mxu1 %v4448_v9  ;;  %v9743_v9 = vld [vmem:[%s10988_s29 + $0x138] sm:$0xff] }
 0xc82   :  { %6736 = vmatmul.mubr.msk.f32.vlgmr.msra.gmra.mxu1 %vm3612_vm14, %v9176_v34  ;;  %4605 = vmatprep.subr.mxu1 %v10675_v38  ;;  %v10986_v34 = vld [vmem:[#allocation125_spill] sm:$0xff] }
 0xc83   :  { %4606 = vmatpush1.msra.mxu1 %v9179_v21 }
 0xc84   :  { %4607 = vmatprep.subr.mxu1 %v10675_v38 }
 0xc85   :  { %4608 = vmatpush1.msra.mxu1 %v9185_v52 }
 0xc86   :  { %4609 = vmatprep.subr.mxu1 %v10675_v38 }
 0xc87   :  { %4610 = vmatpush1.msra.mxu1 %v9190_v57 }
 0xc88   :  { %4611 = vmatprep.subr.mxu1 %v10675_v38 }
 0xc89   :  { %4612 = vmatpush1.msra.mxu1 %v9195_v28  ;;  %v3916_v28 = vsel %vm3915_vm0, %v9382_v17, 0.0 }
 0xc8a   :  { %4613 = vmatprep.subr.mxu1 %v10675_v38 }
 0xc8b   :  { %4614 = vmatpush1.msra.mxu1 %v9200_v2 }
 0xc8c   :  { %4615 = vmatprep.subr.mxu1 %v10675_v38 }
 0xc8d   :  { %4616 = vmatpush1.msra.mxu1 %v9205_v12 }
 0xc8e   :  { %4617 = vmatprep.subr.mxu1 %v10675_v38 }
 0xc8f   :  { %4618 = vmatpush1.msra.mxu1 %v9210_v20  ;;  %v3917_v20 = vrot.slane %v3916_v28, 4 }
 0xc90   :  { %4619 = vmatprep.subr.mxu1 %v10675_v38 }
 0xc91   :  { %4620 = vmatpush1.msra.mxu1 %v9215_v60 }
 0xc92   :  { %4621 = vmatprep.subr.mxu1 %v10675_v38 }
 0xc93   :  { %4622 = vmatpush1.msra.mxu1 %v9220_v23  ;;  %v9603_v23 = vld [vmem:[%s10984_s21 + $0x48] sm:$0xff] }
 0xc94   :  { %4623 = vmatprep.subr.mxu1 %v10675_v38 }
 0xc95   :  { %4624 = vmatpush1.msra.mxu1 %v9225_v37  ;;  %v9608_v37 = vld [vmem:[%s10984_s21 + $0x40] sm:$0xff] }
 0xc96   :  { %4625 = vmatprep.subr.mxu1 %v10675_v38 }
 0xc97   :  { %4626 = vmatpush1.msra.mxu1 %v9230_v7  ;;  %v3918_v7 = vadd.f32 %v3917_v20, %v3916_v28  ;;  %v9775_v28 = vld [vmem:[%s10988_s29 + $0xf8] sm:$0xff] }
 0xc98   :  { %4627 = vmatprep.subr.mxu1 %v10675_v38 }
 0xc99   :  { %4628 = vmatpush1.msra.mxu1 %v9235_v27  ;;  %v9615_v27 = vld [vmem:[%s10984_s21 + $0x38] sm:$0xff] }
 0xc9a   :  { %4629 = vmatprep.subr.mxu1 %v10675_v38 }
 0xc9b   :  { %4630 = vmatpush1.msra.mxu1 %v9240_v14  ;;  %v9622_v14 = vld [vmem:[%s10984_s21 + $0x30] sm:$0xff] }
 0xc9c   :  { %4631 = vmatprep.subr.mxu1 %v10675_v38 }
 0xc9d   :  { %4632 = vmatpush1.msra.mxu1 %v9245_v44  ;;  %v3919_v44 = vrot.slane %v3918_v7, 2 }
 0xc9e   :  { %4633 = vmatprep.subr.mxu1 %v10675_v38 }
 0xc9f   :  { %4634 = vmatpush1.msra.mxu1 %v9250_v55  ;;  %v9629_v55 = vld [vmem:[%s10984_s21 + $0x28] sm:$0xff] }
 0xca0   :  { %4635 = vmatprep.subr.mxu1 %v10675_v38 }
 0xca1   :  { %4636 = vmatpush1.msra.mxu1 %v9255_v16  ;;  %v9636_v16 = vld [vmem:[%s10984_s21 + $0x20] sm:$0xff] }
 0xca2   :  { %4657 = vmatprep.subr.mxu1 %v10675_v38 }
 0xca3   :  { %4658 = vmatpush2.msra.mxu1 %v9260_v43  ;;  %v3920_v43 = vadd.f32 %v3919_v44, %v3918_v7 }
 0xca4   :  { %4659 = vmatprep.subr.mxu1 %v10675_v38 }
 0xca5   :  { %4660 = vmatpush2.msra.mxu1 %v9265_v5  ;;  %v9643_v5 = vld [vmem:[%s10984_s21 + $0x18] sm:$0xff]  ;;  %v3921_v33 = vrot.slane %v3920_v43, 1 }
 0xca6   :  { %4661 = vmatprep.subr.mxu1 %v10675_v38 }
 0xca7   :  { %4662 = vmatpush2.msra.mxu1 %v10982_v42  ;;  %v3922_v10 = vadd.f32 %v3921_v33, %v3920_v43  ;;  %v9747_v42 = vld [vmem:[%s10988_s29 + $0x130] sm:$0xff]  ;;  %v5057_v43 = vld [vmem:[%s10989_s3] sm:$0x1] }
 0xca8   :  { %4663 = vmatprep.subr.mxu1 %v10675_v38 }
 0xca9   :  { %4664 = vmatpush2.msra.mxu1 %v10983_v35  ;;  %v9751_v35 = vld [vmem:[%s10988_s29 + $0x128] sm:$0xff] }
 0xcaa   :  { %4665 = vmatprep.subr.mxu1 %v10675_v38 }
 0xcab   :  { %4666 = vmatpush2.msra.mxu1 %v10985_v26  ;;  %v9755_v26 = vld [vmem:[%s10988_s29 + $0x120] sm:$0xff] }
 0xcac   :  { %4667 = vmatprep.subr.mxu1 %v10675_v38 }
 0xcad   :  { %4668 = vmatpush2.msra.mxu1 %v10986_v34  ;;  %v9759_v34 = vld [vmem:[%s10988_s29 + $0x118] sm:$0xff] }
 0xcae   :  { %7074 = vmatprep.subr.mxu1 %v10675_v38 }
 0xd3e   :  { %v4524_v21 = vpop.f32.mrf.mxu1 }
 0xd40   :  { %v4526_v52 = vpop.f32.mrf.mxu1 }
 0xd42   :  { %v4595_v57 = vpop.f32.mrf.mxu1 }
 0xd43   :  { %v4600_v60 = vmax.f32 %v4524_v21, %v4595_v57  ;;  %v9763_v21 = vld [vmem:[%s10988_s29 + $0x110] sm:$0xff]  ;;  %v9771_v57 = vld [vmem:[%s10988_s29 + $0x100] sm:$0xff] }
 0xd44   :  { %v4597_v2 = vpop.f32.mrf.mxu1 }
 0xd45   :  { %v4601_v12 = vmax.f32 %v4526_v52, %v4597_v2  ;;  %v9767_v52 = vld [vmem:[%s10988_s29 + $0x108] sm:$0xff]  ;;  %v9779_v2 = vld [vmem:[%s10988_s29 + $0xf0] sm:$0xff] }
 0xd47   :  { %6737 = vmatprep.mubr.msk.f32.mxu1 %vm3770_vm15, %v4601_v12  ;;  %6738 = vmatprep.mubr.msk.f32.mxu0 %vm3770_vm15, %v4601_v12 }
 0xd48   :  { %4670 = vmatmul.mubr.f32.vlgmr.msra.gmra.mxu1 %v4600_v60  ;;  %4740 = vmatmul.mubr.f32.vlgmr.msra.gmra.mxu0 %v4600_v60 }
 0xd49   :  { %7098 = vmatpush3.msra.mxu0 %v9603_v23  ;;  %7117 = vmatprep.mubr.msk.f32.mxu0 %vm7323_vm10, %v10675_v38 }
 0xd4a   :  { %7099 = vmatprep.subr.mxu0 %v10675_v38  ;;  %7075 = vmatpush3.msra.mxu1 %v9603_v23 }
 0xd4b   :  { %7100 = vmatpush3.msra.mxu0 %v9608_v37  ;;  %7076 = vmatprep.subr.mxu1 %v10675_v38 }
 0xd4c   :  { %7101 = vmatprep.subr.mxu0 %v10675_v38  ;;  %7077 = vmatpush3.msra.mxu1 %v9608_v37 }
 0xd4d   :  { %7102 = vmatpush3.msra.mxu0 %v9615_v27  ;;  %7078 = vmatprep.subr.mxu1 %v10675_v38 }
 0xd4e   :  { %7103 = vmatprep.subr.mxu0 %v10675_v38  ;;  %7079 = vmatpush3.msra.mxu1 %v9615_v27 }
 0xd4f   :  { %7104 = vmatpush3.msra.mxu0 %v9622_v14  ;;  %7080 = vmatprep.subr.mxu1 %v10675_v38 }
 0xd50   :  { %7105 = vmatprep.subr.mxu0 %v10675_v38  ;;  %7081 = vmatpush3.msra.mxu1 %v9622_v14 }
 0xd51   :  { %7106 = vmatpush3.msra.mxu0 %v9629_v55  ;;  %7082 = vmatprep.subr.mxu1 %v10675_v38 }
 0xd52   :  { %7107 = vmatprep.subr.mxu0 %v10675_v38  ;;  %7083 = vmatpush3.msra.mxu1 %v9629_v55 }
 0xd53   :  { %7108 = vmatpush3.msra.mxu0 %v9636_v16  ;;  %7084 = vmatprep.subr.mxu1 %v10675_v38 }
 0xd54   :  { %7109 = vmatprep.subr.mxu0 %v10675_v38  ;;  %7085 = vmatpush3.msra.mxu1 %v9636_v16 }
 0xd55   :  { %7110 = vmatpush3.msra.mxu0 %v9643_v5  ;;  %7086 = vmatprep.subr.mxu1 %v10675_v38 }
 0xd56   :  { %7111 = vmatprep.subr.mxu0 %v10675_v38  ;;  %7087 = vmatpush3.msra.mxu1 %v9643_v5 }
 0xd57   :  { %7112 = vmatpush3.msra.mxu0 %v9652_v56  ;;  %7088 = vmatprep.subr.mxu1 %v10675_v38 }
 0xd58   :  { %7113 = vmatprep.subr.mxu0 %v10675_v38  ;;  %7089 = vmatpush3.msra.mxu1 %v9652_v56 }
 0xd59   :  { %7114 = vmatpush3.msra.mxu0 %v9659_v22  ;;  %7090 = vmatprep.subr.mxu1 %v10675_v38 }
 0xd5a   :  { %7115 = vmatprep.subr.mxu0 %v10675_v38  ;;  %7091 = vmatpush3.msra.mxu1 %v9659_v22 }
 0xd5b   :  { %7116 = vmatpush3.msra.mxu0 %v9667_v24  ;;  %7092 = vmatprep.subr.mxu1 %v10675_v38 }
 0xd5c   :  { %7118 = vmatmul.mubr.msk.f32.vlgmr.msra.gmra.mxu0 %vm1442_vm7, %v3922_v10  ;;  %7143 = vmatprep.subr.mxu0 %v10675_v38  ;;  %v9794_v10 = vld [vmem:[%s10988_s29 + $0x88] sm:$0xff] }
 0xd5d   :  { %7144 = vmatpush3.msra.mxu0 %v9603_v23  ;;  %7163 = vmatprep.mubr.msk.f32.mxu0 %vm7323_vm10, %v10675_v38 }
 0xd5e   :  { %7145 = vmatprep.subr.mxu0 %v10675_v38  ;;  %7093 = vmatpush3.msra.mxu1 %v9667_v24 }
 0xd5f   :  { %7146 = vmatpush3.msra.mxu0 %v9608_v37  ;;  %7094 = vmatprep.mubr.msk.f32.mxu1 %vm7323_vm10, %v10675_v38 }
 0xd60   :  { %7147 = vmatprep.subr.mxu0 %v10675_v38  ;;  %7120 = vmatprep.subr.mxu1 %v10675_v38 }
 0xd61   :  { %7148 = vmatpush3.msra.mxu0 %v9615_v27 }
 0xd62   :  { %7149 = vmatprep.subr.mxu0 %v10675_v38 }
 0xd63   :  { %7150 = vmatpush3.msra.mxu0 %v9622_v14 }
 0xd64   :  { %7151 = vmatprep.subr.mxu0 %v10675_v38 }
 0xd65   :  { %7152 = vmatpush3.msra.mxu0 %v9629_v55 }
 0xd66   :  { %7153 = vmatprep.subr.mxu0 %v10675_v38 }
 0xd67   :  { %7154 = vmatpush3.msra.mxu0 %v9636_v16 }
 0xd68   :  { %7155 = vmatprep.subr.mxu0 %v10675_v38 }
 0xd69   :  { %7156 = vmatpush3.msra.mxu0 %v9643_v5 }
 0xd6a   :  { %7157 = vmatprep.subr.mxu0 %v10675_v38 }
 0xd6b   :  { %7158 = vmatpush3.msra.mxu0 %v9652_v56 }
 0xd6c   :  { %7159 = vmatprep.subr.mxu0 %v10675_v38 }
 0xd6d   :  { %7160 = vmatpush3.msra.mxu0 %v9659_v22 }
 0xd6e   :  { %7161 = vmatprep.subr.mxu0 %v10675_v38 }
 0xd6f   :  { %7162 = vmatpush3.msra.mxu0 %v9667_v24 }
 0xd70   :  { %7164 = vmatmul.mubr.msk.f32.vlgmr.msra.gmra.mxu0 %vm1442_vm7, %v3930_v31  ;;  %5239 = vmatprep.subr.mxu0 %v9743_v9  ;;  %v9819_v31 = vld [vmem:[%s10988_s29 + $0x58] sm:$0xff] }
 0xd71   :  { %5291 = vmatprep.mubr.f32.mxu0 %v10675_v38  ;;  %5240 = vmatpush1.msra.mxu0 %v9747_v42 }
 0xd72   :  { %5241 = vmatprep.subr.mxu0 %v9751_v35 }
 0xd73   :  { %5242 = vmatpush1.msra.mxu0 %v9755_v26 }
 0xd74   :  { %5243 = vmatprep.subr.mxu0 %v9759_v34 }
 0xd75   :  { %5244 = vmatpush1.msra.mxu0 %v9763_v21 }
 0xd76   :  { %5245 = vmatprep.subr.mxu0 %v9767_v52 }
 0xd77   :  { %5246 = vmatpush1.msra.mxu0 %v9771_v57 }
 0xd78   :  { %5247 = vmatprep.subr.mxu0 %v9775_v28 }
 0xd79   :  { %5248 = vmatpush1.msra.mxu0 %v9779_v2 }
 0xe08   :  { %v4671_v41 = vpop.f32.mrf.mxu1  ;;  %v4741_v62 = vpop.f32.mrf.mxu0 }
 0xe09   :  { %v9705_v15 = vmax.f32 %v4671_v41, %v4741_v62  ;;  %v9823_v41 = vld [vmem:[%s10988_s29 + $0x50] sm:$0xff]  ;;  %v9827_v62 = vld [vmem:[%s10988_s29 + $0x48] sm:$0xff] }
 0xe0a   :  { %v4673_v13 = vpop.f32.mrf.mxu1  ;;  %v4743_v47 = vpop.f32.mrf.mxu0 }
 0xe0b   :  { %v4746_v54 = vsel %vm3915_vm0, %v9705_v15, 0.0  ;;  %v4753_v11 = vmul.f32 %v9705_v15, %v9705_v15  ;;  %v9831_v13 = vld [vmem:[%s10988_s29 + $0x40] sm:$0xff]  ;;  %v9837_v47 = vld [vmem:[%s10988_s29 + $0xe8] sm:$0xff] }
 0xe0c   :  { %v4747_v63 = vrot.slane %v4746_v54, 4  ;;  %5249 = vmatprep.subr.mxu0 %v9837_v47 }
 0xe0d   :  { %v4754_v53 = vsel %vm3915_vm0, %v4753_v11, 0.0  ;;  %v9853_v11 = vld [vmem:[%s10988_s29 + $0xd8] sm:$0xff] }
 0xe0e   :  { %v4748_v19 = vadd.f32 %v4747_v63, %v4746_v54  ;;  %v4755_v51 = vrot.slane %v4754_v53, 4  ;;  %v9840_v54 = vld [vmem:[%s10988_s29 + $0x38] sm:$0xff]  ;;  %v9845_v63 = vld [vmem:[%s10988_s29 + $0xe0] sm:$0xff] }
 0xe0f   :  { %5250 = vmatpush1.msra.mxu0 %v9845_v63 }
 0xe10   :  { %v4749_v3 = vrot.slane %v4748_v19, 2  ;;  %v4756_v18 = vadd.f32 %v4755_v51, %v4754_v53  ;;  %5251 = vmatprep.subr.mxu0 %v9853_v11  ;;  %v9864_v53 = vld [vmem:[%s10988_s29 + $0x20] sm:$0xff] }
 0xe11   :  { %10991 = vst [vmem:[#allocation23_spill] sm:$0xff] %v9864_v53  ;;  %v9877_v51 = vld [vmem:[%s10988_s29 + $0xc0] sm:$0xff] }
 0xe12   :  { %v4750_v29 = vadd.f32 %v4749_v3, %v4748_v19  ;;  %v4757_v49 = vrot.slane %v4756_v18, 2  ;;  %v9848_v19 = vld [vmem:[%s10988_s29 + $0x30] sm:$0xff]  ;;  %v9856_v3 = vld [vmem:[%s10988_s29 + $0x28] sm:$0xff] }
 0xe14   :  { %v4751_v32 = vrot.slane %v4750_v29, 1  ;;  %v4758_v40 = vadd.f32 %v4757_v49, %v4756_v18  ;;  %v9880_v18 = vld [vmem:[%s10988_s29 + $0x10] sm:$0xff]  ;;  %v9888_v49 = vld [vmem:[%s10988_s29 + $0x8] sm:$0xff] }
 0xe15   :  { %10993 = vst [vmem:[#allocation36_spill] sm:$0xff] %v9880_v18  ;;  %10994 = vst [vmem:[#allocation29_spill] sm:$0xff] %v9888_v49 }
 0xe16   :  { %v4752_v30 = vadd.f32 %v4751_v32, %v4750_v29  ;;  %v4759_v45 = vrot.slane %v4758_v40, 1  ;;  %v9861_v29 = vld [vmem:[%s10988_s29 + $0xd0] sm:$0xff]  ;;  %v9869_v32 = vld [vmem:[%s10988_s29 + $0xc8] sm:$0xff] }
 0xe17   :  { %5252 = vmatpush1.msra.mxu0 %v9861_v29 }
 0xe18   :  { %7095 = vmatmul.mubr.msk.f32.vlgmr.msra.gmra.mxu1 %vm1442_vm7, %v4752_v30  ;;  %v4760_v4 = vadd.f32 %v4759_v45, %v4758_v40  ;;  %v9872_v30 = vld [vmem:[%s10988_s29 + $0x18] sm:$0xff]  ;;  %5253 = vmatprep.subr.mxu0 %v9869_v32  ;;  %v9896_v40 = vld [vmem:[%s10988_s29] sm:$0xff]  ;;  %v9901_v45 = vld [vmem:[%s10988_s29 + $0xa8] sm:$0xff] }
 0xe19   :  { %7121 = vmatpush3.msra.mxu1 %v9603_v23  ;;  %7140 = vmatprep.mubr.msk.f32.mxu1 %vm7323_vm10, %v10675_v38  ;;  %10992 = vst [vmem:[#allocation27_spill] sm:$0xff] %v9872_v30  ;;  %10995 = vst [vmem:[#allocation31_spill] sm:$0xff] %v9896_v40 }
 0xe1a   :  { %7122 = vmatprep.subr.mxu1 %v10675_v38  ;;  %5254 = vmatpush1.msra.mxu0 %v9877_v51 }
 0xe1b   :  { %7123 = vmatpush3.msra.mxu1 %v9608_v37 }
 0xe1c   :  { %v4903_v46 = vpop.f32.mrf.mxu0  ;;  %7124 = vmatprep.subr.mxu1 %v10675_v38 }
 0xe1d   :  { %7125 = vmatpush3.msra.mxu1 %v9615_v27 }
 0xe1e   :  { %v7119_v8 = vpop.f32.mrf.mxu0  ;;  %7126 = vmatprep.subr.mxu1 %v10675_v38 }
 0xe1f   :  { %7127 = vmatpush3.msra.mxu1 %v9622_v14  ;;  %v9893_v8 = vld [vmem:[%s10988_s29 + $0xb0] sm:$0xff] }
 0xe20   :  { %7128 = vmatprep.subr.mxu1 %v10675_v38 }
 0xe21   :  { %7129 = vmatpush3.msra.mxu1 %v9629_v55 }
 0xe22   :  { %7130 = vmatprep.subr.mxu1 %v10675_v38 }
 0xe23   :  { %7131 = vmatpush3.msra.mxu1 %v9636_v16 }
 0xe24   :  { %7132 = vmatprep.subr.mxu1 %v10675_v38 }
 0xe25   :  { %7133 = vmatpush3.msra.mxu1 %v9643_v5 }
 0xe26   :  { %7134 = vmatprep.subr.mxu1 %v10675_v38 }
 0xe27   :  { %7135 = vmatpush3.msra.mxu1 %v9652_v56  ;;  %v5061_v56 = vld [vmem:[%s10990_s8] sm:$0x1] }
 0xe28   :  { %7136 = vmatprep.subr.mxu1 %v10675_v38 }
 0xe29   :  { %7137 = vmatpush3.msra.mxu1 %v9659_v22  ;;  %v9787_v22 = vld [vmem:[%s10988_s29 + $0x98] sm:$0xff] }
 0xe2a   :  { %7138 = vmatprep.subr.mxu1 %v10675_v38 }
 0xe2b   :  { %7139 = vmatpush3.msra.mxu1 %v9667_v24  ;;  %v9791_v24 = vld [vmem:[%s10988_s29 + $0x90] sm:$0xff] }
 0xe2c   :  { %7141 = vmatmul.mubr.msk.f32.vlgmr.msra.gmra.mxu1 %vm1442_vm7, %v4760_v4  ;;  %7166 = vmatprep.subr.mxu1 %v10675_v38  ;;  %v9904_v4 = vld [vmem:[%s10988_s29 + $0x278] sm:$0xff] }
 0xe2d   :  { %7170 = vmatprep.mubr.msk.f32.mxu1 %vm7323_vm10, %v10675_v38  ;;  %7167 = vmatpush3.msra.mxu1 %v274_v25  ;;  %10996 = vst [vmem:[#allocation21_spill] sm:$0xff] %v9904_v4 }
 0xe2e   :  { %7168 = vmatprep.subr.mxu1 %v10675_v38 }
 0xe2f   :  { %7169 = vmatpush3.msra.mxu1 %v273_v48 }
 0xe30   :  { %v5049_v0 = vpop.f32.mrf.mxu0  ;;  %7173 = vmatprep.subr.mxu1 %v10675_v38 }
 0xe32   :  { %v7165_v61 = vpop.f32.mrf.mxu0 }
 0xe33   :  { %v9913_v61 = vld [vmem:[%s10988_s29 + $0x1d8] sm:$0xff] }
 0xed8   :  { %v4830_v12 = vpop.f32.mrf.mxu1 }
 0xed9   :  { %v4904_v60 = vadd.f32 %v4903_v46, %v4830_v12  ;;  %v9885_v46 = vld [vmem:[%s10988_s29 + $0xb8] sm:$0xff] }
 0xeda   :  { %v7096_v20 = vpop.f32.mrf.mxu1  ;;  %5255 = vmatprep.subr.mxu0 %v9885_v46 }
 0xedb   :  { %v5053_v23 = vmul.f32 0.02, %v4904_v60  ;;  %5256 = vmatpush1.msra.mxu0 %v9893_v8 }
 0xedc   :  { %5257 = vmatprep.subr.mxu0 %v9901_v45 }
 0xedd   :  { %v5055_v14 = vmul.f32 %v5053_v23, %v5053_v23 }
 0xeec   :  { %v4976_v37 = vpop.f32.mrf.mxu1 }
 0xeed   :  { %v5050_v7 = vadd.f32 %v5049_v0, %v4976_v37  ;;  %v9909_v0 = vld [vmem:[%s10988_s29 + $0xa0] sm:$0xff] }
 0xeee   :  { %v7142_v27 = vpop.f32.mrf.mxu1  ;;  %5258 = vmatpush1.msra.mxu0 %v9909_v0 }
 0xeef   :  { %v5054_v44 = vmul.f32 0.02, %v5050_v7  ;;  %5386 = vmatprep.subr.mxu0 %v9913_v61 }
 0xef1   :  { %v5056_v55 = vsub.f32 %v5054_v44, %v5055_v14  ;;  %v9928_v14 = vld [vmem:[%s10988_s29 + $0x270] sm:$0xff]  ;;  %v9931_v44 = vld [vmem:[%s10988_s29 + $0x268] sm:$0xff] }
 0xef2   :  { %10998 = vst [vmem:[#allocation33_spill] sm:$0xff] %v9928_v14  ;;  %10999 = vst [vmem:[#allocation37_spill] sm:$0xff] %v9931_v44 }
 0xef3   :  { %v5058_v16 = vadd.f32 1e-05, %v5056_v55  ;;  %v9936_v55 = vld [vmem:[%s10988_s29 + $0x260] sm:$0xff] }
 0xef4   :  { %11000 = vst [vmem:[#allocation22_spill] sm:$0xff] %v9936_v55 }
 0xef5   :  { %7235 = vrsqrt.f32 %v5058_v16  ;;  %v9941_v16 = vld [vmem:[%s10988_s29 + $0x1d0] sm:$0xff] }
 0xf02   :  { %v7236_v5 = vpop.eup %7235 }
 0xf03   :  { %v5060_v1 = vmul.f32 %v7236_v5, %v5057_v43  ;;  %v9944_v43 = vld [vmem:[%s10988_s29 + $0x258] sm:$0xff]  ;;  %v9949_v5 = vld [vmem:[%s10988_s29 + $0x1c8] sm:$0xff] }
 0xf04   :  { %11001 = vst [vmem:[#allocation24_spill] sm:$0xff] %v9944_v43 }
 0xf05   :  { %v5062_v33 = vmul.f32 %v5060_v1, %v5053_v23  ;;  %7171 = vmatmul.mubr.msk.f32.vlgmr.msra.gmra.mxu1 %vm5064_vm1, %v5060_v1  ;;  %v9952_v1 = vld [vmem:[%s10988_s29 + $0x250] sm:$0xff] }
 0xf06   :  { %7174 = vmatpush3.msra.mxu1 %v274_v25  ;;  %7177 = vmatprep.mubr.msk.f32.mxu1 %vm7323_vm10, %v10675_v38  ;;  %11002 = vst [vmem:[#allocation26_spill] sm:$0xff] %v9952_v1 }
 0xf07   :  { %v5063_v58 = vsub.f32 %v5061_v56, %v5062_v33  ;;  %7175 = vmatprep.subr.mxu1 %v10675_v38  ;;  %v9957_v56 = vld [vmem:[%s10988_s29 + $0x1c0] sm:$0xff]  ;;  %v9960_v33 = vld [vmem:[%s10988_s29 + $0x248] sm:$0xff] }
 0xf08   :  { %7176 = vmatpush3.msra.mxu1 %v273_v48  ;;  %v10997_v48 = vld [vmem:[#allocation73_spill] sm:$0xff]  ;;  %11003 = vst [vmem:[#allocation38_spill] sm:$0xff] %v9960_v33 }
 0xf09   :  { %7178 = vmatmul.mubr.msk.f32.vlgmr.msra.gmra.mxu1 %vm5064_vm1, %v5063_v58  ;;  %5312 = vmatprep.subr.mxu1 %v9787_v22  ;;  %v9965_v58 = vld [vmem:[%s10988_s29 + $0x1b8] sm:$0xff] }
 0xf0a   :  { %5313 = vmatpush1.msra.mxu1 %v9791_v24  ;;  %5364 = vmatprep.mubr.f32.mxu1 %v10675_v38 }
 0xf0b   :  { %5314 = vmatprep.subr.mxu1 %v9794_v10 }
 0xf0c   :  { %5315 = vmatpush1.msra.mxu1 %v9798_v50 }
 0xf0d   :  { %5316 = vmatprep.subr.mxu1 %v9802_v36 }
 0xf0e   :  { %5317 = vmatpush1.msra.mxu1 %v9807_v39 }
 0xf0f   :  { %5318 = vmatprep.subr.mxu1 %v9811_v59 }
 0xf10   :  { %5319 = vmatpush1.msra.mxu1 %v9815_v6 }
 0xf11   :  { %5320 = vmatprep.subr.mxu1 %v9819_v31 }
 0xf12   :  { %5321 = vmatpush1.msra.mxu1 %v9823_v41 }
 0xf13   :  { %5322 = vmatprep.subr.mxu1 %v9827_v62 }
 0xf14   :  { %5323 = vmatpush1.msra.mxu1 %v9831_v13 }
 0xf15   :  { %5324 = vmatprep.subr.mxu1 %v9840_v54 }
 0xf16   :  { %5325 = vmatpush1.msra.mxu1 %v9848_v19 }
 0xf17   :  { %5326 = vmatprep.subr.mxu1 %v9856_v3 }
 0xf18   :  { %5327 = vmatpush1.msra.mxu1 %v9864_v53  ;;  %v10080_v53 = vld [vmem:[%s10988_s29 + $0x140] sm:$0xff] }
 0xf19   :  { %5328 = vmatprep.subr.mxu1 %v9872_v30  ;;  %v10069_v30 = vld [vmem:[%s10988_s29 + $0x150] sm:$0xff]  ;;  %11017 = vst [vmem:[#allocation48_spill] sm:$0xff] %v10080_v53 }
 0xf1a   :  { %5329 = vmatpush1.msra.mxu1 %v9880_v18  ;;  %v10061_v18 = vld [vmem:[%s10988_s29 + $0x158] sm:$0xff] }
 0xf1b   :  { %5330 = vmatprep.subr.mxu1 %v9888_v49  ;;  %v10056_v49 = vld [vmem:[%s10988_s29 + $0x1e8] sm:$0xff] }
 0xf1c   :  { %5331 = vmatpush1.msra.mxu1 %v9896_v40  ;;  %v10048_v40 = vld [vmem:[%s10988_s29 + $0x1f0] sm:$0xff]  ;;  %11015 = vst [vmem:[#allocation46_spill] sm:$0xff] %v10056_v49 }
 0xf1d   :  { %5462 = vmatprep.subr.mxu1 %v9904_v4  ;;  %v10040_v4 = vld [vmem:[%s10988_s29 + $0x1f8] sm:$0xff]  ;;  %11014 = vst [vmem:[#allocation45_spill] sm:$0xff] %v10048_v40 }
 0xf1e   :  { %11013 = vst [vmem:[#allocation44_spill] sm:$0xff] %v10040_v4 }
 0xfc5   :  { %v5134_v25 = vpop.f32.mrf.mxu1 }
 0xfc6   :  { %v9917_v12 = vrot.slane %v5134_v25, %v10997_v48  ;;  %v9968_v25 = vld [vmem:[%s10988_s29 + $0x240] sm:$0xff] }
 0xfc7   :  { %v7172_v20 = vpop.f32.mrf.mxu1  ;;  %11004 = vst [vmem:[#allocation28_spill] sm:$0xff] %v9968_v25 }
 0xfc8   :  { %v5217_v23 = vmul.f32 %v9917_v12, %v9382_v17  ;;  %v9973_v20 = vld [vmem:[%s10988_s29 + $0x1b0] sm:$0xff] }
 0xfc9   :  { %v5207_v60 = vpop.f32.mrf.mxu1 }
 0xfca   :  { %v9922_v37 = vrot.slane %v5207_v60, %v10997_v48  ;;  %v9976_v60 = vld [vmem:[%s10988_s29 + $0x238] sm:$0xff]  ;;  %v9992_v48 = vld [vmem:[%s10988_s29 + $0x228] sm:$0xff] }
 0xfcb   :  { %v7179_v7 = vpop.f32.mrf.mxu1  ;;  %11005 = vst [vmem:[#allocation39_spill] sm:$0xff] %v9976_v60  ;;  %11007 = vst [vmem:[#allocation40_spill] sm:$0xff] %v9992_v48 }
 0xfcc   :  { %v9925_v27 = vadd.f32 %v9922_v37, %v5217_v23  ;;  %v9981_v23 = vld [vmem:[%s10988_s29 + $0x1a8] sm:$0xff]  ;;  %v9984_v7 = vld [vmem:[%s10988_s29 + $0x230] sm:$0xff] }
 0xfcd   :  { %11006 = vst [vmem:[#allocation30_spill] sm:$0xff] %v9984_v7 }
 0xfce   :  { %6746 = vmatmul.mubr.msk.f32.vlgmr.msra.gmra.mxu1 %vm1442_vm7, %v9925_v27  ;;  %v5224_v17 = vrot.slane %v9925_v27, 1 }
 0xfcf   :  { %5463 = vmatpush1.msra.mxu1 %v9928_v14  ;;  %5514 = vmatprep.mubr.f32.mxu1 %v10675_v38  ;;  %v10032_v14 = vld [vmem:[%s10988_s29 + $0x200] sm:$0xff] }
 0xfd0   :  { %5464 = vmatprep.subr.mxu1 %v9931_v44  ;;  %6745 = vmatmul.mubr.msk.f32.vlgmr.msra.gmra.mxu0 %vm1442_vm7, %v5224_v17  ;;  %v9989_v17 = vld [vmem:[%s10988_s29 + $0x1a0] sm:$0xff]  ;;  %v10024_v44 = vld [vmem:[%s10988_s29 + $0x208] sm:$0xff]  ;;  %11012 = vst [vmem:[#allocation43_spill] sm:$0xff] %v10032_v14 }
 0xfd1   :  { %5465 = vmatpush1.msra.mxu1 %v9936_v55  ;;  %5387 = vmatpush1.msra.mxu0 %v9941_v16  ;;  %v10016_v55 = vld [vmem:[%s10988_s29 + $0x210] sm:$0xff]  ;;  %11011 = vst [vmem:[#allocation42_spill] sm:$0xff] %v10024_v44 }
 0xfd2   :  { %5466 = vmatprep.subr.mxu1 %v9944_v43  ;;  %5388 = vmatprep.subr.mxu0 %v9949_v5  ;;  %v10008_v43 = vld [vmem:[%s10988_s29 + $0x218] sm:$0xff]  ;;  %11010 = vst [vmem:[#allocation34_spill] sm:$0xff] %v10016_v55 }
 0xfd3   :  { %5467 = vmatpush1.msra.mxu1 %v9952_v1  ;;  %5389 = vmatpush1.msra.mxu0 %v9957_v56  ;;  %v10000_v1 = vld [vmem:[%s10988_s29 + $0x220] sm:$0xff]  ;;  %11009 = vst [vmem:[#allocation41_spill] sm:$0xff] %v10008_v43 }
 0xfd4   :  { %5468 = vmatprep.subr.mxu1 %v9960_v33  ;;  %5390 = vmatprep.subr.mxu0 %v9965_v58  ;;  %v9997_v33 = vld [vmem:[%s10988_s29 + $0x198] sm:$0xff]  ;;  %11008 = vst [vmem:[#allocation32_spill] sm:$0xff] %v10000_v1 }
 0xfd5   :  { %5469 = vmatpush1.msra.mxu1 %v9968_v25  ;;  %5391 = vmatpush1.msra.mxu0 %v9973_v20  ;;  %v10005_v25 = vld [vmem:[%s10988_s29 + $0x190] sm:$0xff] }
 0xfd6   :  { %5470 = vmatprep.subr.mxu1 %v9976_v60  ;;  %5392 = vmatprep.subr.mxu0 %v9981_v23  ;;  %v10013_v60 = vld [vmem:[%s10988_s29 + $0x188] sm:$0xff] }
 0xfd7   :  { %5471 = vmatpush1.msra.mxu1 %v9984_v7  ;;  %5393 = vmatpush1.msra.mxu0 %v9989_v17  ;;  %v10021_v7 = vld [vmem:[%s10988_s29 + $0x180] sm:$0xff] }
 0xfd8   :  { %5472 = vmatprep.subr.mxu1 %v9992_v48  ;;  %5394 = vmatprep.subr.mxu0 %v9997_v33  ;;  %v10029_v48 = vld [vmem:[%s10988_s29 + $0x178] sm:$0xff] }
 0xfd9   :  { %5473 = vmatpush1.msra.mxu1 %v10000_v1  ;;  %5395 = vmatpush1.msra.mxu0 %v10005_v25  ;;  %v10037_v1 = vld [vmem:[%s10988_s29 + $0x170] sm:$0xff] }
 0xfda   :  { %5474 = vmatprep.subr.mxu1 %v10008_v43  ;;  %5396 = vmatprep.subr.mxu0 %v10013_v60  ;;  %v10045_v43 = vld [vmem:[%s10988_s29 + $0x168] sm:$0xff] }
 0xfdb   :  { %5475 = vmatpush1.msra.mxu1 %v10016_v55  ;;  %5397 = vmatpush1.msra.mxu0 %v10021_v7  ;;  %v10053_v55 = vld [vmem:[%s10988_s29 + $0x160] sm:$0xff] }
 0xfdc   :  { %5476 = vmatprep.subr.mxu1 %v10024_v44  ;;  %5398 = vmatprep.subr.mxu0 %v10029_v48  ;;  %v10064_v44 = vld [vmem:[%s10988_s29 + $0x1e0] sm:$0xff] }
 0xfdd   :  { %5477 = vmatpush1.msra.mxu1 %v10032_v14  ;;  %5399 = vmatpush1.msra.mxu0 %v10037_v1  ;;  %11016 = vst [vmem:[#allocation47_spill] sm:$0xff] %v10064_v44  ;;  %v5447_v14 = vrot.slane %v9925_v27, 3 }
 0xfde   :  { %5478 = vmatprep.subr.mxu1 %v10040_v4  ;;  %5400 = vmatprep.subr.mxu0 %v10045_v43  ;;  %v10075_v4 = vld [vmem:[%s10988_s29 + $0x148] sm:$0xff] }
 0xfdf   :  { %5479 = vmatpush1.msra.mxu1 %v10048_v40  ;;  %5401 = vmatpush1.msra.mxu0 %v10053_v55  ;;  %v10088_v40 = vld [vmem:[%s10988_s29 + $0x318] sm:$0xff] }
 0xfe0   :  { %5480 = vmatprep.subr.mxu1 %v10056_v49  ;;  %5402 = vmatprep.subr.mxu0 %v10061_v18  ;;  %v5371_v49 = vrot.slane %v9925_v27, 2 }
 0xfe1   :  { %5481 = vmatpush1.msra.mxu1 %v10064_v44  ;;  %5403 = vmatpush1.msra.mxu0 %v10069_v30  ;;  %v10093_v44 = vld [vmem:[%s10988_s29 + $0x310] sm:$0xff] }
 0xfe2   :  { %6748 = vmatmul.mubr.msk.f32.vlgmr.msra.gmra.mxu1 %vm1442_vm7, %v5447_v14  ;;  %5404 = vmatprep.subr.mxu0 %v10075_v4  ;;  %v10098_v14 = vld [vmem:[%s10988_s29 + $0x308] sm:$0xff] }
 0xfe3   :  { %5632 = vmatprep.subr.mxu1 %v9743_v9  ;;  %5405 = vmatpush1.msra.mxu0 %v10080_v53  ;;  %v10103_v9 = vld [vmem:[%s10988_s29 + $0x300] sm:$0xff]  ;;  %v10108_v53 = vld [vmem:[%s10988_s29 + $0x2f8] sm:$0xff] }
 0xfe4   :  { %5438 = vmatprep.mubr.f32.mxu0 %v10675_v38  ;;  %5633 = vmatpush1.msra.mxu1 %v9747_v42  ;;  %v10113_v42 = vld [vmem:[%s10988_s29 + $0x2f0] sm:$0xff] }
 0xfe5   :  { %6747 = vmatmul.mubr.msk.f32.vlgmr.msra.gmra.mxu0 %vm1442_vm7, %v5371_v49  ;;  %5538 = vmatprep.subr.mxu0 %v10088_v40  ;;  %v5614_v49 = vmul.f32 %v9917_v12, %v9705_v15  ;;  %v10173_v15 = vld [vmem:[%s10988_s29 + $0x298] sm:$0xff]  ;;  %v10191_v12 = vld [vmem:[%s10988_s29 + $0x280] sm:$0xff] }
 0xfe6   :  { %5634 = vmatprep.subr.mxu1 %v9751_v35  ;;  %5539 = vmatpush1.msra.mxu0 %v10093_v44  ;;  %v10118_v35 = vld [vmem:[%s10988_s29 + $0x2e8] sm:$0xff] }
 0xfe7   :  { %5635 = vmatpush1.msra.mxu1 %v9755_v26  ;;  %5540 = vmatprep.subr.mxu0 %v10098_v14  ;;  %v10123_v26 = vld [vmem:[%s10988_s29 + $0x2e0] sm:$0xff] }
 0xfe8   :  { %5636 = vmatprep.subr.mxu1 %v9759_v34  ;;  %5541 = vmatpush1.msra.mxu0 %v10103_v9  ;;  %v10128_v34 = vld [vmem:[%s10988_s29 + $0x2d8] sm:$0xff] }
 0xfe9   :  { %5637 = vmatpush1.msra.mxu1 %v9763_v21  ;;  %5542 = vmatprep.subr.mxu0 %v10108_v53  ;;  %v10133_v21 = vld [vmem:[%s10988_s29 + $0x2d0] sm:$0xff] }
 0xfea   :  { %5638 = vmatprep.subr.mxu1 %v9767_v52  ;;  %5543 = vmatpush1.msra.mxu0 %v10113_v42  ;;  %v10138_v52 = vld [vmem:[%s10988_s29 + $0x2c8] sm:$0xff] }
 0xfeb   :  { %5639 = vmatpush1.msra.mxu1 %v9771_v57  ;;  %5544 = vmatprep.subr.mxu0 %v10118_v35  ;;  %v10143_v57 = vld [vmem:[%s10988_s29 + $0x2c0] sm:$0xff] }
 0xfec   :  { %5640 = vmatprep.subr.mxu1 %v9775_v28  ;;  %5545 = vmatpush1.msra.mxu0 %v10123_v26  ;;  %v10148_v28 = vld [vmem:[%s10988_s29 + $0x2b8] sm:$0xff] }
 0xfed   :  { %5641 = vmatpush1.msra.mxu1 %v9779_v2  ;;  %5546 = vmatprep.subr.mxu0 %v10128_v34  ;;  %v10153_v2 = vld [vmem:[%s10988_s29 + $0x2b0] sm:$0xff] }
 0xfee   :  { %5642 = vmatprep.subr.mxu1 %v9837_v47  ;;  %5547 = vmatpush1.msra.mxu0 %v10133_v21  ;;  %v10160_v47 = vld [vmem:[%s10988_s29 + $0x2a8] sm:$0xff] }
 0xfef   :  { %5643 = vmatpush1.msra.mxu1 %v9845_v63  ;;  %5548 = vmatprep.subr.mxu0 %v10138_v52  ;;  %v10165_v63 = vld [vmem:[%s10988_s29 + $0x2a0] sm:$0xff] }
 0xff0   :  { %5644 = vmatprep.subr.mxu1 %v9853_v11  ;;  %5549 = vmatpush1.msra.mxu0 %v10143_v57  ;;  %v10168_v11 = vadd.f32 %v5614_v49, %v9922_v37  ;;  %v11042_v37 = vld [vmem:[#allocation45_spill] sm:$0xff] }
 0xff1   :  { %5645 = vmatpush1.msra.mxu1 %v9861_v29  ;;  %5550 = vmatprep.subr.mxu0 %v10148_v28  ;;  %v10178_v29 = vld [vmem:[%s10988_s29 + $0x290] sm:$0xff]  ;;  %v6109_v49 = vld [vmem:[%s11041_s14 + $0x80] sm:$0xff] }
 0xff2   :  { %5646 = vmatprep.subr.mxu1 %v9869_v32  ;;  %5551 = vmatpush1.msra.mxu0 %v10153_v2  ;;  %v10183_v32 = vld [vmem:[%s10988_s29 + $0x288] sm:$0xff] }
 0xff3   :  { %5647 = vmatpush1.msra.mxu1 %v9877_v51  ;;  %5552 = vmatprep.subr.mxu0 %v10160_v47  ;;  %v5617_v51 = vrot.slane %v10168_v11, 1 }
 0xff4   :  { %5648 = vmatprep.subr.mxu1 %v9885_v46  ;;  %5553 = vmatpush1.msra.mxu0 %v10165_v63  ;;  %v5523_v46 = vrot.slane %v9925_v27, 4  ;;  %v11043_v27 = vld [vmem:[#allocation46_spill] sm:$0xff] }
 0xff5   :  { %5649 = vmatpush1.msra.mxu1 %v9893_v8  ;;  %5554 = vmatprep.subr.mxu0 %v10173_v15  ;;  %v11035_v8 = vld [vmem:[#allocation32_spill] sm:$0xff] }
 0xff6   :  { %5650 = vmatprep.subr.mxu1 %v9901_v45  ;;  %5555 = vmatpush1.msra.mxu0 %v10178_v29  ;;  %v11037_v45 = vld [vmem:[#allocation34_spill] sm:$0xff] }
 0xff7   :  { %5651 = vmatpush1.msra.mxu1 %v9909_v0  ;;  %5684 = vmatprep.mubr.f32.mxu1 %v10675_v38  ;;  %v11039_v0 = vld [vmem:[#allocation43_spill] sm:$0xff] }
 0xff8   :  { %5556 = vmatprep.subr.mxu0 %v10183_v32  ;;  %6751 = vmatmul.mubr.msk.f32.vlgmr.msra.gmra.mxu1 %vm1442_vm7, %v5617_v51 }
 0xff9   :  { %5779 = vmatprep.subr.mxu1 %v9913_v61  ;;  %5557 = vmatpush1.msra.mxu0 %v10191_v12  ;;  %v11040_v61 = vld [vmem:[#allocation44_spill] sm:$0xff] }
 0xffa   :  { %5590 = vmatprep.mubr.f32.mxu0 %v10675_v38  ;;  %5780 = vmatpush1.msra.mxu1 %v9941_v16  ;;  %v6108_v16 = vld [vmem:[%s11041_s14 + $0x78] sm:$0xff] }
 0xffb   :  { %6749 = vmatmul.mubr.msk.f32.vlgmr.msra.gmra.mxu0 %vm1442_vm7, %v5523_v46  ;;  %5705 = vmatprep.subr.mxu0 %v9787_v22  ;;  %v11018_v22 = vld [vmem:[#allocation23_spill] sm:$0xff] }
 0xffc   :  { %5781 = vmatprep.subr.mxu1 %v9949_v5  ;;  %5706 = vmatpush1.msra.mxu0 %v9791_v24  ;;  %v11019_v24 = vld [vmem:[#allocation27_spill] sm:$0xff]  ;;  %v6106_v5 = vld [vmem:[%s11041_s14 + $0x68] sm:$0xff] }
 0xffd   :  { %5782 = vmatpush1.msra.mxu1 %v9957_v56  ;;  %5707 = vmatprep.subr.mxu0 %v9794_v10  ;;  %v5764_v10 = vrot.slane %v10168_v11, 2  ;;  %v6104_v56 = vld [vmem:[%s11041_s14 + $0x58] sm:$0xff] }
 0xffe   :  { %5783 = vmatprep.subr.mxu1 %v9965_v58  ;;  %5708 = vmatpush1.msra.mxu0 %v9798_v50  ;;  %v11020_v50 = vld [vmem:[#allocation36_spill] sm:$0xff]  ;;  %v6102_v58 = vld [vmem:[%s11041_s14 + $0x48] sm:$0xff] }
 0xfff   :  { %5784 = vmatpush1.msra.mxu1 %v9973_v20  ;;  %5709 = vmatprep.subr.mxu0 %v9802_v36  ;;  %v11021_v36 = vld [vmem:[#allocation48_spill] sm:$0xff] }
0x1000   :  { %5785 = vmatprep.subr.mxu1 %v9981_v23  ;;  %5710 = vmatpush1.msra.mxu0 %v9807_v39  ;;  %v11022_v39 = vld [vmem:[#allocation29_spill] sm:$0xff]  ;;  %v6100_v20 = vld [vmem:[%s11041_s14 + $0x38] sm:$0xff] }
0x1001   :  { %5786 = vmatpush1.msra.mxu1 %v9989_v17  ;;  %5711 = vmatprep.subr.mxu0 %v9811_v59  ;;  %v11023_v59 = vld [vmem:[#allocation31_spill] sm:$0xff]  ;;  %v6098_v23 = vld [vmem:[%s11041_s14 + $0x28] sm:$0xff] }
0x1002   :  { %5787 = vmatprep.subr.mxu1 %v9997_v33  ;;  %5712 = vmatpush1.msra.mxu0 %v9815_v6  ;;  %v11024_v6 = vld [vmem:[#allocation21_spill] sm:$0xff]  ;;  %v6103_v33 = vld [vmem:[%s11041_s14 + $0x50] sm:$0xff]  ;;  %v6096_v17 = vld [vmem:[%s11041_s14 + $0x18] sm:$0xff] }
0x1003   :  { %5788 = vmatpush1.msra.mxu1 %v10005_v25  ;;  %5713 = vmatprep.subr.mxu0 %v9819_v31  ;;  %v11025_v31 = vld [vmem:[#allocation33_spill] sm:$0xff] }
0x1004   :  { %5789 = vmatprep.subr.mxu1 %v10013_v60  ;;  %5714 = vmatpush1.msra.mxu0 %v9823_v41  ;;  %v11026_v41 = vld [vmem:[#allocation37_spill] sm:$0xff]  ;;  %v6099_v60 = vld [vmem:[%s11041_s14 + $0x30] sm:$0xff] }
0x1005   :  { %5790 = vmatpush1.msra.mxu1 %v10021_v7  ;;  %5715 = vmatprep.subr.mxu0 %v9827_v62  ;;  %v11027_v62 = vld [vmem:[#allocation22_spill] sm:$0xff]  ;;  %v6101_v25 = vld [vmem:[%s11041_s14 + $0x40] sm:$0xff] }
0x1006   :  { %5791 = vmatprep.subr.mxu1 %v10029_v48  ;;  %5716 = vmatpush1.msra.mxu0 %v9831_v13  ;;  %v11028_v13 = vld [vmem:[#allocation24_spill] sm:$0xff]  ;;  %v5916_v48 = vrot.slane %v10168_v11, 4 }
0x1007   :  { %5792 = vmatpush1.msra.mxu1 %v10037_v1  ;;  %5717 = vmatprep.subr.mxu0 %v9840_v54  ;;  %v11029_v54 = vld [vmem:[#allocation26_spill] sm:$0xff]  ;;  %v6105_v1 = vld [vmem:[%s11041_s14 + $0x60] sm:$0xff] }
0x1008   :  { %5793 = vmatprep.subr.mxu1 %v10045_v43  ;;  %5718 = vmatpush1.msra.mxu0 %v9848_v19  ;;  %v11030_v19 = vld [vmem:[#allocation38_spill] sm:$0xff]  ;;  %v6097_v7 = vld [vmem:[%s11041_s14 + $0x20] sm:$0xff] }
0x1009   :  { %5794 = vmatpush1.msra.mxu1 %v10053_v55  ;;  %5719 = vmatprep.subr.mxu0 %v9856_v3  ;;  %v11031_v3 = vld [vmem:[#allocation28_spill] sm:$0xff]  ;;  %v5840_v55 = vrot.slane %v10168_v11, 3  ;;  %v6107_v43 = vld [vmem:[%s11041_s14 + $0x70] sm:$0xff] }
0x100a   :  { %5795 = vmatprep.subr.mxu1 %v10061_v18  ;;  %5720 = vmatpush1.msra.mxu0 %v11018_v22  ;;  %v11034_v18 = vld [vmem:[#allocation40_spill] sm:$0xff] }
0x100b   :  { %5796 = vmatpush1.msra.mxu1 %v10069_v30  ;;  %5721 = vmatprep.subr.mxu0 %v11019_v24  ;;  %v11033_v30 = vld [vmem:[#allocation30_spill] sm:$0xff] }
0x100c   :  { %5797 = vmatprep.subr.mxu1 %v10075_v4  ;;  %5722 = vmatpush1.msra.mxu0 %v11020_v50  ;;  %v11038_v4 = vld [vmem:[#allocation42_spill] sm:$0xff] }
0x100d   :  { %5798 = vmatpush1.msra.mxu1 %v11021_v36  ;;  %5831 = vmatprep.mubr.f32.mxu1 %v10675_v38 }
0x100e   :  { %5723 = vmatprep.subr.mxu0 %v11022_v39  ;;  %6753 = vmatmul.mubr.msk.f32.vlgmr.msra.gmra.mxu1 %vm1442_vm7, %v5764_v10 }
0x100f   :  { %5931 = vmatprep.subr.mxu1 %v10088_v40  ;;  %5724 = vmatpush1.msra.mxu0 %v11023_v59  ;;  %v11036_v40 = vld [vmem:[#allocation41_spill] sm:$0xff] }
0x1010   :  { %5757 = vmatprep.mubr.f32.mxu0 %v10675_v38  ;;  %5932 = vmatpush1.msra.mxu1 %v10093_v44  ;;  %v11044_v44 = vld [vmem:[#allocation47_spill] sm:$0xff] }
0x1011   :  { %6752 = vmatmul.mubr.msk.f32.vlgmr.msra.gmra.mxu0 %vm1442_vm7, %v10168_v11  ;;  %5855 = vmatprep.subr.mxu0 %v11024_v6 }
0x1012   :  { %5933 = vmatprep.subr.mxu1 %v10098_v14  ;;  %5856 = vmatpush1.msra.mxu0 %v11025_v31  ;;  %v6095_v14 = vld [vmem:[%s11041_s14 + $0x10] sm:$0xff] }
0x1013   :  { %5934 = vmatpush1.msra.mxu1 %v10103_v9  ;;  %5857 = vmatprep.subr.mxu0 %v11026_v41  ;;  %v6094_v9 = vld [vmem:[%s11041_s14 + $0x8] sm:$0xff] }
0x1014   :  { %5935 = vmatprep.subr.mxu1 %v10108_v53  ;;  %5858 = vmatpush1.msra.mxu0 %v11027_v62  ;;  %v11032_v53 = vld [vmem:[#allocation39_spill] sm:$0xff] }
0x1015   :  { %5936 = vmatpush1.msra.mxu1 %v10113_v42  ;;  %5859 = vmatprep.subr.mxu0 %v11028_v13  ;;  %v6093_v42 = vld [vmem:[%s11041_s14] sm:$0xff] }
0x1016   :  { %5937 = vmatprep.subr.mxu1 %v10118_v35  ;;  %5860 = vmatpush1.msra.mxu0 %v11029_v54  ;;  %v6117_v35 = vld [vmem:[%s11041_s14 + $0xc0] sm:$0xff] }
0x1017   :  { %5938 = vmatpush1.msra.mxu1 %v10123_v26  ;;  %5861 = vmatprep.subr.mxu0 %v11030_v19  ;;  %v6116_v26 = vld [vmem:[%s11041_s14 + $0xb8] sm:$0xff] }
0x1018   :  { %5939 = vmatprep.subr.mxu1 %v10128_v34  ;;  %5862 = vmatpush1.msra.mxu0 %v11031_v3  ;;  %v6115_v34 = vld [vmem:[%s11041_s14 + $0xb0] sm:$0xff] }
0x1019   :  { %5940 = vmatpush1.msra.mxu1 %v10133_v21  ;;  %5863 = vmatprep.subr.mxu0 %v11032_v53  ;;  %v6114_v21 = vld [vmem:[%s11041_s14 + $0xa8] sm:$0xff] }
0x101a   :  { %5941 = vmatprep.subr.mxu1 %v10138_v52  ;;  %5864 = vmatpush1.msra.mxu0 %v11033_v30  ;;  %v6113_v52 = vld [vmem:[%s11041_s14 + $0xa0] sm:$0xff] }
0x101b   :  { %5942 = vmatpush1.msra.mxu1 %v10143_v57  ;;  %5865 = vmatprep.subr.mxu0 %v11034_v18  ;;  %v6112_v57 = vld [vmem:[%s11041_s14 + $0x98] sm:$0xff] }
0x101c   :  { %5943 = vmatprep.subr.mxu1 %v10148_v28  ;;  %5866 = vmatpush1.msra.mxu0 %v11035_v8  ;;  %v6111_v28 = vld [vmem:[%s11041_s14 + $0x90] sm:$0xff]  ;;  %v11046_v18 = vld [vmem:[#allocation72_spill] sm:$0xff] }
0x101d   :  { %5944 = vmatpush1.msra.mxu1 %v10153_v2  ;;  %5867 = vmatprep.subr.mxu0 %v11036_v40  ;;  %v6110_v2 = vld [vmem:[%s11041_s14 + $0x88] sm:$0xff]  ;;  %vm5599_vm2 = vcmp.eq.s32.totalorder %v11046_v18, 0  ;;  %vm5992_vm3 = vcmp.eq.s32.totalorder %v11046_v18, 1 }
0x101e   :  { %5945 = vmatprep.subr.mxu1 %v10160_v47  ;;  %5868 = vmatpush1.msra.mxu0 %v11037_v45 }
0x101f   :  { %5946 = vmatpush1.msra.mxu1 %v10165_v63  ;;  %5869 = vmatprep.subr.mxu0 %v11038_v4 }
0x1020   :  { %5947 = vmatprep.subr.mxu1 %v10173_v15  ;;  %5870 = vmatpush1.msra.mxu0 %v11039_v0 }
0x1021   :  { %5948 = vmatpush1.msra.mxu1 %v10178_v29  ;;  %5871 = vmatprep.subr.mxu0 %v11040_v61 }
0x1022   :  { %5949 = vmatprep.subr.mxu1 %v10183_v32  ;;  %5872 = vmatpush1.msra.mxu0 %v11042_v37 }
0x1023   :  { %5950 = vmatpush1.msra.mxu1 %v10191_v12  ;;  %5983 = vmatprep.mubr.f32.mxu1 %v10675_v38 }
0x1024   :  { %5873 = vmatprep.subr.mxu0 %v11043_v27  ;;  %6755 = vmatmul.mubr.msk.f32.vlgmr.msra.gmra.mxu1 %vm1442_vm7, %v5916_v48  ;;  %v11047_v48 = vld [vmem:[#allocation73_spill] sm:$0xff] }
0x1025   :  { %5874 = vmatpush1.msra.mxu0 %v11044_v44  ;;  %5907 = vmatprep.mubr.f32.mxu0 %v10675_v38 }
0x1026   :  { %6129 = vmatprep.subr.mxu0 %v10675_v38  ;;  %6754 = vmatmul.mubr.msk.f32.vlgmr.msra.gmra.mxu0 %vm1442_vm7, %v5840_v55  ;;  %v6750_v55 = vsel %vm5599_vm2, 1.0, %v10675_v38  ;;  %vm6251_vm7 = vcmask 408576  }
0x1027   :  { %7180 = vmatprep.subr.mxu1 %v10675_v38  ;;  %7194 = vmatprep.mubr.msk.f32.mxu1 %vm7323_vm10, %v10675_v38 }
0x1028   :  { %6130 = vmatpush1.msra.mxu0 %v6108_v16  ;;  %v6756_v16 = vsel %vm5992_vm3, 1.0, %v10675_v38 }
0x1029   :  { %6131 = vmatprep.subr.mxu0 %v10675_v38 }
0x102a   :  { %6132 = vmatpush1.msra.mxu0 %v6107_v43  ;;  %v6007_v43 = vld [vmem:[%s11045_s19] sm:$0x3] }
0x102b   :  { %6133 = vmatprep.subr.mxu0 %v10675_v38 }
0x102c   :  { %6134 = vmatpush1.msra.mxu0 %v6106_v5 }
0x102d   :  { %6135 = vmatprep.subr.mxu0 %v10675_v38 }
0x102e   :  { %6136 = vmatpush1.msra.mxu0 %v6105_v1 }
0x102f   :  { %6137 = vmatprep.subr.mxu0 %v10675_v38 }
0x1030   :  { %6138 = vmatpush1.msra.mxu0 %v6104_v56 }
0x1031   :  { %6139 = vmatprep.subr.mxu0 %v10675_v38 }
0x1032   :  { %6140 = vmatpush1.msra.mxu0 %v6103_v33 }
0x1033   :  { %6141 = vmatprep.subr.mxu0 %v10675_v38 }
0x1034   :  { %6142 = vmatpush1.msra.mxu0 %v6102_v58 }
0x1035   :  { %6143 = vmatprep.subr.mxu0 %v10675_v38 }
0x1036   :  { %6144 = vmatpush1.msra.mxu0 %v6101_v25 }
0x1037   :  { %6145 = vmatprep.subr.mxu0 %v10675_v38 }
0x1038   :  { %6146 = vmatpush1.msra.mxu0 %v6100_v20  ;;  %v6012_v20 = vrot.slane %v6007_v43, %v11047_v48 }
0x1039   :  { %6147 = vmatprep.subr.mxu0 %v10675_v38 }
0x103a   :  { %6148 = vmatpush1.msra.mxu0 %v6099_v60 }
0x103b   :  { %6149 = vmatprep.subr.mxu0 %v10675_v38 }
0x103c   :  { %6150 = vmatpush1.msra.mxu0 %v6098_v23 }
0x103d   :  { %6151 = vmatprep.subr.mxu0 %v10675_v38 }
0x103e   :  { %6152 = vmatpush1.msra.mxu0 %v6097_v7 }
0x103f   :  { %6153 = vmatprep.subr.mxu0 %v10675_v38 }
0x1040   :  { %6154 = vmatpush1.msra.mxu0 %v6096_v17 }
0x1041   :  { %6155 = vmatprep.subr.mxu0 %v10675_v38 }
0x1042   :  { %6156 = vmatpush1.msra.mxu0 %v6095_v14  ;;  %v11048_v14 = vld [vmem:[#allocation74_spill] sm:$0xff] }
0x1043   :  { %6157 = vmatprep.subr.mxu0 %v10675_v38 }
0x1044   :  { %6158 = vmatpush1.msra.mxu0 %v6094_v9  ;;  %v6016_v9 = vrot.slane %v6007_v43, %v11048_v14 }
0x1045   :  { %6159 = vmatprep.subr.mxu0 %v10675_v38 }
0x1046   :  { %6160 = vmatpush1.msra.mxu0 %v6093_v42 }
0x1047   :  { %6175 = vmatprep.subr.mxu0 %v10675_v38 }
0x1048   :  { %6176 = vmatpush2.msra.mxu0 %v6117_v35 }
0x1049   :  { %6177 = vmatprep.subr.mxu0 %v10675_v38 }
0x104a   :  { %6178 = vmatpush2.msra.mxu0 %v6116_v26 }
0x104b   :  { %6179 = vmatprep.subr.mxu0 %v10675_v38 }
0x104c   :  { %6180 = vmatpush2.msra.mxu0 %v6115_v34 }
0x104d   :  { %6181 = vmatprep.subr.mxu0 %v10675_v38 }
0x104e   :  { %6182 = vmatpush2.msra.mxu0 %v6114_v21 }
0x104f   :  { %6183 = vmatprep.subr.mxu0 %v10675_v38 }
0x1050   :  { %6184 = vmatpush2.msra.mxu0 %v6113_v52 }
0x1051   :  { %6185 = vmatprep.subr.mxu0 %v10675_v38 }
0x1052   :  { %6186 = vmatpush2.msra.mxu0 %v6112_v57 }
0x1053   :  { %6187 = vmatprep.subr.mxu0 %v10675_v38 }
0x1054   :  { %6188 = vmatpush2.msra.mxu0 %v6111_v28 }
0x1055   :  { %6189 = vmatprep.subr.mxu0 %v10675_v38 }
0x1056   :  { %6190 = vmatpush2.msra.mxu0 %v6110_v2 }
0x1057   :  { %6191 = vmatprep.subr.mxu0 %v10675_v38 }
0x1058   :  { %6192 = vmatpush2.msra.mxu0 %v6109_v49 }
0x108e   :  { %v5366_v63 = vpop.f32.mrf.mxu1 }
0x1090   :  { %v5293_v47 = vpop.f32.mrf.mxu0  ;;  %v5368_v29 = vpop.f32.mrf.mxu1 }
0x1091   :  { %v5367_v50 = vadd.f32 %v5366_v63, %v5293_v47 }
0x1092   :  { %v5295_v11 = vpop.f32.mrf.mxu0 }
0x1093   :  { %v5369_v39 = vadd.f32 %v5368_v29, %v5295_v11 }
0x10a2   :  { %v5516_v32 = vpop.f32.mrf.mxu1 }
0x10a4   :  { %v5518_v46 = vpop.f32.mrf.mxu1 }
0x10a5   :  { %v5440_v15 = vpop.f32.mrf.mxu0 }
0x10a6   :  { %v5445_v59 = vadd.f32 %v5440_v15, %v5367_v50 }
0x10a7   :  { %v5442_v51 = vpop.f32.mrf.mxu0 }
0x10a8   :  { %v5446_v41 = vadd.f32 %v5442_v51, %v5369_v39  ;;  %v5521_v13 = vadd.f32 %v5516_v32, %v5445_v59 }
0x10aa   :  { %v5522_v53 = vadd.f32 %v5518_v46, %v5446_v41 }
0x10b8   :  { %v5686_v22 = vpop.f32.mrf.mxu1 }
0x10ba   :  { %v5688_v36 = vpop.f32.mrf.mxu1 }
0x10bb   :  { %v5592_v12 = vpop.f32.mrf.mxu0 }
0x10bc   :  { %v5597_v3 = vadd.f32 %v5592_v12, %v5521_v13 }
0x10bd   :  { %v5594_v24 = vpop.f32.mrf.mxu0 }
0x10be   :  { %v5598_v45 = vadd.f32 %v5594_v24, %v5522_v53  ;;  %v5605_v37 = vrot.slane %v5597_v3, %v11047_v48 }
0x10c0   :  { %v5609_v1 = vrot.slane %v5598_v45, %v11047_v48  ;;  %v5610_v58 = vmul.f32 %v6750_v55, %v5605_v37 }
0x10c2   :  { %v5611_v23 = vmul.f32 %v6750_v55, %v5609_v1 }
0x10ce   :  { %v5833_v6 = vpop.f32.mrf.mxu1 }
0x10d0   :  { %v5835_v19 = vpop.f32.mrf.mxu1 }
0x10d1   :  { %v5759_v10 = vpop.f32.mrf.mxu0 }
0x10d2   :  { %v5760_v62 = vadd.f32 %v5759_v10, %v5686_v22 }
0x10d3   :  { %v5761_v31 = vpop.f32.mrf.mxu0 }
0x10d4   :  { %v5762_v54 = vadd.f32 %v5761_v31, %v5688_v36  ;;  %v5838_v30 = vadd.f32 %v5833_v6, %v5760_v62 }
0x10d6   :  { %v5839_v0 = vadd.f32 %v5835_v19, %v5762_v54 }
0x10e4   :  { %v5985_v8 = vpop.f32.mrf.mxu1 }
0x10e6   :  { %v5909_v40 = vpop.f32.mrf.mxu0  ;;  %v5987_v5 = vpop.f32.mrf.mxu1 }
0x10e7   :  { %v5914_v4 = vadd.f32 %v5909_v40, %v5838_v30 }
0x10e8   :  { %v5911_v61 = vpop.f32.mrf.mxu0 }
0x10e9   :  { %v5990_v27 = vadd.f32 %v5985_v8, %v5914_v4  ;;  %v5915_v44 = vadd.f32 %v5911_v61, %v5839_v0  ;;  %v6065_v0 = vld [vmem:[%s11049_s24] sm:$0x3] }
0x10ea   :  { %v6070_v37 = vrot.slane %v6065_v0, %v11047_v48 }
0x10eb   :  { %v5998_v56 = vrot.slane %v5990_v27, %v11047_v48  ;;  %v5991_v33 = vadd.f32 %v5987_v5, %v5915_v44  ;;  %v6074_v27 = vrot.slane %v6065_v0, %v11048_v14  ;;  %v6079_v44 = vld [vmem:[%s11050_s30] sm:$0x3] }
0x10ec   :  { %v6088_v5 = vrot.slane %v6079_v44, %v11048_v14  ;;  %v6237_v14 = vld [vmem:[%s7488_s20] sm:$0xff] }
0x10ed   :  { %v6003_v25 = vmul.f32 %v6756_v16, %v5998_v56  ;;  %v6002_v60 = vrot.slane %v5991_v33, %v11047_v48  ;;  %v6084_v56 = vrot.slane %v6079_v44, %v11047_v48  ;;  %v6241_v48 = vld [vmem:[%s7488_s20 + $0x20] sm:$0xff] }
0x10ef   :  { %v6005_v7 = vadd.f32 %v6003_v25, %v5610_v58  ;;  %v6004_v17 = vmul.f32 %v6756_v16, %v6002_v60  ;;  %v6242_v60 = vld [vmem:[%s7488_s20 + $0x28] sm:$0xff] }
0x10f1   :  { %v6019_v42 = vadd.f32 %v6012_v20, %v6005_v7  ;;  %v6006_v35 = vadd.f32 %v6004_v17, %v5611_v23  ;;  %v6243_v20 = vld [vmem:[%s7488_s20 + $0x30] sm:$0x3]  ;;  %v6240_v23 = vld [vmem:[%s7488_s20 + $0x18] sm:$0xff]  ;;  %v6238_v17 = vld [vmem:[%s7488_s20 + $0x8] sm:$0xff] }
0x10f2   :  { %7181 = vmatpush3.msk.msra.mxu1 %vm1271_vm5, %v6243_v20  ;;  %v6239_v7 = vld [vmem:[%s7488_s20 + $0x10] sm:$0xff]  ;;  %s7324_s20 = smov [#allocation2]  }
0x10f3   :  { %v6021_v26 = vsel %vm1271_vm5, %v6019_v42, 0.0  ;;  %v6020_v34 = vadd.f32 %v6016_v9, %v6006_v35  ;;  %7182 = vmatprep.subr.mxu1 %v10675_v38  ;;  %v6757_v9 = vld [vmem:[%s11051_s6] ss:$0 sm:$0xff]  ;;  %s6336_s10 = sshll.u32 %s7324_s20, 4  ;;  %s6337_s10 = int_to_ptr.vmem [resolvable:$true] %s6336_s10 }
0x10f4   :  { %v6022_v21 = vrot.slane %v6021_v26, 4  ;;  %7183 = vmatpush3.msra.mxu1 %v6242_v60  ;;  %s7267_s11 = scalar_lea.vmem %s6337_s10, 32  ;;  %p7272_p1 = scmp.lt.s32.totalorder %s6337_s10, %s6337_s10 }
0x10f5   :  { %v6029_v52 = vsel %vm6028_vm4, %v6020_v34, 0.0  ;;  %7184 = vmatprep.subr.mxu1 %v10675_v38  ;;  %p7268_p0 = scmp.ne.s32.totalorder %s6337_s10, %s7267_s11  ;;  %p7273_p2 = scmp.lt.s32.totalorder %s7267_s11, %s7267_s11 }
0x10f6   :  { %v6023_v57 = vadd.f32 %v6022_v21, %v6021_v26  ;;  %v6030_v28 = vrot.slane %v6029_v52, 4  ;;  %7185 = vmatpush3.msra.mxu1 %v6241_v48 }
0x10f7   :  { %7186 = vmatprep.subr.mxu1 %v10675_v38  ;;  %p7274_p3 = por %p7273_p2, %p7272_p1 }
0x10f8   :  { %v6024_v2 = vrot.slane %v6023_v57, 2  ;;  %v6031_v49 = vadd.f32 %v6030_v28, %v6029_v52  ;;  %7187 = vmatpush3.msra.mxu1 %v6240_v23 }
0x10f9   :  { %7188 = vmatprep.subr.mxu1 %v10675_v38  ;;  %p7275_p4 = pnand %p7274_p3, %p7268_p0 }
0x10fa   :  { %v6025_v47 = vadd.f32 %v6024_v2, %v6023_v57  ;;  %v6032_v63 = vrot.slane %v6031_v49, 2  ;;  %7189 = vmatpush3.msra.mxu1 %v6239_v7 }
0x10fb   :  { %7190 = vmatprep.subr.mxu1 %v10675_v38 }
0x10fc   :  { %v6026_v11 = vrot.slane %v6025_v47, 1  ;;  %v6033_v15 = vadd.f32 %v6032_v63, %v6031_v49  ;;  %7191 = vmatpush3.msra.mxu1 %v6238_v17 }
0x10fd   :  { %7192 = vmatprep.subr.mxu1 %v10675_v38 }
0x10fe   :  { %v6027_v29 = vadd.f32 %v6026_v11, %v6025_v47  ;;  %v6034_v32 = vrot.slane %v6033_v15, 1  ;;  %7193 = vmatpush3.msra.mxu1 %v6237_v14 }
0x1100   :  { %v6037_v51 = vmul.f32 0.5, %v6027_v29  ;;  %v6035_v12 = vadd.f32 %v6034_v32, %v6033_v15 }
0x1102   :  { %v6039_v46 = vsub.f32 %v6019_v42, %v6037_v51  ;;  %v6038_v22 = vmul.f32 0.5, %v6035_v12 }
0x1104   :  { %v6041_v24 = vmul.f32 %v6039_v46, %v6039_v46  ;;  %v6040_v10 = vsub.f32 %v6020_v34, %v6038_v22 }
0x1106   :  { %v6043_v50 = vsel %vm1271_vm5, %v6041_v24, 0.0  ;;  %v6042_v36 = vmul.f32 %v6040_v10, %v6040_v10  ;;  %vm6199_vm5 = vcmask 402432  }
0x1107   :  { %v6044_v39 = vrot.slane %v6043_v50, 4 }
0x1108   :  { %v6050_v59 = vsel %vm6028_vm4, %v6042_v36, 0.0 }
0x1109   :  { %v6045_v6 = vadd.f32 %v6044_v39, %v6043_v50  ;;  %v6051_v31 = vrot.slane %v6050_v59, 4  ;;  %v6759_v50 = vld [vmem:[%s11052_s7] ss:$0 sm:$0xff] }
0x110a   :  { %v6760_v39 = vld [vmem:[%s7483_s12] ss:$0 sm:$0xff] }
0x110b   :  { %v6046_v41 = vrot.slane %v6045_v6, 2  ;;  %v6052_v62 = vadd.f32 %v6051_v31, %v6050_v59  ;;  %v6761_v31 = vld [vmem:[%s7493_s27] ss:$0 sm:$0xff] }
0x110d   :  { %v6047_v13 = vadd.f32 %v6046_v41, %v6045_v6  ;;  %v6053_v54 = vrot.slane %v6052_v62, 2 }
0x110f   :  { %v6048_v19 = vrot.slane %v6047_v13, 1  ;;  %v6054_v3 = vadd.f32 %v6053_v54, %v6052_v62 }
0x1111   :  { %v6049_v53 = vadd.f32 %v6048_v19, %v6047_v13  ;;  %v6055_v30 = vrot.slane %v6054_v3, 1 }
0x1113   :  { %v6057_v18 = vmul.f32 0.5, %v6049_v53  ;;  %v6056_v8 = vadd.f32 %v6055_v30, %v6054_v3 }
0x1115   :  { %v6059_v40 = vadd.f32 1e-05, %v6057_v18  ;;  %v6058_v45 = vmul.f32 0.5, %v6056_v8 }
0x1117   :  { %7237 = vrsqrt.f32 %v6059_v40  ;;  %v6060_v4 = vadd.f32 1e-05, %v6058_v45 }
0x1119   :  { %7239 = vrsqrt.f32 %v6060_v4 }
0x1124   :  { %v7238_v61 = vpop.eup %7237 }
0x1125   :  { %v6063_v55 = vmul.f32 %v7238_v61, %v6039_v46 }
0x1126   :  { %v7240_v16 = vpop.eup %7239 }
0x1127   :  { %v6064_v43 = vmul.f32 %v7240_v16, %v6040_v10  ;;  %v6077_v1 = vmul.f32 %v6070_v37, %v6063_v55 }
0x1129   :  { %v6078_v33 = vmul.f32 %v6074_v27, %v6064_v43  ;;  %v6091_v25 = vadd.f32 %v6084_v56, %v6077_v1 }
0x112b   :  { %v6092_v58 = vadd.f32 %v6088_v5, %v6078_v33 }
0x112d   :  { %6758 = vmatprep.mubr.msk.f32.mxu0 %vm6125_vm6, %v6092_v58 }
0x112e   :  { %6194 = vmatmul.mubr.f32.vlgmr.msra.gmra.mxu0 %v6091_v25 }
0x11ee   :  { %v6195_v42 = vpop.f32.mrf.mxu0 }
0x11ef   :  { %v6196_v35 = vadd.f32 %v6757_v9, %v6195_v42 }
0x11f0   :  { %v6197_v26 = vpop.f32.mrf.mxu0 }
0x11f1   :  { %v6200_v34 = vsel %vm6199_vm5, %v6196_v35, 0.0 }
0x11f2   :  { %v6201_v21 = vrot.slane %v6200_v34, 4 }
0x11f4   :  { %v6202_v52 = vadd.f32 %v6201_v21, %v6200_v34 }
0x11f6   :  { %v6203_v57 = vrot.slane %v6202_v52, 2 }
0x11f8   :  { %v6204_v28 = vadd.f32 %v6203_v57, %v6202_v52 }
0x11fa   :  { %v6205_v2 = vrot.slane %v6204_v28, 1 }
0x11fc   :  { %v6206_v49 = vadd.f32 %v6205_v2, %v6204_v28 }
0x11fe   :  { %v6207_v47 = vmul.f32 0.5, %v6206_v49 }
0x1200   :  { %v6208_v63 = vsub.f32 %v6196_v35, %v6207_v47 }
0x1202   :  { %v6209_v11 = vmul.f32 %v6208_v63, %v6208_v63 }
0x1204   :  { %v6210_v38 = vsel %vm6199_vm5, %v6209_v11, 0.0 }
0x1205   :  { %v6211_v15 = vrot.slane %v6210_v38, 4 }
0x1207   :  { %v6212_v29 = vadd.f32 %v6211_v15, %v6210_v38 }
0x1209   :  { %v6213_v32 = vrot.slane %v6212_v29, 2 }
0x120b   :  { %v6214_v51 = vadd.f32 %v6213_v32, %v6212_v29 }
0x120d   :  { %v6215_v12 = vrot.slane %v6214_v51, 1 }
0x120f   :  { %v6216_v46 = vadd.f32 %v6215_v12, %v6214_v51 }
0x1211   :  { %v6217_v22 = vmul.f32 0.5, %v6216_v46 }
0x1213   :  { %v6218_v24 = vadd.f32 1e-05, %v6217_v22 }
0x1215   :  { %7241 = vrsqrt.f32 %v6218_v24 }
0x1222   :  { %v7242_v10 = vpop.eup %7241 }
0x1223   :  { %v6220_v36 = vmul.f32 %v7242_v10, %v6208_v63 }
0x1225   :  { %v6228_v59 = vmul.f32 %v6759_v50, %v6220_v36 }
0x1227   :  { %v6236_v6 = vadd.f32 %v6760_v39, %v6228_v59 }
0x1229   :  { %7195 = vmatmul.mubr.msk.f32.vlgmr.msra.gmra.mxu1 %vm6251_vm7, %v6236_v6 }
0x12e9   :  { %v6324_v41 = vpop.f32.mrf.mxu1 }
0x12ea   :  { %v6325_v62 = vadd.f32 %v6761_v31, %v6324_v41 }
0x12eb   :  { %v7196_v13 = vpop.f32.mrf.mxu1 }
0x12ec   :  { %6329 = vst.msk [vmem:[#allocation2] sm:$0x3] %vm6328_vm8, %v6325_v62 }
0x12ed   :  { %7278 = shalt.err (!%p7275_p4)
}
0x12ee   :  { %6339 = dma.vmem_to_hbm [thread:$0]  %s6337_s10, 32, %s7498_s4, [#allocation3]  }
0x12ef   :  { %7287 = dma.done.wait [#allocation3], 32  }
0x12f0   :  { %7288 = vsyncadd [#allocation3], 4294967264 }
0x12f1   :  { %6343 = vsyncpa [#allocation3], 1 }

</bundles_post_ra>
